<compile_context>
chip_gen: v5e
topology: v5e:2x2
jax: 0.10.0
libtpu: 0.0.40
codegen_flags: <defaults>
</compile_context>

<pallas_src>
import numpy as np
import jax
import jax.numpy as jnp
from jax import lax
from jax.experimental import pallas as pl
from jax.experimental.pallas import tpu as pltpu


# ----------------------------- problem geometry -----------------------------
# fc1 expects 1024 = 64*4*4 features, which forces 28x28 inputs (MNIST-like):
# conv1 -> 9x9x25, conv2 -> 9x9x64, pool -> 4x4x64.
H_IN = W_IN = 28
K1, S1 = 12, 2
OH1 = OW1 = (H_IN - K1) // S1 + 1          # 9
P1 = OH1 * OW1                             # 81 conv1/conv2 output positions
K1F = K1 * K1 * 1                          # 144 conv1 patch features
K2, PAD2 = 5, 2
OH2 = OW2 = OH1                            # 9 (same padding)
PH = PW = OH2 // 2                         # 4 pooled rows/cols (floor mode)
NPOOL = PH * PW                            # 16 pooled positions
C1, C2, NCLS = 25, 64, 10
CP = 128                                   # padded channel / lane width
FCK = NPOOL * CP                           # 2048 padded fc reduction dim


# --------------------- constant selection matrices (numpy) ------------------

def _conv2_shift_matrices():
    """S[t] @ y1 gives the (zero padded) spatial shift of y1 for tap t."""
    s = np.zeros((K2 * K2, P1, P1), np.float32)
    for di in range(K2):
        for dj in range(K2):
            t = di * K2 + dj
            dh, dw = di - PAD2, dj - PAD2
            for oh in range(OH2):
                for ow in range(OW2):
                    sh, sw = oh + dh, ow + dw
                    if 0 <= sh < OH1 and 0 <= sw < OW1:
                        s[t, oh * OW2 + ow, sh * OW1 + sw] = 1.0
    return s


def _pool_select_matrices():
    """Q[a*2+b] @ y2 gathers corner (a, b) of every 2x2 pooling window."""
    q = np.zeros((4, NPOOL, P1), np.float32)
    for a in range(2):
        for b in range(2):
            for ph in range(PH):
                for pw in range(PW):
                    q[a * 2 + b, ph * PW + pw,
                      (2 * ph + a) * OW2 + (2 * pw + b)] = 1.0
    return q


# ------------------------------ fused kernel --------------------------------

def _cnn_fused_kernel(p1_ref, w1_ref, b1_ref, s2_ref, w2_ref, b2_ref,
                      q_ref, wfc_ref, bfc_ref, o_ref):
    f32 = jnp.float32
    bf16 = jnp.bfloat16

    # conv1 (im2col matmul) + bias + ReLU: (81,144) @ (144,128).
    y1 = jnp.dot(p1_ref[0], w1_ref[...], preferred_element_type=f32)
    y1 = jnp.maximum(y1 + b1_ref[...], 0.0)
    y1b = y1.astype(bf16)

    # conv2 (5x5, pad 2) + bias + ReLU.  For each of the 25 taps a constant
    # 0/1 selection matrix builds the spatially shifted (zero padded) copy of
    # y1 on the MXU, which is then contracted with that tap's (Cin, Cout)
    # weight block.  Everything stays in VMEM / vregs.
    acc = jnp.zeros((P1, CP), f32)
    for t in range(K2 * K2):
        xt = jnp.dot(s2_ref[t], y1b, preferred_element_type=f32)     # (81,128)
        acc = acc + jnp.dot(xt.astype(bf16), w2_ref[t],
                            preferred_element_type=f32)
    y2 = jnp.maximum(acc + b2_ref[...], 0.0)
    y2b = y2.astype(bf16)

    # 2x2 max-pool: gather the four window corners with selection matmuls,
    # reduce with elementwise max.
    c00 = jnp.dot(q_ref[0], y2b, preferred_element_type=f32)          # (16,128)
    c01 = jnp.dot(q_ref[1], y2b, preferred_element_type=f32)
    c10 = jnp.dot(q_ref[2], y2b, preferred_element_type=f32)
    c11 = jnp.dot(q_ref[3], y2b, preferred_element_type=f32)
    pooled = jnp.maximum(jnp.maximum(c00, c01), jnp.maximum(c10, c11))

    # Flatten (PyTorch NCHW order is folded into wfc) + fc.  The concat is
    # along the lane dim at 128-aligned offsets -> lane-dense.
    flat = jnp.concatenate([pooled[p:p + 1, :] for p in range(NPOOL)], axis=1)
    logits = jnp.dot(flat.astype(bf16), wfc_ref[...],
                     preferred_element_type=f32)
    o_ref[0] = logits + bfc_ref[...]


# --------------------------- parameter preparation ---------------------------

def prepare_params(params):
    """One-time weight layout prep (hoisted out of the traced forward)."""
    bf16 = jnp.bfloat16
    w1, b1 = params["w1"], params["b1"]            # (25,1,12,12), (25,)
    w2, b2 = params["w2"], params["b2"]            # (64,25,5,5),  (64,)
    wfc, bfc = params["wfc"], params["bfc"]        # (10,1024),    (10,)

    # conv1: OIHW -> (cin*kh*kw, Cout) matrix, Cout padded to 128 lanes.
    w1m = jnp.zeros((K1F, CP), jnp.float32).at[:, :C1].set(
        w1.reshape(C1, K1F).T)
    b1p = jnp.zeros((1, CP), jnp.float32).at[0, :C1].set(b1)

    # conv2: per-tap (Cin, Cout) blocks, zero padded to 128x128.
    w2t = jnp.transpose(w2, (2, 3, 1, 0)).reshape(K2 * K2, C1, C2)
    w2p = jnp.zeros((K2 * K2, CP, CP), jnp.float32).at[:, :C1, :C2].set(w2t)
    b2p = jnp.zeros((1, CP), jnp.float32).at[0, :C2].set(b2)

    # fc: fold the pooled NCHW flatten permutation into the weight.
    # kernel flat index = p*128 + c   <->   PyTorch flat index = c*16 + p.
    wfc_pcn = jnp.transpose(wfc.reshape(NCLS, C2, NPOOL), (2, 1, 0))  # (16,64,10)
    wfc_v = (jnp.zeros((NPOOL, CP, CP), jnp.float32)
             .at[:, :C2, :NCLS].set(wfc_pcn).reshape(FCK, CP))
    bfc_p = jnp.zeros((1, CP), jnp.float32).at[0, :NCLS].set(bfc)

    return {
        "w1": w1m.astype(bf16), "b1": b1p,
        "s2": jnp.asarray(_conv2_shift_matrices(), bf16),
        "w2": w2p.astype(bf16), "b2": b2p,
        "q": jnp.asarray(_pool_select_matrices(), bf16),
        "wfc": wfc_v.astype(bf16), "bfc": bfc_p,
    }


# ------------------------------- forward pass --------------------------------

def cnn_forward(x_nchw, prepped):
    B = x_nchw.shape[0]
    # conv1 im2col patches via ONE fused XLA op (feature order is
    # channel-major (cin, kh, kw), matching w1.reshape(25, 144)).
    patches = lax.conv_general_dilated_patches(
        x_nchw.astype(jnp.bfloat16), (K1, K1), (S1, S1), "VALID",
        dimension_numbers=("NCHW", "OIHW", "NHWC"))       # (B, 9, 9, 144)
    patches = patches.reshape(B, P1, K1F)

    out = pl.pallas_call(
        _cnn_fused_kernel,
        out_shape=jax.ShapeDtypeStruct((B, 1, CP), jnp.float32),
        grid=(B,),
        in_specs=[
            pl.BlockSpec((1, P1, K1F), lambda i: (i, 0, 0)),        # patches
            pl.BlockSpec((K1F, CP), lambda i: (0, 0)),              # w1
            pl.BlockSpec((1, CP), lambda i: (0, 0)),                # b1
            pl.BlockSpec((K2 * K2, P1, P1), lambda i: (0, 0, 0)),   # shift mats
            pl.BlockSpec((K2 * K2, CP, CP), lambda i: (0, 0, 0)),   # w2 taps
            pl.BlockSpec((1, CP), lambda i: (0, 0)),                # b2
            pl.BlockSpec((4, NPOOL, P1), lambda i: (0, 0, 0)),      # pool mats
            pl.BlockSpec((FCK, CP), lambda i: (0, 0)),              # wfc
            pl.BlockSpec((1, CP), lambda i: (0, 0)),                # bfc
        ],
        out_specs=pl.BlockSpec((1, 1, CP), lambda i: (i, 0, 0)),
        compiler_params=pltpu.CompilerParams(
            dimension_semantics=("parallel",)),
    )(patches, prepped["w1"], prepped["b1"], prepped["s2"], prepped["w2"],
      prepped["b2"], prepped["q"], prepped["wfc"], prepped["bfc"])

    return out.reshape(B, CP)[:, :NCLS]


# ------------------------ pure-XLA reference (f32) ---------------------------

def cnn_reference(x_nchw, params):
    dn1 = jax.lax.conv_dimension_numbers(
        x_nchw.shape, params["w1"].shape, ("NCHW", "OIHW", "NCHW"))
    y1 = jax.lax.conv_general_dilated(
        x_nchw, params["w1"], (2, 2), "VALID", dimension_numbers=dn1)
    y1 = jax.nn.relu(y1 + params["b1"][None, :, None, None])
    dn2 = jax.lax.conv_dimension_numbers(
        y1.shape, params["w2"].shape, ("NCHW", "OIHW", "NCHW"))
    y2 = jax.lax.conv_general_dilated(
        y1, params["w2"], (1, 1), ((2, 2), (2, 2)), dimension_numbers=dn2)
    y2 = jax.nn.relu(y2 + params["b2"][None, :, None, None])
    p = jax.lax.reduce_window(
        y2, -jnp.inf, jax.lax.max, (1, 1, 2, 2), (1, 1, 2, 2), "VALID")
    flat = p.reshape(p.shape[0], -1)
    return flat @ params["wfc"].T + params["bfc"]


def init_params(key):
    ks = jax.random.split(key, 6)

    def uinit(k, shape, fan_in):
        bound = 1.0 / float(fan_in) ** 0.5
        return jax.random.uniform(k, shape, jnp.float32, -bound, bound)

    return {
        "w1": uinit(ks[0], (C1, 1, K1, K1), 1 * K1 * K1),
        "b1": uinit(ks[1], (C1,), 1 * K1 * K1),
        "w2": uinit(ks[2], (C2, C1, K2, K2), C1 * K2 * K2),
        "b2": uinit(ks[3], (C2,), C1 * K2 * K2),
        "wfc": uinit(ks[4], (NCLS, C2 * NPOOL), C2 * NPOOL),
        "bfc": uinit(ks[5], (NCLS,), C2 * NPOOL),
    }


if __name__ == "__main__":
    key = jax.random.PRNGKey(0)
    pkey, xkey = jax.random.split(key)
    params = init_params(pkey)
    prepped = prepare_params(params)      # one-time weight layout prep

    x = jax.random.normal(xkey, (2, 1, 28, 28), jnp.float32)

    fwd = jax.jit(cnn_forward)
    out = jax.block_until_ready(fwd(x, prepped))
    assert out.shape == (2, NCLS)

    ref = cnn_reference(x, params)
    np.testing.assert_allclose(np.asarray(out), np.asarray(ref),
                               rtol=3e-2, atol=3e-2)
    print("KERNEL_OK")
</pallas_src>

<mosaic_0001>
module attributes {stable_mosaic.version = 11 : i64} {
  func.func @_cnn_fused_kernel(%arg0: i32, %arg1: memref<1x81x144xbf16, #tpu.memory_space<vmem>>, %arg2: memref<144x128xbf16, #tpu.memory_space<vmem>>, %arg3: memref<1x128xf32, #tpu.memory_space<vmem>>, %arg4: memref<25x81x81xbf16, #tpu.memory_space<vmem>>, %arg5: memref<25x128x128xbf16, #tpu.memory_space<vmem>>, %arg6: memref<1x128xf32, #tpu.memory_space<vmem>>, %arg7: memref<4x16x81xbf16, #tpu.memory_space<vmem>>, %arg8: memref<2048x128xbf16, #tpu.memory_space<vmem>>, %arg9: memref<1x128xf32, #tpu.memory_space<vmem>>, %arg10: memref<1x1x128xf32, #tpu.memory_space<vmem>>) attributes {dimension_semantics = [#tpu.dimension_semantics<parallel>], iteration_bounds = array<i64: 2>, scalar_prefetch = 0 : i64, scratch_operands = 0 : i64, tpu.core_type = #tpu.core_type<tc>, window_params = [{transform_indices = @transform_0, window_bounds = array<i64: 1, 81, 144>}, {pipeline_mode = #tpu.pipeline_mode<synchronous>, transform_indices = @transform_1, window_bounds = array<i64: 144, 128>}, {pipeline_mode = #tpu.pipeline_mode<synchronous>, transform_indices = @transform_2, window_bounds = array<i64: 1, 128>}, {pipeline_mode = #tpu.pipeline_mode<synchronous>, transform_indices = @transform_3, window_bounds = array<i64: 25, 81, 81>}, {pipeline_mode = #tpu.pipeline_mode<synchronous>, transform_indices = @transform_4, window_bounds = array<i64: 25, 128, 128>}, {pipeline_mode = #tpu.pipeline_mode<synchronous>, transform_indices = @transform_5, window_bounds = array<i64: 1, 128>}, {pipeline_mode = #tpu.pipeline_mode<synchronous>, transform_indices = @transform_6, window_bounds = array<i64: 4, 16, 81>}, {pipeline_mode = #tpu.pipeline_mode<synchronous>, transform_indices = @transform_7, window_bounds = array<i64: 2048, 128>}, {pipeline_mode = #tpu.pipeline_mode<synchronous>, transform_indices = @transform_8, window_bounds = array<i64: 1, 128>}, {transform_indices = @transform_9, window_bounds = array<i64: 1, 1, 128>}]} {
    %c0 = arith.constant 0 : index
    %c0_0 = arith.constant 0 : index
    %c0_1 = arith.constant 0 : index
    %0 = vector.load %arg1[%c0, %c0_0, %c0_1] : memref<1x81x144xbf16, #tpu.memory_space<vmem>>, vector<1x81x144xbf16>
    %1 = vector.shape_cast %0 : vector<1x81x144xbf16> to vector<81x144xbf16>
    %c0_2 = arith.constant 0 : index
    %c0_3 = arith.constant 0 : index
    %2 = vector.load %arg2[%c0_2, %c0_3] : memref<144x128xbf16, #tpu.memory_space<vmem>>, vector<144x128xbf16>
    %cst = arith.constant dense<0.000000e+00> : vector<81x128xf32>
    %3 = tpu.matmul %1, %2, %cst {dimension_numbers = #tpu.dot_dimension_numbers<[1], [0], [0], [1], [0, 0, 1, 1], [], []>} : vector<81x144xbf16>, vector<144x128xbf16>, vector<81x128xf32> -> vector<81x128xf32>
    %c0_4 = arith.constant 0 : index
    %c0_5 = arith.constant 0 : index
    %4 = vector.load %arg3[%c0_4, %c0_5] : memref<1x128xf32, #tpu.memory_space<vmem>>, vector<1x128xf32>
    %5 = vector.broadcast %4 : vector<1x128xf32> to vector<81x128xf32>
    %6 = arith.addf %3, %5 : vector<81x128xf32>
    %cst_6 = arith.constant 0.000000e+00 : f32
    %7 = vector.broadcast %cst_6 : f32 to vector<81x128xf32>
    %8 = arith.maximumf %6, %7 : vector<81x128xf32>
    %9 = arith.truncf %8 : vector<81x128xf32> to vector<81x128xbf16>
    %cst_7 = arith.constant 0.000000e+00 : f32
    %10 = vector.broadcast %cst_7 : f32 to vector<81x128xf32>
    %c0_8 = arith.constant 0 : index
    %c0_9 = arith.constant 0 : index
    %c0_10 = arith.constant 0 : index
    %11 = vector.load %arg4[%c0_8, %c0_9, %c0_10] : memref<25x81x81xbf16, #tpu.memory_space<vmem>>, vector<1x81x81xbf16>
    %12 = vector.shape_cast %11 : vector<1x81x81xbf16> to vector<81x81xbf16>
    %cst_11 = arith.constant dense<0.000000e+00> : vector<81x128xf32>
    %13 = tpu.matmul %12, %9, %cst_11 {dimension_numbers = #tpu.dot_dimension_numbers<[1], [0], [0], [1], [0, 0, 1, 1], [], []>} : vector<81x81xbf16>, vector<81x128xbf16>, vector<81x128xf32> -> vector<81x128xf32>
    %14 = arith.truncf %13 : vector<81x128xf32> to vector<81x128xbf16>
    %c0_12 = arith.constant 0 : index
    %c0_13 = arith.constant 0 : index
    %c0_14 = arith.constant 0 : index
    %15 = vector.load %arg5[%c0_12, %c0_13, %c0_14] : memref<25x128x128xbf16, #tpu.memory_space<vmem>>, vector<1x128x128xbf16>
    %16 = vector.shape_cast %15 : vector<1x128x128xbf16> to vector<128x128xbf16>
    %cst_15 = arith.constant dense<0.000000e+00> : vector<81x128xf32>
    %17 = tpu.matmul %14, %16, %cst_15 {dimension_numbers = #tpu.dot_dimension_numbers<[1], [0], [0], [1], [0, 0, 1, 1], [], []>} : vector<81x128xbf16>, vector<128x128xbf16>, vector<81x128xf32> -> vector<81x128xf32>
    %18 = arith.addf %10, %17 : vector<81x128xf32>
    %c1 = arith.constant 1 : index
    %c0_16 = arith.constant 0 : index
    %c0_17 = arith.constant 0 : index
    %19 = vector.load %arg4[%c1, %c0_16, %c0_17] : memref<25x81x81xbf16, #tpu.memory_space<vmem>>, vector<1x81x81xbf16>
    %20 = vector.shape_cast %19 : vector<1x81x81xbf16> to vector<81x81xbf16>
    %cst_18 = arith.constant dense<0.000000e+00> : vector<81x128xf32>
    %21 = tpu.matmul %20, %9, %cst_18 {dimension_numbers = #tpu.dot_dimension_numbers<[1], [0], [0], [1], [0, 0, 1, 1], [], []>} : vector<81x81xbf16>, vector<81x128xbf16>, vector<81x128xf32> -> vector<81x128xf32>
    %22 = arith.truncf %21 : vector<81x128xf32> to vector<81x128xbf16>
    %c1_19 = arith.constant 1 : index
    %c0_20 = arith.constant 0 : index
    %c0_21 = arith.constant 0 : index
    %23 = vector.load %arg5[%c1_19, %c0_20, %c0_21] : memref<25x128x128xbf16, #tpu.memory_space<vmem>>, vector<1x128x128xbf16>
    %24 = vector.shape_cast %23 : vector<1x128x128xbf16> to vector<128x128xbf16>
    %cst_22 = arith.constant dense<0.000000e+00> : vector<81x128xf32>
    %25 = tpu.matmul %22, %24, %cst_22 {dimension_numbers = #tpu.dot_dimension_numbers<[1], [0], [0], [1], [0, 0, 1, 1], [], []>} : vector<81x128xbf16>, vector<128x128xbf16>, vector<81x128xf32> -> vector<81x128xf32>
    %26 = arith.addf %18, %25 : vector<81x128xf32>
    %c2 = arith.constant 2 : index
    %c0_23 = arith.constant 0 : index
    %c0_24 = arith.constant 0 : index
    %27 = vector.load %arg4[%c2, %c0_23, %c0_24] : memref<25x81x81xbf16, #tpu.memory_space<vmem>>, vector<1x81x81xbf16>
    %28 = vector.shape_cast %27 : vector<1x81x81xbf16> to vector<81x81xbf16>
    %cst_25 = arith.constant dense<0.000000e+00> : vector<81x128xf32>
    %29 = tpu.matmul %28, %9, %cst_25 {dimension_numbers = #tpu.dot_dimension_numbers<[1], [0], [0], [1], [0, 0, 1, 1], [], []>} : vector<81x81xbf16>, vector<81x128xbf16>, vector<81x128xf32> -> vector<81x128xf32>
    %30 = arith.truncf %29 : vector<81x128xf32> to vector<81x128xbf16>
    %c2_26 = arith.constant 2 : index
    %c0_27 = arith.constant 0 : index
    %c0_28 = arith.constant 0 : index
    %31 = vector.load %arg5[%c2_26, %c0_27, %c0_28] : memref<25x128x128xbf16, #tpu.memory_space<vmem>>, vector<1x128x128xbf16>
    %32 = vector.shape_cast %31 : vector<1x128x128xbf16> to vector<128x128xbf16>
    %cst_29 = arith.constant dense<0.000000e+00> : vector<81x128xf32>
    %33 = tpu.matmul %30, %32, %cst_29 {dimension_numbers = #tpu.dot_dimension_numbers<[1], [0], [0], [1], [0, 0, 1, 1], [], []>} : vector<81x128xbf16>, vector<128x128xbf16>, vector<81x128xf32> -> vector<81x128xf32>
    %34 = arith.addf %26, %33 : vector<81x128xf32>
    %c3 = arith.constant 3 : index
    %c0_30 = arith.constant 0 : index
    %c0_31 = arith.constant 0 : index
    %35 = vector.load %arg4[%c3, %c0_30, %c0_31] : memref<25x81x81xbf16, #tpu.memory_space<vmem>>, vector<1x81x81xbf16>
    %36 = vector.shape_cast %35 : vector<1x81x81xbf16> to vector<81x81xbf16>
    %cst_32 = arith.constant dense<0.000000e+00> : vector<81x128xf32>
    %37 = tpu.matmul %36, %9, %cst_32 {dimension_numbers = #tpu.dot_dimension_numbers<[1], [0], [0], [1], [0, 0, 1, 1], [], []>} : vector<81x81xbf16>, vector<81x128xbf16>, vector<81x128xf32> -> vector<81x128xf32>
    %38 = arith.truncf %37 : vector<81x128xf32> to vector<81x128xbf16>
    %c3_33 = arith.constant 3 : index
    %c0_34 = arith.constant 0 : index
    %c0_35 = arith.constant 0 : index
    %39 = vector.load %arg5[%c3_33, %c0_34, %c0_35] : memref<25x128x128xbf16, #tpu.memory_space<vmem>>, vector<1x128x128xbf16>
    %40 = vector.shape_cast %39 : vector<1x128x128xbf16> to vector<128x128xbf16>
    %cst_36 = arith.constant dense<0.000000e+00> : vector<81x128xf32>
    %41 = tpu.matmul %38, %40, %cst_36 {dimension_numbers = #tpu.dot_dimension_numbers<[1], [0], [0], [1], [0, 0, 1, 1], [], []>} : vector<81x128xbf16>, vector<128x128xbf16>, vector<81x128xf32> -> vector<81x128xf32>
    %42 = arith.addf %34, %41 : vector<81x128xf32>
    %c4 = arith.constant 4 : index
    %c0_37 = arith.constant 0 : index
    %c0_38 = arith.constant 0 : index
    %43 = vector.load %arg4[%c4, %c0_37, %c0_38] : memref<25x81x81xbf16, #tpu.memory_space<vmem>>, vector<1x81x81xbf16>
    %44 = vector.shape_cast %43 : vector<1x81x81xbf16> to vector<81x81xbf16>
    %cst_39 = arith.constant dense<0.000000e+00> : vector<81x128xf32>
    %45 = tpu.matmul %44, %9, %cst_39 {dimension_numbers = #tpu.dot_dimension_numbers<[1], [0], [0], [1], [0, 0, 1, 1], [], []>} : vector<81x81xbf16>, vector<81x128xbf16>, vector<81x128xf32> -> vector<81x128xf32>
    %46 = arith.truncf %45 : vector<81x128xf32> to vector<81x128xbf16>
    %c4_40 = arith.constant 4 : index
    %c0_41 = arith.constant 0 : index
    %c0_42 = arith.constant 0 : index
    %47 = vector.load %arg5[%c4_40, %c0_41, %c0_42] : memref<25x128x128xbf16, #tpu.memory_space<vmem>>, vector<1x128x128xbf16>
    %48 = vector.shape_cast %47 : vector<1x128x128xbf16> to vector<128x128xbf16>
    %cst_43 = arith.constant dense<0.000000e+00> : vector<81x128xf32>
    %49 = tpu.matmul %46, %48, %cst_43 {dimension_numbers = #tpu.dot_dimension_numbers<[1], [0], [0], [1], [0, 0, 1, 1], [], []>} : vector<81x128xbf16>, vector<128x128xbf16>, vector<81x128xf32> -> vector<81x128xf32>
    %50 = arith.addf %42, %49 : vector<81x128xf32>
    %c5 = arith.constant 5 : index
    %c0_44 = arith.constant 0 : index
    %c0_45 = arith.constant 0 : index
    %51 = vector.load %arg4[%c5, %c0_44, %c0_45] : memref<25x81x81xbf16, #tpu.memory_space<vmem>>, vector<1x81x81xbf16>
    %52 = vector.shape_cast %51 : vector<1x81x81xbf16> to vector<81x81xbf16>
    %cst_46 = arith.constant dense<0.000000e+00> : vector<81x128xf32>
    %53 = tpu.matmul %52, %9, %cst_46 {dimension_numbers = #tpu.dot_dimension_numbers<[1], [0], [0], [1], [0, 0, 1, 1], [], []>} : vector<81x81xbf16>, vector<81x128xbf16>, vector<81x128xf32> -> vector<81x128xf32>
    %54 = arith.truncf %53 : vector<81x128xf32> to vector<81x128xbf16>
    %c5_47 = arith.constant 5 : index
    %c0_48 = arith.constant 0 : index
    %c0_49 = arith.constant 0 : index
    %55 = vector.load %arg5[%c5_47, %c0_48, %c0_49] : memref<25x128x128xbf16, #tpu.memory_space<vmem>>, vector<1x128x128xbf16>
    %56 = vector.shape_cast %55 : vector<1x128x128xbf16> to vector<128x128xbf16>
    %cst_50 = arith.constant dense<0.000000e+00> : vector<81x128xf32>
    %57 = tpu.matmul %54, %56, %cst_50 {dimension_numbers = #tpu.dot_dimension_numbers<[1], [0], [0], [1], [0, 0, 1, 1], [], []>} : vector<81x128xbf16>, vector<128x128xbf16>, vector<81x128xf32> -> vector<81x128xf32>
    %58 = arith.addf %50, %57 : vector<81x128xf32>
    %c6 = arith.constant 6 : index
    %c0_51 = arith.constant 0 : index
    %c0_52 = arith.constant 0 : index
    %59 = vector.load %arg4[%c6, %c0_51, %c0_52] : memref<25x81x81xbf16, #tpu.memory_space<vmem>>, vector<1x81x81xbf16>
    %60 = vector.shape_cast %59 : vector<1x81x81xbf16> to vector<81x81xbf16>
    %cst_53 = arith.constant dense<0.000000e+00> : vector<81x128xf32>
    %61 = tpu.matmul %60, %9, %cst_53 {dimension_numbers = #tpu.dot_dimension_numbers<[1], [0], [0], [1], [0, 0, 1, 1], [], []>} : vector<81x81xbf16>, vector<81x128xbf16>, vector<81x128xf32> -> vector<81x128xf32>
    %62 = arith.truncf %61 : vector<81x128xf32> to vector<81x128xbf16>
    %c6_54 = arith.constant 6 : index
    %c0_55 = arith.constant 0 : index
    %c0_56 = arith.constant 0 : index
    %63 = vector.load %arg5[%c6_54, %c0_55, %c0_56] : memref<25x128x128xbf16, #tpu.memory_space<vmem>>, vector<1x128x128xbf16>
    %64 = vector.shape_cast %63 : vector<1x128x128xbf16> to vector<128x128xbf16>
    %cst_57 = arith.constant dense<0.000000e+00> : vector<81x128xf32>
    %65 = tpu.matmul %62, %64, %cst_57 {dimension_numbers = #tpu.dot_dimension_numbers<[1], [0], [0], [1], [0, 0, 1, 1], [], []>} : vector<81x128xbf16>, vector<128x128xbf16>, vector<81x128xf32> -> vector<81x128xf32>
    %66 = arith.addf %58, %65 : vector<81x128xf32>
    %c7 = arith.constant 7 : index
    %c0_58 = arith.constant 0 : index
    %c0_59 = arith.constant 0 : index
    %67 = vector.load %arg4[%c7, %c0_58, %c0_59] : memref<25x81x81xbf16, #tpu.memory_space<vmem>>, vector<1x81x81xbf16>
    %68 = vector.shape_cast %67 : vector<1x81x81xbf16> to vector<81x81xbf16>
    %cst_60 = arith.constant dense<0.000000e+00> : vector<81x128xf32>
    %69 = tpu.matmul %68, %9, %cst_60 {dimension_numbers = #tpu.dot_dimension_numbers<[1], [0], [0], [1], [0, 0, 1, 1], [], []>} : vector<81x81xbf16>, vector<81x128xbf16>, vector<81x128xf32> -> vector<81x128xf32>
    %70 = arith.truncf %69 : vector<81x128xf32> to vector<81x128xbf16>
    %c7_61 = arith.constant 7 : index
    %c0_62 = arith.constant 0 : index
    %c0_63 = arith.constant 0 : index
    %71 = vector.load %arg5[%c7_61, %c0_62, %c0_63] : memref<25x128x128xbf16, #tpu.memory_space<vmem>>, vector<1x128x128xbf16>
    %72 = vector.shape_cast %71 : vector<1x128x128xbf16> to vector<128x128xbf16>
    %cst_64 = arith.constant dense<0.000000e+00> : vector<81x128xf32>
    %73 = tpu.matmul %70, %72, %cst_64 {dimension_numbers = #tpu.dot_dimension_numbers<[1], [0], [0], [1], [0, 0, 1, 1], [], []>} : vector<81x128xbf16>, vector<128x128xbf16>, vector<81x128xf32> -> vector<81x128xf32>
    %74 = arith.addf %66, %73 : vector<81x128xf32>
    %c8 = arith.constant 8 : index
    %c0_65 = arith.constant 0 : index
    %c0_66 = arith.constant 0 : index
    %75 = vector.load %arg4[%c8, %c0_65, %c0_66] : memref<25x81x81xbf16, #tpu.memory_space<vmem>>, vector<1x81x81xbf16>
    %76 = vector.shape_cast %75 : vector<1x81x81xbf16> to vector<81x81xbf16>
    %cst_67 = arith.constant dense<0.000000e+00> : vector<81x128xf32>
    %77 = tpu.matmul %76, %9, %cst_67 {dimension_numbers = #tpu.dot_dimension_numbers<[1], [0], [0], [1], [0, 0, 1, 1], [], []>} : vector<81x81xbf16>, vector<81x128xbf16>, vector<81x128xf32> -> vector<81x128xf32>
    %78 = arith.truncf %77 : vector<81x128xf32> to vector<81x128xbf16>
    %c8_68 = arith.constant 8 : index
    %c0_69 = arith.constant 0 : index
    %c0_70 = arith.constant 0 : index
    %79 = vector.load %arg5[%c8_68, %c0_69, %c0_70] : memref<25x128x128xbf16, #tpu.memory_space<vmem>>, vector<1x128x128xbf16>
    %80 = vector.shape_cast %79 : vector<1x128x128xbf16> to vector<128x128xbf16>
    %cst_71 = arith.constant dense<0.000000e+00> : vector<81x128xf32>
    %81 = tpu.matmul %78, %80, %cst_71 {dimension_numbers = #tpu.dot_dimension_numbers<[1], [0], [0], [1], [0, 0, 1, 1], [], []>} : vector<81x128xbf16>, vector<128x128xbf16>, vector<81x128xf32> -> vector<81x128xf32>
    %82 = arith.addf %74, %81 : vector<81x128xf32>
    %c9 = arith.constant 9 : index
    %c0_72 = arith.constant 0 : index
    %c0_73 = arith.constant 0 : index
    %83 = vector.load %arg4[%c9, %c0_72, %c0_73] : memref<25x81x81xbf16, #tpu.memory_space<vmem>>, vector<1x81x81xbf16>
    %84 = vector.shape_cast %83 : vector<1x81x81xbf16> to vector<81x81xbf16>
    %cst_74 = arith.constant dense<0.000000e+00> : vector<81x128xf32>
    %85 = tpu.matmul %84, %9, %cst_74 {dimension_numbers = #tpu.dot_dimension_numbers<[1], [0], [0], [1], [0, 0, 1, 1], [], []>} : vector<81x81xbf16>, vector<81x128xbf16>, vector<81x128xf32> -> vector<81x128xf32>
    %86 = arith.truncf %85 : vector<81x128xf32> to vector<81x128xbf16>
    %c9_75 = arith.constant 9 : index
    %c0_76 = arith.constant 0 : index
    %c0_77 = arith.constant 0 : index
    %87 = vector.load %arg5[%c9_75, %c0_76, %c0_77] : memref<25x128x128xbf16, #tpu.memory_space<vmem>>, vector<1x128x128xbf16>
    %88 = vector.shape_cast %87 : vector<1x128x128xbf16> to vector<128x128xbf16>
    %cst_78 = arith.constant dense<0.000000e+00> : vector<81x128xf32>
    %89 = tpu.matmul %86, %88, %cst_78 {dimension_numbers = #tpu.dot_dimension_numbers<[1], [0], [0], [1], [0, 0, 1, 1], [], []>} : vector<81x128xbf16>, vector<128x128xbf16>, vector<81x128xf32> -> vector<81x128xf32>
    %90 = arith.addf %82, %89 : vector<81x128xf32>
    %c10 = arith.constant 10 : index
    %c0_79 = arith.constant 0 : index
    %c0_80 = arith.constant 0 : index
    %91 = vector.load %arg4[%c10, %c0_79, %c0_80] : memref<25x81x81xbf16, #tpu.memory_space<vmem>>, vector<1x81x81xbf16>
    %92 = vector.shape_cast %91 : vector<1x81x81xbf16> to vector<81x81xbf16>
    %cst_81 = arith.constant dense<0.000000e+00> : vector<81x128xf32>
    %93 = tpu.matmul %92, %9, %cst_81 {dimension_numbers = #tpu.dot_dimension_numbers<[1], [0], [0], [1], [0, 0, 1, 1], [], []>} : vector<81x81xbf16>, vector<81x128xbf16>, vector<81x128xf32> -> vector<81x128xf32>
    %94 = arith.truncf %93 : vector<81x128xf32> to vector<81x128xbf16>
    %c10_82 = arith.constant 10 : index
    %c0_83 = arith.constant 0 : index
    %c0_84 = arith.constant 0 : index
    %95 = vector.load %arg5[%c10_82, %c0_83, %c0_84] : memref<25x128x128xbf16, #tpu.memory_space<vmem>>, vector<1x128x128xbf16>
    %96 = vector.shape_cast %95 : vector<1x128x128xbf16> to vector<128x128xbf16>
    %cst_85 = arith.constant dense<0.000000e+00> : vector<81x128xf32>
    %97 = tpu.matmul %94, %96, %cst_85 {dimension_numbers = #tpu.dot_dimension_numbers<[1], [0], [0], [1], [0, 0, 1, 1], [], []>} : vector<81x128xbf16>, vector<128x128xbf16>, vector<81x128xf32> -> vector<81x128xf32>
    %98 = arith.addf %90, %97 : vector<81x128xf32>
    %c11 = arith.constant 11 : index
    %c0_86 = arith.constant 0 : index
    %c0_87 = arith.constant 0 : index
    %99 = vector.load %arg4[%c11, %c0_86, %c0_87] : memref<25x81x81xbf16, #tpu.memory_space<vmem>>, vector<1x81x81xbf16>
    %100 = vector.shape_cast %99 : vector<1x81x81xbf16> to vector<81x81xbf16>
    %cst_88 = arith.constant dense<0.000000e+00> : vector<81x128xf32>
    %101 = tpu.matmul %100, %9, %cst_88 {dimension_numbers = #tpu.dot_dimension_numbers<[1], [0], [0], [1], [0, 0, 1, 1], [], []>} : vector<81x81xbf16>, vector<81x128xbf16>, vector<81x128xf32> -> vector<81x128xf32>
    %102 = arith.truncf %101 : vector<81x128xf32> to vector<81x128xbf16>
    %c11_89 = arith.constant 11 : index
    %c0_90 = arith.constant 0 : index
    %c0_91 = arith.constant 0 : index
    %103 = vector.load %arg5[%c11_89, %c0_90, %c0_91] : memref<25x128x128xbf16, #tpu.memory_space<vmem>>, vector<1x128x128xbf16>
    %104 = vector.shape_cast %103 : vector<1x128x128xbf16> to vector<128x128xbf16>
    %cst_92 = arith.constant dense<0.000000e+00> : vector<81x128xf32>
    %105 = tpu.matmul %102, %104, %cst_92 {dimension_numbers = #tpu.dot_dimension_numbers<[1], [0], [0], [1], [0, 0, 1, 1], [], []>} : vector<81x128xbf16>, vector<128x128xbf16>, vector<81x128xf32> -> vector<81x128xf32>
    %106 = arith.addf %98, %105 : vector<81x128xf32>
    %c12 = arith.constant 12 : index
    %c0_93 = arith.constant 0 : index
    %c0_94 = arith.constant 0 : index
    %107 = vector.load %arg4[%c12, %c0_93, %c0_94] : memref<25x81x81xbf16, #tpu.memory_space<vmem>>, vector<1x81x81xbf16>
    %108 = vector.shape_cast %107 : vector<1x81x81xbf16> to vector<81x81xbf16>
    %cst_95 = arith.constant dense<0.000000e+00> : vector<81x128xf32>
    %109 = tpu.matmul %108, %9, %cst_95 {dimension_numbers = #tpu.dot_dimension_numbers<[1], [0], [0], [1], [0, 0, 1, 1], [], []>} : vector<81x81xbf16>, vector<81x128xbf16>, vector<81x128xf32> -> vector<81x128xf32>
    %110 = arith.truncf %109 : vector<81x128xf32> to vector<81x128xbf16>
    %c12_96 = arith.constant 12 : index
    %c0_97 = arith.constant 0 : index
    %c0_98 = arith.constant 0 : index
    %111 = vector.load %arg5[%c12_96, %c0_97, %c0_98] : memref<25x128x128xbf16, #tpu.memory_space<vmem>>, vector<1x128x128xbf16>
    %112 = vector.shape_cast %111 : vector<1x128x128xbf16> to vector<128x128xbf16>
    %cst_99 = arith.constant dense<0.000000e+00> : vector<81x128xf32>
    %113 = tpu.matmul %110, %112, %cst_99 {dimension_numbers = #tpu.dot_dimension_numbers<[1], [0], [0], [1], [0, 0, 1, 1], [], []>} : vector<81x128xbf16>, vector<128x128xbf16>, vector<81x128xf32> -> vector<81x128xf32>
    %114 = arith.addf %106, %113 : vector<81x128xf32>
    %c13 = arith.constant 13 : index
    %c0_100 = arith.constant 0 : index
    %c0_101 = arith.constant 0 : index
    %115 = vector.load %arg4[%c13, %c0_100, %c0_101] : memref<25x81x81xbf16, #tpu.memory_space<vmem>>, vector<1x81x81xbf16>
    %116 = vector.shape_cast %115 : vector<1x81x81xbf16> to vector<81x81xbf16>
    %cst_102 = arith.constant dense<0.000000e+00> : vector<81x128xf32>
    %117 = tpu.matmul %116, %9, %cst_102 {dimension_numbers = #tpu.dot_dimension_numbers<[1], [0], [0], [1], [0, 0, 1, 1], [], []>} : vector<81x81xbf16>, vector<81x128xbf16>, vector<81x128xf32> -> vector<81x128xf32>
    %118 = arith.truncf %117 : vector<81x128xf32> to vector<81x128xbf16>
    %c13_103 = arith.constant 13 : index
    %c0_104 = arith.constant 0 : index
    %c0_105 = arith.constant 0 : index
    %119 = vector.load %arg5[%c13_103, %c0_104, %c0_105] : memref<25x128x128xbf16, #tpu.memory_space<vmem>>, vector<1x128x128xbf16>
    %120 = vector.shape_cast %119 : vector<1x128x128xbf16> to vector<128x128xbf16>
    %cst_106 = arith.constant dense<0.000000e+00> : vector<81x128xf32>
    %121 = tpu.matmul %118, %120, %cst_106 {dimension_numbers = #tpu.dot_dimension_numbers<[1], [0], [0], [1], [0, 0, 1, 1], [], []>} : vector<81x128xbf16>, vector<128x128xbf16>, vector<81x128xf32> -> vector<81x128xf32>
    %122 = arith.addf %114, %121 : vector<81x128xf32>
    %c14 = arith.constant 14 : index
    %c0_107 = arith.constant 0 : index
    %c0_108 = arith.constant 0 : index
    %123 = vector.load %arg4[%c14, %c0_107, %c0_108] : memref<25x81x81xbf16, #tpu.memory_space<vmem>>, vector<1x81x81xbf16>
    %124 = vector.shape_cast %123 : vector<1x81x81xbf16> to vector<81x81xbf16>
    %cst_109 = arith.constant dense<0.000000e+00> : vector<81x128xf32>
    %125 = tpu.matmul %124, %9, %cst_109 {dimension_numbers = #tpu.dot_dimension_numbers<[1], [0], [0], [1], [0, 0, 1, 1], [], []>} : vector<81x81xbf16>, vector<81x128xbf16>, vector<81x128xf32> -> vector<81x128xf32>
    %126 = arith.truncf %125 : vector<81x128xf32> to vector<81x128xbf16>
    %c14_110 = arith.constant 14 : index
    %c0_111 = arith.constant 0 : index
    %c0_112 = arith.constant 0 : index
    %127 = vector.load %arg5[%c14_110, %c0_111, %c0_112] : memref<25x128x128xbf16, #tpu.memory_space<vmem>>, vector<1x128x128xbf16>
    %128 = vector.shape_cast %127 : vector<1x128x128xbf16> to vector<128x128xbf16>
    %cst_113 = arith.constant dense<0.000000e+00> : vector<81x128xf32>
    %129 = tpu.matmul %126, %128, %cst_113 {dimension_numbers = #tpu.dot_dimension_numbers<[1], [0], [0], [1], [0, 0, 1, 1], [], []>} : vector<81x128xbf16>, vector<128x128xbf16>, vector<81x128xf32> -> vector<81x128xf32>
    %130 = arith.addf %122, %129 : vector<81x128xf32>
    %c15 = arith.constant 15 : index
    %c0_114 = arith.constant 0 : index
    %c0_115 = arith.constant 0 : index
    %131 = vector.load %arg4[%c15, %c0_114, %c0_115] : memref<25x81x81xbf16, #tpu.memory_space<vmem>>, vector<1x81x81xbf16>
    %132 = vector.shape_cast %131 : vector<1x81x81xbf16> to vector<81x81xbf16>
    %cst_116 = arith.constant dense<0.000000e+00> : vector<81x128xf32>
    %133 = tpu.matmul %132, %9, %cst_116 {dimension_numbers = #tpu.dot_dimension_numbers<[1], [0], [0], [1], [0, 0, 1, 1], [], []>} : vector<81x81xbf16>, vector<81x128xbf16>, vector<81x128xf32> -> vector<81x128xf32>
    %134 = arith.truncf %133 : vector<81x128xf32> to vector<81x128xbf16>
    %c15_117 = arith.constant 15 : index
    %c0_118 = arith.constant 0 : index
    %c0_119 = arith.constant 0 : index
    %135 = vector.load %arg5[%c15_117, %c0_118, %c0_119] : memref<25x128x128xbf16, #tpu.memory_space<vmem>>, vector<1x128x128xbf16>
    %136 = vector.shape_cast %135 : vector<1x128x128xbf16> to vector<128x128xbf16>
    %cst_120 = arith.constant dense<0.000000e+00> : vector<81x128xf32>
    %137 = tpu.matmul %134, %136, %cst_120 {dimension_numbers = #tpu.dot_dimension_numbers<[1], [0], [0], [1], [0, 0, 1, 1], [], []>} : vector<81x128xbf16>, vector<128x128xbf16>, vector<81x128xf32> -> vector<81x128xf32>
    %138 = arith.addf %130, %137 : vector<81x128xf32>
    %c16 = arith.constant 16 : index
    %c0_121 = arith.constant 0 : index
    %c0_122 = arith.constant 0 : index
    %139 = vector.load %arg4[%c16, %c0_121, %c0_122] : memref<25x81x81xbf16, #tpu.memory_space<vmem>>, vector<1x81x81xbf16>
    %140 = vector.shape_cast %139 : vector<1x81x81xbf16> to vector<81x81xbf16>
    %cst_123 = arith.constant dense<0.000000e+00> : vector<81x128xf32>
    %141 = tpu.matmul %140, %9, %cst_123 {dimension_numbers = #tpu.dot_dimension_numbers<[1], [0], [0], [1], [0, 0, 1, 1], [], []>} : vector<81x81xbf16>, vector<81x128xbf16>, vector<81x128xf32> -> vector<81x128xf32>
    %142 = arith.truncf %141 : vector<81x128xf32> to vector<81x128xbf16>
    %c16_124 = arith.constant 16 : index
    %c0_125 = arith.constant 0 : index
    %c0_126 = arith.constant 0 : index
    %143 = vector.load %arg5[%c16_124, %c0_125, %c0_126] : memref<25x128x128xbf16, #tpu.memory_space<vmem>>, vector<1x128x128xbf16>
    %144 = vector.shape_cast %143 : vector<1x128x128xbf16> to vector<128x128xbf16>
    %cst_127 = arith.constant dense<0.000000e+00> : vector<81x128xf32>
    %145 = tpu.matmul %142, %144, %cst_127 {dimension_numbers = #tpu.dot_dimension_numbers<[1], [0], [0], [1], [0, 0, 1, 1], [], []>} : vector<81x128xbf16>, vector<128x128xbf16>, vector<81x128xf32> -> vector<81x128xf32>
    %146 = arith.addf %138, %145 : vector<81x128xf32>
    %c17 = arith.constant 17 : index
    %c0_128 = arith.constant 0 : index
    %c0_129 = arith.constant 0 : index
    %147 = vector.load %arg4[%c17, %c0_128, %c0_129] : memref<25x81x81xbf16, #tpu.memory_space<vmem>>, vector<1x81x81xbf16>
    %148 = vector.shape_cast %147 : vector<1x81x81xbf16> to vector<81x81xbf16>
    %cst_130 = arith.constant dense<0.000000e+00> : vector<81x128xf32>
    %149 = tpu.matmul %148, %9, %cst_130 {dimension_numbers = #tpu.dot_dimension_numbers<[1], [0], [0], [1], [0, 0, 1, 1], [], []>} : vector<81x81xbf16>, vector<81x128xbf16>, vector<81x128xf32> -> vector<81x128xf32>
    %150 = arith.truncf %149 : vector<81x128xf32> to vector<81x128xbf16>
    %c17_131 = arith.constant 17 : index
    %c0_132 = arith.constant 0 : index
    %c0_133 = arith.constant 0 : index
    %151 = vector.load %arg5[%c17_131, %c0_132, %c0_133] : memref<25x128x128xbf16, #tpu.memory_space<vmem>>, vector<1x128x128xbf16>
    %152 = vector.shape_cast %151 : vector<1x128x128xbf16> to vector<128x128xbf16>
    %cst_134 = arith.constant dense<0.000000e+00> : vector<81x128xf32>
    %153 = tpu.matmul %150, %152, %cst_134 {dimension_numbers = #tpu.dot_dimension_numbers<[1], [0], [0], [1], [0, 0, 1, 1], [], []>} : vector<81x128xbf16>, vector<128x128xbf16>, vector<81x128xf32> -> vector<81x128xf32>
    %154 = arith.addf %146, %153 : vector<81x128xf32>
    %c18 = arith.constant 18 : index
    %c0_135 = arith.constant 0 : index
    %c0_136 = arith.constant 0 : index
    %155 = vector.load %arg4[%c18, %c0_135, %c0_136] : memref<25x81x81xbf16, #tpu.memory_space<vmem>>, vector<1x81x81xbf16>
    %156 = vector.shape_cast %155 : vector<1x81x81xbf16> to vector<81x81xbf16>
    %cst_137 = arith.constant dense<0.000000e+00> : vector<81x128xf32>
    %157 = tpu.matmul %156, %9, %cst_137 {dimension_numbers = #tpu.dot_dimension_numbers<[1], [0], [0], [1], [0, 0, 1, 1], [], []>} : vector<81x81xbf16>, vector<81x128xbf16>, vector<81x128xf32> -> vector<81x128xf32>
    %158 = arith.truncf %157 : vector<81x128xf32> to vector<81x128xbf16>
    %c18_138 = arith.constant 18 : index
    %c0_139 = arith.constant 0 : index
    %c0_140 = arith.constant 0 : index
    %159 = vector.load %arg5[%c18_138, %c0_139, %c0_140] : memref<25x128x128xbf16, #tpu.memory_space<vmem>>, vector<1x128x128xbf16>
    %160 = vector.shape_cast %159 : vector<1x128x128xbf16> to vector<128x128xbf16>
    %cst_141 = arith.constant dense<0.000000e+00> : vector<81x128xf32>
    %161 = tpu.matmul %158, %160, %cst_141 {dimension_numbers = #tpu.dot_dimension_numbers<[1], [0], [0], [1], [0, 0, 1, 1], [], []>} : vector<81x128xbf16>, vector<128x128xbf16>, vector<81x128xf32> -> vector<81x128xf32>
    %162 = arith.addf %154, %161 : vector<81x128xf32>
    %c19 = arith.constant 19 : index
    %c0_142 = arith.constant 0 : index
    %c0_143 = arith.constant 0 : index
    %163 = vector.load %arg4[%c19, %c0_142, %c0_143] : memref<25x81x81xbf16, #tpu.memory_space<vmem>>, vector<1x81x81xbf16>
    %164 = vector.shape_cast %163 : vector<1x81x81xbf16> to vector<81x81xbf16>
    %cst_144 = arith.constant dense<0.000000e+00> : vector<81x128xf32>
    %165 = tpu.matmul %164, %9, %cst_144 {dimension_numbers = #tpu.dot_dimension_numbers<[1], [0], [0], [1], [0, 0, 1, 1], [], []>} : vector<81x81xbf16>, vector<81x128xbf16>, vector<81x128xf32> -> vector<81x128xf32>
    %166 = arith.truncf %165 : vector<81x128xf32> to vector<81x128xbf16>
    %c19_145 = arith.constant 19 : index
    %c0_146 = arith.constant 0 : index
    %c0_147 = arith.constant 0 : index
    %167 = vector.load %arg5[%c19_145, %c0_146, %c0_147] : memref<25x128x128xbf16, #tpu.memory_space<vmem>>, vector<1x128x128xbf16>
    %168 = vector.shape_cast %167 : vector<1x128x128xbf16> to vector<128x128xbf16>
    %cst_148 = arith.constant dense<0.000000e+00> : vector<81x128xf32>
    %169 = tpu.matmul %166, %168, %cst_148 {dimension_numbers = #tpu.dot_dimension_numbers<[1], [0], [0], [1], [0, 0, 1, 1], [], []>} : vector<81x128xbf16>, vector<128x128xbf16>, vector<81x128xf32> -> vector<81x128xf32>
    %170 = arith.addf %162, %169 : vector<81x128xf32>
    %c20 = arith.constant 20 : index
    %c0_149 = arith.constant 0 : index
    %c0_150 = arith.constant 0 : index
    %171 = vector.load %arg4[%c20, %c0_149, %c0_150] : memref<25x81x81xbf16, #tpu.memory_space<vmem>>, vector<1x81x81xbf16>
    %172 = vector.shape_cast %171 : vector<1x81x81xbf16> to vector<81x81xbf16>
    %cst_151 = arith.constant dense<0.000000e+00> : vector<81x128xf32>
    %173 = tpu.matmul %172, %9, %cst_151 {dimension_numbers = #tpu.dot_dimension_numbers<[1], [0], [0], [1], [0, 0, 1, 1], [], []>} : vector<81x81xbf16>, vector<81x128xbf16>, vector<81x128xf32> -> vector<81x128xf32>
    %174 = arith.truncf %173 : vector<81x128xf32> to vector<81x128xbf16>
    %c20_152 = arith.constant 20 : index
    %c0_153 = arith.constant 0 : index
    %c0_154 = arith.constant 0 : index
    %175 = vector.load %arg5[%c20_152, %c0_153, %c0_154] : memref<25x128x128xbf16, #tpu.memory_space<vmem>>, vector<1x128x128xbf16>
    %176 = vector.shape_cast %175 : vector<1x128x128xbf16> to vector<128x128xbf16>
    %cst_155 = arith.constant dense<0.000000e+00> : vector<81x128xf32>
    %177 = tpu.matmul %174, %176, %cst_155 {dimension_numbers = #tpu.dot_dimension_numbers<[1], [0], [0], [1], [0, 0, 1, 1], [], []>} : vector<81x128xbf16>, vector<128x128xbf16>, vector<81x128xf32> -> vector<81x128xf32>
    %178 = arith.addf %170, %177 : vector<81x128xf32>
    %c21 = arith.constant 21 : index
    %c0_156 = arith.constant 0 : index
    %c0_157 = arith.constant 0 : index
    %179 = vector.load %arg4[%c21, %c0_156, %c0_157] : memref<25x81x81xbf16, #tpu.memory_space<vmem>>, vector<1x81x81xbf16>
    %180 = vector.shape_cast %179 : vector<1x81x81xbf16> to vector<81x81xbf16>
    %cst_158 = arith.constant dense<0.000000e+00> : vector<81x128xf32>
    %181 = tpu.matmul %180, %9, %cst_158 {dimension_numbers = #tpu.dot_dimension_numbers<[1], [0], [0], [1], [0, 0, 1, 1], [], []>} : vector<81x81xbf16>, vector<81x128xbf16>, vector<81x128xf32> -> vector<81x128xf32>
    %182 = arith.truncf %181 : vector<81x128xf32> to vector<81x128xbf16>
    %c21_159 = arith.constant 21 : index
    %c0_160 = arith.constant 0 : index
    %c0_161 = arith.constant 0 : index
    %183 = vector.load %arg5[%c21_159, %c0_160, %c0_161] : memref<25x128x128xbf16, #tpu.memory_space<vmem>>, vector<1x128x128xbf16>
    %184 = vector.shape_cast %183 : vector<1x128x128xbf16> to vector<128x128xbf16>
    %cst_162 = arith.constant dense<0.000000e+00> : vector<81x128xf32>
    %185 = tpu.matmul %182, %184, %cst_162 {dimension_numbers = #tpu.dot_dimension_numbers<[1], [0], [0], [1], [0, 0, 1, 1], [], []>} : vector<81x128xbf16>, vector<128x128xbf16>, vector<81x128xf32> -> vector<81x128xf32>
    %186 = arith.addf %178, %185 : vector<81x128xf32>
    %c22 = arith.constant 22 : index
    %c0_163 = arith.constant 0 : index
    %c0_164 = arith.constant 0 : index
    %187 = vector.load %arg4[%c22, %c0_163, %c0_164] : memref<25x81x81xbf16, #tpu.memory_space<vmem>>, vector<1x81x81xbf16>
    %188 = vector.shape_cast %187 : vector<1x81x81xbf16> to vector<81x81xbf16>
    %cst_165 = arith.constant dense<0.000000e+00> : vector<81x128xf32>
    %189 = tpu.matmul %188, %9, %cst_165 {dimension_numbers = #tpu.dot_dimension_numbers<[1], [0], [0], [1], [0, 0, 1, 1], [], []>} : vector<81x81xbf16>, vector<81x128xbf16>, vector<81x128xf32> -> vector<81x128xf32>
    %190 = arith.truncf %189 : vector<81x128xf32> to vector<81x128xbf16>
    %c22_166 = arith.constant 22 : index
    %c0_167 = arith.constant 0 : index
    %c0_168 = arith.constant 0 : index
    %191 = vector.load %arg5[%c22_166, %c0_167, %c0_168] : memref<25x128x128xbf16, #tpu.memory_space<vmem>>, vector<1x128x128xbf16>
    %192 = vector.shape_cast %191 : vector<1x128x128xbf16> to vector<128x128xbf16>
    %cst_169 = arith.constant dense<0.000000e+00> : vector<81x128xf32>
    %193 = tpu.matmul %190, %192, %cst_169 {dimension_numbers = #tpu.dot_dimension_numbers<[1], [0], [0], [1], [0, 0, 1, 1], [], []>} : vector<81x128xbf16>, vector<128x128xbf16>, vector<81x128xf32> -> vector<81x128xf32>
    %194 = arith.addf %186, %193 : vector<81x128xf32>
    %c23 = arith.constant 23 : index
    %c0_170 = arith.constant 0 : index
    %c0_171 = arith.constant 0 : index
    %195 = vector.load %arg4[%c23, %c0_170, %c0_171] : memref<25x81x81xbf16, #tpu.memory_space<vmem>>, vector<1x81x81xbf16>
    %196 = vector.shape_cast %195 : vector<1x81x81xbf16> to vector<81x81xbf16>
    %cst_172 = arith.constant dense<0.000000e+00> : vector<81x128xf32>
    %197 = tpu.matmul %196, %9, %cst_172 {dimension_numbers = #tpu.dot_dimension_numbers<[1], [0], [0], [1], [0, 0, 1, 1], [], []>} : vector<81x81xbf16>, vector<81x128xbf16>, vector<81x128xf32> -> vector<81x128xf32>
    %198 = arith.truncf %197 : vector<81x128xf32> to vector<81x128xbf16>
    %c23_173 = arith.constant 23 : index
    %c0_174 = arith.constant 0 : index
    %c0_175 = arith.constant 0 : index
    %199 = vector.load %arg5[%c23_173, %c0_174, %c0_175] : memref<25x128x128xbf16, #tpu.memory_space<vmem>>, vector<1x128x128xbf16>
    %200 = vector.shape_cast %199 : vector<1x128x128xbf16> to vector<128x128xbf16>
    %cst_176 = arith.constant dense<0.000000e+00> : vector<81x128xf32>
    %201 = tpu.matmul %198, %200, %cst_176 {dimension_numbers = #tpu.dot_dimension_numbers<[1], [0], [0], [1], [0, 0, 1, 1], [], []>} : vector<81x128xbf16>, vector<128x128xbf16>, vector<81x128xf32> -> vector<81x128xf32>
    %202 = arith.addf %194, %201 : vector<81x128xf32>
    %c24 = arith.constant 24 : index
    %c0_177 = arith.constant 0 : index
    %c0_178 = arith.constant 0 : index
    %203 = vector.load %arg4[%c24, %c0_177, %c0_178] : memref<25x81x81xbf16, #tpu.memory_space<vmem>>, vector<1x81x81xbf16>
    %204 = vector.shape_cast %203 : vector<1x81x81xbf16> to vector<81x81xbf16>
    %cst_179 = arith.constant dense<0.000000e+00> : vector<81x128xf32>
    %205 = tpu.matmul %204, %9, %cst_179 {dimension_numbers = #tpu.dot_dimension_numbers<[1], [0], [0], [1], [0, 0, 1, 1], [], []>} : vector<81x81xbf16>, vector<81x128xbf16>, vector<81x128xf32> -> vector<81x128xf32>
    %206 = arith.truncf %205 : vector<81x128xf32> to vector<81x128xbf16>
    %c24_180 = arith.constant 24 : index
    %c0_181 = arith.constant 0 : index
    %c0_182 = arith.constant 0 : index
    %207 = vector.load %arg5[%c24_180, %c0_181, %c0_182] : memref<25x128x128xbf16, #tpu.memory_space<vmem>>, vector<1x128x128xbf16>
    %208 = vector.shape_cast %207 : vector<1x128x128xbf16> to vector<128x128xbf16>
    %cst_183 = arith.constant dense<0.000000e+00> : vector<81x128xf32>
    %209 = tpu.matmul %206, %208, %cst_183 {dimension_numbers = #tpu.dot_dimension_numbers<[1], [0], [0], [1], [0, 0, 1, 1], [], []>} : vector<81x128xbf16>, vector<128x128xbf16>, vector<81x128xf32> -> vector<81x128xf32>
    %210 = arith.addf %202, %209 : vector<81x128xf32>
    %c0_184 = arith.constant 0 : index
    %c0_185 = arith.constant 0 : index
    %211 = vector.load %arg6[%c0_184, %c0_185] : memref<1x128xf32, #tpu.memory_space<vmem>>, vector<1x128xf32>
    %212 = vector.broadcast %211 : vector<1x128xf32> to vector<81x128xf32>
    %213 = arith.addf %210, %212 : vector<81x128xf32>
    %cst_186 = arith.constant 0.000000e+00 : f32
    %214 = vector.broadcast %cst_186 : f32 to vector<81x128xf32>
    %215 = arith.maximumf %213, %214 : vector<81x128xf32>
    %216 = arith.truncf %215 : vector<81x128xf32> to vector<81x128xbf16>
    %c0_187 = arith.constant 0 : index
    %c0_188 = arith.constant 0 : index
    %c0_189 = arith.constant 0 : index
    %217 = vector.load %arg7[%c0_187, %c0_188, %c0_189] : memref<4x16x81xbf16, #tpu.memory_space<vmem>>, vector<1x16x81xbf16>
    %218 = vector.shape_cast %217 : vector<1x16x81xbf16> to vector<16x81xbf16>
    %cst_190 = arith.constant dense<0.000000e+00> : vector<16x128xf32>
    %219 = tpu.matmul %218, %216, %cst_190 {dimension_numbers = #tpu.dot_dimension_numbers<[1], [0], [0], [1], [0, 0, 1, 1], [], []>} : vector<16x81xbf16>, vector<81x128xbf16>, vector<16x128xf32> -> vector<16x128xf32>
    %c1_191 = arith.constant 1 : index
    %c0_192 = arith.constant 0 : index
    %c0_193 = arith.constant 0 : index
    %220 = vector.load %arg7[%c1_191, %c0_192, %c0_193] : memref<4x16x81xbf16, #tpu.memory_space<vmem>>, vector<1x16x81xbf16>
    %221 = vector.shape_cast %220 : vector<1x16x81xbf16> to vector<16x81xbf16>
    %cst_194 = arith.constant dense<0.000000e+00> : vector<16x128xf32>
    %222 = tpu.matmul %221, %216, %cst_194 {dimension_numbers = #tpu.dot_dimension_numbers<[1], [0], [0], [1], [0, 0, 1, 1], [], []>} : vector<16x81xbf16>, vector<81x128xbf16>, vector<16x128xf32> -> vector<16x128xf32>
    %c2_195 = arith.constant 2 : index
    %c0_196 = arith.constant 0 : index
    %c0_197 = arith.constant 0 : index
    %223 = vector.load %arg7[%c2_195, %c0_196, %c0_197] : memref<4x16x81xbf16, #tpu.memory_space<vmem>>, vector<1x16x81xbf16>
    %224 = vector.shape_cast %223 : vector<1x16x81xbf16> to vector<16x81xbf16>
    %cst_198 = arith.constant dense<0.000000e+00> : vector<16x128xf32>
    %225 = tpu.matmul %224, %216, %cst_198 {dimension_numbers = #tpu.dot_dimension_numbers<[1], [0], [0], [1], [0, 0, 1, 1], [], []>} : vector<16x81xbf16>, vector<81x128xbf16>, vector<16x128xf32> -> vector<16x128xf32>
    %c3_199 = arith.constant 3 : index
    %c0_200 = arith.constant 0 : index
    %c0_201 = arith.constant 0 : index
    %226 = vector.load %arg7[%c3_199, %c0_200, %c0_201] : memref<4x16x81xbf16, #tpu.memory_space<vmem>>, vector<1x16x81xbf16>
    %227 = vector.shape_cast %226 : vector<1x16x81xbf16> to vector<16x81xbf16>
    %cst_202 = arith.constant dense<0.000000e+00> : vector<16x128xf32>
    %228 = tpu.matmul %227, %216, %cst_202 {dimension_numbers = #tpu.dot_dimension_numbers<[1], [0], [0], [1], [0, 0, 1, 1], [], []>} : vector<16x81xbf16>, vector<81x128xbf16>, vector<16x128xf32> -> vector<16x128xf32>
    %229 = arith.maximumf %219, %222 : vector<16x128xf32>
    %230 = arith.maximumf %225, %228 : vector<16x128xf32>
    %231 = arith.maximumf %229, %230 : vector<16x128xf32>
    %232 = vector.extract_strided_slice %231 {offsets = [0, 0], sizes = [1, 128], strides = [1, 1]} : vector<16x128xf32> to vector<1x128xf32>
    %233 = vector.extract_strided_slice %231 {offsets = [1, 0], sizes = [1, 128], strides = [1, 1]} : vector<16x128xf32> to vector<1x128xf32>
    %234 = vector.extract_strided_slice %231 {offsets = [2, 0], sizes = [1, 128], strides = [1, 1]} : vector<16x128xf32> to vector<1x128xf32>
    %235 = vector.extract_strided_slice %231 {offsets = [3, 0], sizes = [1, 128], strides = [1, 1]} : vector<16x128xf32> to vector<1x128xf32>
    %236 = vector.extract_strided_slice %231 {offsets = [4, 0], sizes = [1, 128], strides = [1, 1]} : vector<16x128xf32> to vector<1x128xf32>
    %237 = vector.extract_strided_slice %231 {offsets = [5, 0], sizes = [1, 128], strides = [1, 1]} : vector<16x128xf32> to vector<1x128xf32>
    %238 = vector.extract_strided_slice %231 {offsets = [6, 0], sizes = [1, 128], strides = [1, 1]} : vector<16x128xf32> to vector<1x128xf32>
    %239 = vector.extract_strided_slice %231 {offsets = [7, 0], sizes = [1, 128], strides = [1, 1]} : vector<16x128xf32> to vector<1x128xf32>
    %240 = vector.extract_strided_slice %231 {offsets = [8, 0], sizes = [1, 128], strides = [1, 1]} : vector<16x128xf32> to vector<1x128xf32>
    %241 = vector.extract_strided_slice %231 {offsets = [9, 0], sizes = [1, 128], strides = [1, 1]} : vector<16x128xf32> to vector<1x128xf32>
    %242 = vector.extract_strided_slice %231 {offsets = [10, 0], sizes = [1, 128], strides = [1, 1]} : vector<16x128xf32> to vector<1x128xf32>
    %243 = vector.extract_strided_slice %231 {offsets = [11, 0], sizes = [1, 128], strides = [1, 1]} : vector<16x128xf32> to vector<1x128xf32>
    %244 = vector.extract_strided_slice %231 {offsets = [12, 0], sizes = [1, 128], strides = [1, 1]} : vector<16x128xf32> to vector<1x128xf32>
    %245 = vector.extract_strided_slice %231 {offsets = [13, 0], sizes = [1, 128], strides = [1, 1]} : vector<16x128xf32> to vector<1x128xf32>
    %246 = vector.extract_strided_slice %231 {offsets = [14, 0], sizes = [1, 128], strides = [1, 1]} : vector<16x128xf32> to vector<1x128xf32>
    %247 = vector.extract_strided_slice %231 {offsets = [15, 0], sizes = [1, 128], strides = [1, 1]} : vector<16x128xf32> to vector<1x128xf32>
    %248 = tpu.concatenate %232, %233, %234, %235, %236, %237, %238, %239, %240, %241, %242, %243, %244, %245, %246, %247 in 1 : vector<1x128xf32>, vector<1x128xf32>, vector<1x128xf32>, vector<1x128xf32>, vector<1x128xf32>, vector<1x128xf32>, vector<1x128xf32>, vector<1x128xf32>, vector<1x128xf32>, vector<1x128xf32>, vector<1x128xf32>, vector<1x128xf32>, vector<1x128xf32>, vector<1x128xf32>, vector<1x128xf32>, vector<1x128xf32> -> vector<1x2048xf32>
    %249 = arith.truncf %248 : vector<1x2048xf32> to vector<1x2048xbf16>
    %c0_203 = arith.constant 0 : index
    %c0_204 = arith.constant 0 : index
    %250 = vector.load %arg8[%c0_203, %c0_204] : memref<2048x128xbf16, #tpu.memory_space<vmem>>, vector<2048x128xbf16>
    %cst_205 = arith.constant dense<0.000000e+00> : vector<1x128xf32>
    %251 = tpu.matmul %249, %250, %cst_205 {dimension_numbers = #tpu.dot_dimension_numbers<[1], [0], [0], [1], [0, 0, 1, 1], [], []>} : vector<1x2048xbf16>, vector<2048x128xbf16>, vector<1x128xf32> -> vector<1x128xf32>
    %c0_206 = arith.constant 0 : index
    %c0_207 = arith.constant 0 : index
    %252 = vector.load %arg9[%c0_206, %c0_207] : memref<1x128xf32, #tpu.memory_space<vmem>>, vector<1x128xf32>
    %253 = arith.addf %251, %252 : vector<1x128xf32>
    %c0_208 = arith.constant 0 : index
    %c0_209 = arith.constant 0 : index
    %c0_210 = arith.constant 0 : index
    %254 = vector.load %arg10[%c0_208, %c0_209, %c0_210] : memref<1x1x128xf32, #tpu.memory_space<vmem>>, vector<1x1x128xf32>
    %255 = vector.shape_cast %254 : vector<1x1x128xf32> to vector<1x128xf32>
    %256 = vector.shape_cast %253 : vector<1x128xf32> to vector<1x1x128xf32>
    tpu.vector_store %arg10[%c0_208, %c0_209, %c0_210], %256 {strides = array<i32>} : memref<1x1x128xf32, #tpu.memory_space<vmem>>, vector<1x1x128xf32>,
    return
  }
  func.func @transform_0(%arg0: i32) -> (i32, i32, i32) {
    %c0_i32 = arith.constant 0 : i32
    %c0_i32_0 = arith.constant 0 : i32
    %c0_i32_1 = arith.constant 0 : i32
    return %arg0, %c0_i32, %c0_i32_0 : i32, i32, i32
  }
  func.func @transform_1(%arg0: i32) -> (i32, i32) {
    %c0_i32 = arith.constant 0 : i32
    %c0_i32_0 = arith.constant 0 : i32
    %c0_i32_1 = arith.constant 0 : i32
    return %c0_i32, %c0_i32_0 : i32, i32
  }
  func.func @transform_2(%arg0: i32) -> (i32, i32) {
    %c0_i32 = arith.constant 0 : i32
    %c0_i32_0 = arith.constant 0 : i32
    %c0_i32_1 = arith.constant 0 : i32
    return %c0_i32, %c0_i32_0 : i32, i32
  }
  func.func @transform_3(%arg0: i32) -> (i32, i32, i32) {
    %c0_i32 = arith.constant 0 : i32
    %c0_i32_0 = arith.constant 0 : i32
    %c0_i32_1 = arith.constant 0 : i32
    %c0_i32_2 = arith.constant 0 : i32
    return %c0_i32, %c0_i32_0, %c0_i32_1 : i32, i32, i32
  }
  func.func @transform_4(%arg0: i32) -> (i32, i32, i32) {
    %c0_i32 = arith.constant 0 : i32
    %c0_i32_0 = arith.constant 0 : i32
    %c0_i32_1 = arith.constant 0 : i32
    %c0_i32_2 = arith.constant 0 : i32
    return %c0_i32, %c0_i32_0, %c0_i32_1 : i32, i32, i32
  }
  func.func @transform_5(%arg0: i32) -> (i32, i32) {
    %c0_i32 = arith.constant 0 : i32
    %c0_i32_0 = arith.constant 0 : i32
    %c0_i32_1 = arith.constant 0 : i32
    return %c0_i32, %c0_i32_0 : i32, i32
  }
  func.func @transform_6(%arg0: i32) -> (i32, i32, i32) {
    %c0_i32 = arith.constant 0 : i32
    %c0_i32_0 = arith.constant 0 : i32
    %c0_i32_1 = arith.constant 0 : i32
    %c0_i32_2 = arith.constant 0 : i32
    return %c0_i32, %c0_i32_0, %c0_i32_1 : i32, i32, i32
  }
  func.func @transform_7(%arg0: i32) -> (i32, i32) {
    %c0_i32 = arith.constant 0 : i32
    %c0_i32_0 = arith.constant 0 : i32
    %c0_i32_1 = arith.constant 0 : i32
    return %c0_i32, %c0_i32_0 : i32, i32
  }
  func.func @transform_8(%arg0: i32) -> (i32, i32) {
    %c0_i32 = arith.constant 0 : i32
    %c0_i32_0 = arith.constant 0 : i32
    %c0_i32_1 = arith.constant 0 : i32
    return %c0_i32, %c0_i32_0 : i32, i32
  }
  func.func @transform_9(%arg0: i32) -> (i32, i32, i32) {
    %c0_i32 = arith.constant 0 : i32
    %c0_i32_0 = arith.constant 0 : i32
    %c0_i32_1 = arith.constant 0 : i32
    return %arg0, %c0_i32, %c0_i32_0 : i32, i32, i32
  }
}

</mosaic_0001>

<bundles_post_ra>
// kernel: cnn_forward.1
= control target key start
LH: loop header
LB: loop body
LE: loop exit
PB: predicated region body
PF: predicated region fallthrough
CT: control target
= control target key end

     0   :  { %14 = vsyncpa [#allocation3], 0  ;;  %s12563_s0 = inlined_call_operand.vmem [shape: bf16[2,81,144], index: 0, kind: input, shape index: {}]   ;;  %s12564_s1 = inlined_call_operand.vmem [shape: bf16[144,128], index: 1, kind: input, shape index: {}]   ;;  %s12565_s2 = inlined_call_operand.vmem [shape: f32[1,128], index: 2, kind: input, shape index: {}]   ;;  %s12566_s3 = inlined_call_operand.hbm [shape: bf16[25,81,81], index: 3, kind: input, shape index: {}]   ;;  %s12567_s4 = inlined_call_operand.vmem [shape: bf16[25,128,128], index: 4, kind: input, shape index: {}]   ;;  %s12568_s5 = inlined_call_operand.vmem [shape: f32[1,128], index: 5, kind: input, shape index: {}]   ;;  %s12569_s6 = inlined_call_operand.vmem [shape: bf16[4,16,81], index: 6, kind: input, shape index: {}]   ;;  %s12570_s7 = inlined_call_operand.hbm [shape: bf16[2048,128], index: 7, kind: input, shape index: {}]   ;;  %s12571_s8 = inlined_call_operand.vmem [shape: f32[1,128], index: 8, kind: input, shape index: {}]   ;;  %s12572_s9 = inlined_call_operand.hbm [shape: f32[2,1,128], index: 9, kind: output, shape index: {}]  }
   0x1   :  { %15 = vsyncpa [#allocation6], 0 }
   0x2   :  { %16 = vsyncpa [#allocation4], 0 }
   0x3   :  { %18 = vsyncpa [#allocation4 + $0x1], 0  ;;  %s10702_s30 = smov 0   ;;  %s10704_s10 = smov 0  }
   0x4   :  { %s10706_s11 = smov 0   ;;  %s10708_s12 = smov 0  }
   0x5 LB: > { %s10723_s13 = sadd.s32 4294967295, %s10645_s12   ;;  %s7508_s14 = sadd.s32 4294967294, %s10645_s12   ;;  %s10645_s12 = sphi %s10708_s12, %s12579_s12   ;;  %s10641_s11 = sphi %s10706_s11, %s12578_s11   ;;  %s10637_s10 = sphi %s10704_s10, %s12577_s10   ;;  %s10633_s30 = sphi %s10702_s30, %s12576_s30  }
   0x6   : > { %s10727_s15 = sadd.s32 1, %s10645_s12   ;;  %s225_s16 = sadd.s32 1, %s10641_s11 }
   0x7   : > { %s222_s17 = ssub.s32 %s10645_s12, %s10727_s15  ;;  %p235_p0 = scmp.ne.s32.totalorder %s10641_s11, %s10637_s10 }
   0x8   : > { %p223_p1 = scmp.eq.s32.totalorder %s222_s17, 0  ;;  %p236_p2 = scmp.eq.s32.totalorder %s10723_s13, 1 }
   0x9   : > { %p241_p3 = scmp.ne.s32.totalorder %s10637_s10, %s10633_s30  ;;  %p242_p4 = scmp.eq.s32.totalorder %s7508_s14, 1 }
   0xa   : > { %s10738_s18 = scalar_select %p223_p1, %s10641_s11, %s225_s16  }
   0xb   : > { %p10740_p5 = por %p236_p2, %p235_p0  ;;  %p10744_p6 = por %p242_p4, %p241_p3 }
   0xc   : > { %p7509_p7 = scmp.ge.s32.totalorder %s10645_s12, 1  ;;  %p249_p8 = scmp.lt.s32.totalorder %s10645_s12, 3 }
   0xd   : > { %p10471_p9 = scmp.eq.s32.totalorder %s10723_s13, 0  ;;  %s266_s24 = sshll.u32 %s12566_s3, 4  ;;  %s267_s24 = int_to_ptr.hbm [resolvable:$true] %s266_s24 }
   0xe   : > { %p10751_p10 = pnand %p7509_p7, %p249_p8  ;;  %s10647_s25 = smov [#allocation2]  }
   0xf   : > { %s268_s26 = sshll.u32 %s10647_s25, 4  ;;  %s289_s29 = sshll.u32 %s12570_s7, 4  ;;  %s269_s26 = int_to_ptr.vmem [resolvable:$true] %s268_s26  ;;  %s290_s29 = int_to_ptr.hbm [resolvable:$true] %s289_s29 }
  0x10   : > { %p10460_p11 = pneg %p10751_p10  ;;  %s10648_s14 = smov 64  }
  0x11   : > { %s10649_s16 = smov 4   ;;  %s10650_s17 = smov [#allocation5]  }
  0x12   : > { %p10461_p12 = pnand %p10471_p9, %p10460_p11  ;;  %s291_s22 = sshll.u32 %s10650_s17, 4  ;;  %s292_s22 = int_to_ptr.vmem [resolvable:$true] %s291_s22 }
  0x13   : > { %318 = sbr.rel (%p10751_p10) target bundleno = 2244 (0x8c4), region = 56 }
  0x14   : > { %10463 = dma.hbm_to_vmem [thread:$0]  (!%p10461_p12), %s267_s24, 17600, %s269_s26, [#allocation3], %s10648_s14, %s10648_s14, %s10649_s16  }
  0x15   : > { %10466 = dma.hbm_to_vmem [thread:$0]  (!%p10461_p12), %s290_s29, 16384, %s292_s22, [#allocation6], %s10648_s14, %s10648_s14, %s10649_s16  }
  0x18   : > { %10620 = dma.done.wait (%p10471_p9), [#allocation3], 17600  }
  0x19   : > { %10622 = vsyncadd (%p10471_p9), [#allocation3], 4294949696 }
  0x1a   : > { %10624 = dma.done.wait (%p10471_p9), [#allocation6], 16384  }
  0x1b   : > { %10626 = vsyncadd (%p10471_p9), [#allocation6], 4294950912  ;;  %p359_p13 = scmp.lt.s32.totalorder %s10723_s13, 1  ;;  %v9990_v0 = vld [vmem:[%s12564_s1 + $0x38] sm:$0xff]  ;;  %v9989_v1 = vld [vmem:[%s12564_s1 + $0x30] sm:$0xff]  ;;  %vm503_vm0 = vcmask 130048   ;;  %s7427_s16 = scalar_lea.hbm %s12572_s9, %s10723_s13 }
  0x1c   : > { %522 = vmatpush.bf16.msra.mxu0 %v9990_v0  ;;  %v9991_v2 = vld [vmem:[%s12564_s1 + $0x40] sm:$0xff]  ;;  %v9988_v6 = vld [vmem:[%s12564_s1 + $0x28] sm:$0xff]  ;;  %v9986_v8 = vld [vmem:[%s12564_s1 + $0x18] sm:$0xff]  ;;  %vm673_vm1 = vcmask 1040384   ;;  %vm654_vm2 = vcmask 662528   ;;  %s357_s28 = sand.u32 1, %s10637_s10  }
  0x1d   : > { %s360_s23 = scalar_select %p359_p13, %s10723_s13, 1  ;;  %567 = vmatpush.bf16.msra.mxu1 %v9991_v2  ;;  %v9987_v7 = vld [vmem:[%s12564_s1 + $0x20] sm:$0xff]  ;;  %v9985_v11 = vld [vmem:[%s12564_s1 + $0x10] sm:$0xff]  ;;  %v9984_v13 = vld [vmem:[%s12564_s1 + $0x8] sm:$0xff] }
  0x1e   : > { %v9983_v14 = vld [vmem:[%s12564_s1] sm:$0xff]  ;;  %v10017_v60 = vld [vmem:[%s12567_s4 + $0x78] sm:$0xff]  ;;  %v10016_v63 = vld [vmem:[%s12567_s4 + $0x70] sm:$0xff]  ;;  %s358_s17 = scalar_lea.vmem [#allocation7], %s357_s28  ;;  %s10595_s27 = scalar_lea.hbm %s12572_s9, 2 }
  0x1f   : > { %s10449_s24 = smul.u32 88, %s360_s23  ;;  %v10841_v47 = vld [vmem:[%s12565_s2] ss:$0 sm:$0xff]  ;;  %v10015_v0 = vld [vmem:[%s12567_s4 + $0x68] sm:$0xff]  ;;  %s7429_s22 = sshll.u32 %s358_s17, 4  ;;  %s7430_s22 = int_to_ptr.vmem [resolvable:$true] %s7429_s22 }
  0x20   : > { %523 = vmatpush.bf16.msra.mxu0 %v9989_v1  ;;  %s7431_s23 = sshll.u32 %s7427_s16, 4  ;;  %s7432_s23 = int_to_ptr.hbm [resolvable:$true] %s7431_s23 }
  0x21   : > { %s10780_s26 = scalar_lea.vmem %s12563_s0, %s10449_s24  ;;  %906 = vmatpush.bf16.msrb.mxu1 %v10017_v60  ;;  %v10007_v60 = vld [vmem:[#allocation2 + $0x3c] sm:$0xff]  ;;  %s7419_s24 = scalar_lea.sflag [#allocation4], %s357_s28 }
  0x22   : > { %v9973_v3 = vld [vmem:[%s10780_s26 + $0x4] sm:$0xf]  ;;  %v7521_v4 = vld [vmem:[%s10780_s26 + $0x8] sm:$0xf0]  ;;  %v9975_v9 = vld [vmem:[%s10780_s26 + $0x14] sm:$0xf] }
  0x23   : > { %v7524_v5 = vor.u32 %v9973_v3, %v7521_v4  ;;  %v7529_v10 = vld [vmem:[%s10780_s26 + $0x18] sm:$0xf0]  ;;  %v7519_v15 = vld [vmem:[%s10780_s26] sm:$0xf]  ;;  %v9974_v16 = vld [vmem:[%s10780_s26 + $0x4] sm:$0xf0] }
  0x24   : > { %524 = vmatpush.bf16.msra.mxu0 %v9988_v6  ;;  %v7532_v12 = vor.u32 %v9975_v9, %v7529_v10  ;;  %v7520_v17 = vor.u32 %v9974_v16, %v7519_v15  ;;  %v9977_v18 = vld [vmem:[%s10780_s26 + $0x24] sm:$0xf]  ;;  %v7537_v19 = vld [vmem:[%s10780_s26 + $0x28] sm:$0xf0]  ;;  %v7527_v21 = vld [vmem:[%s10780_s26 + $0x10] sm:$0xf] }
  0x25   : > { %7593 = vmatmul.msk.bf16.vlgmr.msra.gmra.mxu1 %vm503_vm0, %v7524_v5  ;;  %v7540_v20 = vor.u32 %v9977_v18, %v7537_v19  ;;  %v9976_v22 = vld [vmem:[%s10780_s26 + $0x14] sm:$0xf0]  ;;  %v9979_v24 = vld [vmem:[%s10780_s26 + $0x34] sm:$0xf]  ;;  %v7545_v25 = vld [vmem:[%s10780_s26 + $0x38] sm:$0xf0] }
  0x26   : > { %v7528_v23 = vor.u32 %v9976_v22, %v7527_v21  ;;  %v7548_v26 = vor.u32 %v9979_v24, %v7545_v25  ;;  %v7535_v27 = vld [vmem:[%s10780_s26 + $0x20] sm:$0xf]  ;;  %v9978_v28 = vld [vmem:[%s10780_s26 + $0x24] sm:$0xf0]  ;;  %v9981_v30 = vld [vmem:[%s10780_s26 + $0x44] sm:$0xf]  ;;  %907 = vmatpush.bf16.msrb.mxu1 %v10016_v63 }
  0x27   : > { %v7536_v29 = vor.u32 %v9978_v28, %v7535_v27  ;;  %v7553_v31 = vld [vmem:[%s10780_s26 + $0x48] sm:$0xf0]  ;;  %v7543_v33 = vld [vmem:[%s10780_s26 + $0x30] sm:$0xf]  ;;  %v9980_v34 = vld [vmem:[%s10780_s26 + $0x34] sm:$0xf0] }
  0x28   : > { %525 = vmatpush.bf16.msra.mxu0 %v9987_v7  ;;  %v7556_v32 = vor.u32 %v9981_v30, %v7553_v31  ;;  %v375_v35 = vld [vmem:[%s10780_s26 + $0x50] sm:$0x11]  ;;  %v7544_v36 = vor.u32 %v9980_v34, %v7543_v33  ;;  %v7551_v39 = vld [vmem:[%s10780_s26 + $0x40] sm:$0xf]  ;;  %v9982_v40 = vld [vmem:[%s10780_s26 + $0x44] sm:$0xf0] }
  0x29   : > { %v430_v37 = vunpack.c.h.b16 %v375_v35  ;;  %v7552_v41 = vor.u32 %v9982_v40, %v7551_v39  ;;  %v429_v42 = vunpack.c.l.b16 %v375_v35  ;;  %v10014_v3 = vld [vmem:[%s12567_s4 + $0x60] sm:$0xff]  ;;  %v10013_v4 = vld [vmem:[%s12567_s4 + $0x58] sm:$0xff]  ;;  %v10012_v7 = vld [vmem:[%s12567_s4 + $0x50] sm:$0xff]  ;;  %s10589_s26 = sshra.s32 %s7432_s23, 4  ;;  %s10590_s26 = int_to_ptr.hbm [resolvable:$true] %s10589_s26 }
  0x2a   : > { %908 = vmatpush.bf16.msrb.mxu1 %v10015_v0  ;;  %v9996_v63 = vld [vmem:[#allocation2 + $0x20] sm:$0xff]  ;;  %v10009_v0 = vld [vmem:[#allocation2 + $0x4c] sm:$0xff]  ;;  %s10591_s25 = scalar_lea.hbm %s10590_s26, 1  ;;  %p10596_p3 = scmp.lt.s32.totalorder %s10590_s26, %s12572_s9 }
  0x2b   : > { %v442_v38 = vpack.c.b16 %v430_v37, %v430_v37  ;;  %v441_v43 = vpack.c.b16 %v429_v42, %v429_v42  ;;  %p10592_p0 = scmp.ne.s32.totalorder %s10590_s26, %s10591_s25  ;;  %p10597_p4 = scmp.lt.s32.totalorder %s10595_s27, %s10591_s25 }
  0x2c   : > { %526 = vmatpush.bf16.msra.mxu0 %v9986_v8  ;;  %v10011_v8 = vld [vmem:[%s12567_s4 + $0x48] sm:$0xff] }
  0x2d   : > { %p10593_p1 = pnand %p10592_p0, %p10740_p5  ;;  %p10598_p7 = por %p10597_p4, %p10596_p3 }
  0x2e   : > { %909 = vmatpush.bf16.msrb.mxu1 %v10014_v3 }
  0x2f   : > { %p10594_p2 = pneg %p10593_p1 }
  0x30   : > { %527 = vmatpush.bf16.msra.mxu0 %v9985_v11  ;;  %v10010_v11 = vld [vmem:[%s12567_s4 + $0x40] sm:$0xff] }
  0x31   : > { %p10599_p8 = pnand %p10598_p7, %p10594_p2 }
  0x32   : > { %910 = vmatpush.bf16.msrb.mxu1 %v10013_v4 }
  0x34   : > { %528 = vmatpush.bf16.msra.mxu0 %v9984_v13 }
  0x35   : > { %7594 = vmatmul.msk.bf16.gmra.mxu1 %vm503_vm0, %v7532_v12 }
  0x36   : > { %911 = vmatpush.bf16.msrb.mxu1 %v10012_v7  ;;  %v10004_v7 = vld [vmem:[%s12567_s4 + $0x38] sm:$0xff] }
  0x38   : > { %529 = vmatpush.bf16.msra.mxu0 %v9983_v14 }
  0x3a   : > { %912 = vmatpush.bf16.msrb.mxu1 %v10011_v8  ;;  %v10003_v8 = vld [vmem:[%s12567_s4 + $0x30] sm:$0xff] }
  0x3b   : > { %530 = vmatmul.bf16.vlgmr.msra.gmra.mxu0 %v7520_v17 }
  0x3e   : > { %913 = vmatpush.bf16.msrb.mxu1 %v10010_v11  ;;  %v10000_v11 = vld [vmem:[%s12567_s4 + $0x18] sm:$0xff] }
  0x45   : > { %7595 = vmatmul.msk.bf16.gmra.mxu1 %vm503_vm0, %v7540_v20 }
  0x4b   : > { %535 = vmatmul.bf16.gmra.mxu0 %v7528_v23  ;;  %v10651_v23 = vmov 0  }
  0x4c   : > { %v10883_v24 = vsel %vm673_vm1, 65535, %v10651_v23 }
  0x55   : > { %7596 = vmatmul.msk.bf16.gmra.mxu1 %vm503_vm0, %v7548_v26 }
  0x5b   : > { %540 = vmatmul.bf16.gmra.mxu0 %v7536_v29 }
  0x65   : > { %7597 = vmatmul.msk.bf16.gmra.mxu1 %vm503_vm0, %v7556_v32 }
  0x6b   : > { %545 = vmatmul.bf16.gmra.mxu0 %v7544_v36 }
  0x75   : > { %7598 = vmatmul.msk.bf16.gmra.mxu1 %vm503_vm0, %v442_v38 }
  0x7b   : > { %550 = vmatmul.bf16.gmra.mxu0 %v7552_v41 }
  0x8b   : > { %555 = vmatmul.bf16.gmra.mxu0 %v441_v43 }
  0xa2   : > { %v569_v44 = vpop.f32.mrf.mxu1 }
  0xaa   : > { %v10836_v45 = vpop.f32.mrf.mxu1 }
  0xb2   : > { %v574_v46 = vpop.f32.mrf.mxu1 }
  0xb8   : > { %v531_v49 = vpop.f32.mrf.mxu0 }
  0xb9   : > { %v532_v50 = vadd.f32 %v10841_v47, %v531_v49 }
  0xba   : > { %v10843_v48 = vpop.f32.mrf.mxu1 }
  0xbb   : > { %v10846_v51 = vadd.f32 %v569_v44, %v532_v50 }
  0xc0   : > { %v10850_v53 = vpop.f32.mrf.mxu0 }
  0xc1   : > { %v534_v42 = vadd.f32 %v10841_v47, %v10850_v53  ;;  %v598_v53 = vmax.f32 %v10846_v51, 0.0  ;;  %v9993_v51 = vld [vmem:[#allocation2 + $0x8] sm:$0xff] }
  0xc2   : > { %v10848_v52 = vpop.f32.mrf.mxu1 }
  0xc3   : > { %v572_v50 = vadd.f32 %v10836_v45, %v534_v42 }
  0xc8   : > { %v536_v55 = vpop.f32.mrf.mxu0 }
  0xc9   : > { %v537_v56 = vadd.f32 %v10841_v47, %v536_v55 }
  0xca   : > { %v581_v54 = vpop.f32.mrf.mxu1 }
  0xcb   : > { %v10853_v57 = vadd.f32 %v574_v46, %v537_v56  ;;  %v9992_v56 = vld [vmem:[#allocation2] sm:$0xff] }
  0xcd   : > { %v600_v55 = vmax.f32 %v10853_v57, 0.0  ;;  %v10005_v57 = vld [vmem:[#allocation2 + $0x2c] sm:$0xff] }
  0xd0   : > { %v538_v59 = vpop.f32.mrf.mxu0 }
  0xd1   : > { %v539_v36 = vadd.f32 %v10841_v47, %v538_v59  ;;  %v9994_v59 = vld [vmem:[#allocation2 + $0x10] sm:$0xff] }
  0xd2   : > { %v584_v58 = vpop.f32.mrf.mxu1 }
  0xd3   : > { %v577_v43 = vadd.f32 %v10843_v48, %v539_v36  ;;  %v1041_v36 = vld [vmem:[#allocation2 + $0x80] sm:$0x1] }
  0xd8   : > { %v541_v62 = vpop.f32.mrf.mxu0 }
  0xd9   : > { %v542_v33 = vadd.f32 %v10841_v47, %v541_v62  ;;  %v10008_v62 = vld [vmem:[#allocation2 + $0x44] sm:$0xff] }
  0xda   : > { %v586_v61 = vpop.f32.mrf.mxu1 }
  0xdb   : > { %v580_v40 = vadd.f32 %v10848_v52, %v542_v33  ;;  %v601_v52 = vmax.f32 %v577_v43, 0.0  ;;  %v10022_v33 = vld [vmem:[#allocation2 + $0x78] sm:$0xff] }
  0xdd   : > { %v602_v49 = vmax.f32 %v580_v40, 0.0  ;;  %v10916_v48 = vpack.c.bf16 %v601_v52, %v600_v55  ;;  %v10028_v55 = vld [vmem:[%s12567_s4 + $0xa8] sm:$0xff] }
  0xe0   : > { %v543_v2 = vpop.f32.mrf.mxu0 }
  0xe1   : > { %v544_v29 = vadd.f32 %v10841_v47, %v543_v2  ;;  %v625_v2 = vld [vmem:[#allocation2 + $0x28] sm:$0x1] }
  0xe2   : > { %v589_v1 = vpop.f32.mrf.mxu1  ;;  %v647_v4 = vunpack.c.l.b16 %v625_v2 }
  0xe3   : > { %v582_v37 = vadd.f32 %v581_v54, %v544_v29 }
  0xe5   : > { %v603_v44 = vmax.f32 %v582_v37, 0.0  ;;  %v1063_v37 = vunpack.c.l.b16 %v1041_v36 }
  0xe7   : > { %v10910_v54 = vpack.c.bf16 %v603_v44, %v602_v49  ;;  %v1069_v43 = vpack.c.b16 %v1063_v37, %v1063_v37  ;;  %v10030_v44 = vld [vmem:[%s12567_s4 + $0xb8] sm:$0xff]  ;;  %v10029_v49 = vld [vmem:[%s12567_s4 + $0xb0] sm:$0xff] }
  0xe8   : > { %v546_v6 = vpop.f32.mrf.mxu0  ;;  %1197 = vmatpush.bf16.msrb.mxu0 %v10030_v44 }
  0xe9   : > { %v547_v25 = vadd.f32 %v10841_v47, %v546_v6  ;;  %v653_v6 = vpack.c.b16 %v647_v4, %v647_v4 }
  0xea   : > { %v591_v5 = vpop.f32.mrf.mxu1 }
  0xeb   : > { %v585_v34 = vadd.f32 %v584_v58, %v547_v25  ;;  %v10006_v58 = vld [vmem:[#allocation2 + $0x34] sm:$0xff] }
  0xec   : > { %v10021_v25 = vld [vmem:[#allocation2 + $0x70] sm:$0xff]  ;;  %1198 = vmatpush.bf16.msrb.mxu0 %v10029_v49 }
  0xed   : > { %v604_v41 = vmax.f32 %v585_v34, 0.0 }
  0xf0   : > { %v548_v10 = vpop.f32.mrf.mxu0  ;;  %1199 = vmatpush.bf16.msrb.mxu0 %v10028_v55 }
  0xf1   : > { %v549_v20 = vadd.f32 %v10841_v47, %v548_v10  ;;  %v10001_v10 = vld [vmem:[%s12567_s4 + $0x20] sm:$0xff] }
  0xf2   : > { %v594_v9 = vpop.f32.mrf.mxu1 }
  0xf3   : > { %v587_v30 = vadd.f32 %v586_v61, %v549_v20  ;;  %v9995_v61 = vld [vmem:[#allocation2 + $0x18] sm:$0xff] }
  0xf5   : > { %v605_v38 = vmax.f32 %v587_v30, 0.0 }
  0xf7   : > { %v10904_v46 = vpack.c.bf16 %v605_v38, %v604_v41 }
  0xf8   : > { %v551_v13 = vpop.f32.mrf.mxu0 }
  0xf9   : > { %v552_v18 = vadd.f32 %v10841_v47, %v551_v13  ;;  %v9999_v13 = vld [vmem:[%s12567_s4 + $0x10] sm:$0xff] }
  0xfa   : > { %v596_v12 = vpop.f32.mrf.mxu1 }
  0xfb   : > { %v590_v26 = vadd.f32 %v589_v1, %v552_v18  ;;  %v750_v1 = vld [vmem:[#allocation2 + $0x54] sm:$0x1]  ;;  %v10018_v12 = vld [vmem:[#allocation2 + $0x58] sm:$0xff] }
  0xfc   : > { %v772_v3 = vunpack.c.l.b16 %v750_v1 }
  0xfd   : > { %v606_v35 = vmax.f32 %v590_v26, 0.0 }
 0x100   : > { %v553_v14 = vpop.f32.mrf.mxu0 }
 0x101   : > { %v554_v16 = vadd.f32 %v10841_v47, %v553_v14  ;;  %v9998_v14 = vld [vmem:[%s12567_s4 + $0x8] sm:$0xff] }
 0x103   : > { %v592_v21 = vadd.f32 %v591_v5, %v554_v16  ;;  %v778_v5 = vpack.c.b16 %v772_v3, %v772_v3  ;;  %v10019_v16 = vld [vmem:[#allocation2 + $0x60] sm:$0xff] }
 0x105   : > { %v607_v31 = vmax.f32 %v592_v21, 0.0 }
 0x107   : > { %v10895_v39 = vpack.c.bf16 %v607_v31, %v606_v35 }
 0x108   : > { %v556_v15 = vpop.f32.mrf.mxu0 }
 0x109   : > { %v557_v17 = vadd.f32 %v10841_v47, %v556_v15  ;;  %v599_v47 = vmax.f32 %v572_v50, 0.0  ;;  %v9997_v15 = vld [vmem:[%s12567_s4] sm:$0xff] }
 0x10b   : > { %v595_v19 = vadd.f32 %v594_v9, %v557_v17  ;;  %v10922_v45 = vpack.c.bf16 %v599_v47, %v598_v53  ;;  %v10002_v9 = vld [vmem:[%s12567_s4 + $0x28] sm:$0xff]  ;;  %v10027_v47 = vld [vmem:[%s12567_s4 + $0xa0] sm:$0xff] }
 0x10c   : > { %v10020_v17 = vld [vmem:[#allocation2 + $0x68] sm:$0xff]  ;;  %1200 = vmatpush.bf16.msrb.mxu0 %v10027_v47 }
 0x10d   : > { %v608_v22 = vmax.f32 %v595_v19, 0.0  ;;  %v10035_v47 = vld [vmem:[#allocation2 + $0xa4] sm:$0xff] }
 0x10f   : > { %v614_v27 = vpack.c.bf16 %v608_v22, %v608_v22 }
 0x110   : > { %v558_v28 = vpop.f32.mrf.mxu0 }
 0x111   : > { %v10888_v32 = vand.u32 %v10883_v24, %v614_v27 }
 0x113   : > { %681 = vmatpush.bf16.msra.mxu2 %v10888_v32  ;;  %799 = vmatpush.bf16.msra.mxu3 %v10888_v32 }
 0x114   : > { %1306 = vmatpush.bf16.msra.mxu1 %v10888_v32 }
 0x117   : > { %682 = vmatpush.bf16.msra.mxu2 %v10895_v39  ;;  %800 = vmatpush.bf16.msra.mxu3 %v10895_v39 }
 0x118   : > { %1307 = vmatpush.bf16.msra.mxu1 %v10895_v39 }
 0x11b   : > { %683 = vmatpush.bf16.msra.mxu2 %v10904_v46  ;;  %801 = vmatpush.bf16.msra.mxu3 %v10904_v46 }
 0x11c   : > { %1308 = vmatpush.bf16.msra.mxu1 %v10904_v46 }
 0x11f   : > { %684 = vmatpush.bf16.msra.mxu2 %v10910_v54  ;;  %802 = vmatpush.bf16.msra.mxu3 %v10910_v54 }
 0x120   : > { %1309 = vmatpush.bf16.msra.mxu1 %v10910_v54 }
 0x123   : > { %685 = vmatpush.bf16.msra.mxu2 %v10916_v48  ;;  %803 = vmatpush.bf16.msra.mxu3 %v10916_v48 }
 0x124   : > { %1310 = vmatpush.bf16.msra.mxu1 %v10916_v48 }
 0x127   : > { %686 = vmatpush.bf16.msra.mxu2 %v10922_v45  ;;  %804 = vmatpush.bf16.msra.mxu3 %v10922_v45 }
 0x128   : > { %1311 = vmatpush.bf16.msra.mxu1 %v10922_v45 }
 0x12a   : > { %7619 = vmatmul.msk.bf16.vlgmr.msra.gmra.mxu2 %vm654_vm2, %v9992_v56  ;;  %7645 = vmatmul.msk.bf16.vlgmr.msra.gmra.mxu3 %vm654_vm2, %v10005_v57 }
 0x12b   : > { %1090 = vmatpush.bf16.msrb.mxu3 %v10888_v32  ;;  %992 = vmatpush.bf16.msrb.mxu2 %v10004_v7 }
 0x12f   : > { %1091 = vmatpush.bf16.msrb.mxu3 %v10895_v39  ;;  %993 = vmatpush.bf16.msrb.mxu2 %v10003_v8 }
 0x133   : > { %1092 = vmatpush.bf16.msrb.mxu3 %v10904_v46  ;;  %994 = vmatpush.bf16.msrb.mxu2 %v10002_v9 }
 0x137   : > { %1093 = vmatpush.bf16.msrb.mxu3 %v10910_v54  ;;  %995 = vmatpush.bf16.msrb.mxu2 %v10001_v10 }
 0x13a   : > { %7620 = vmatmul.msk.bf16.gmra.mxu2 %vm654_vm2, %v9993_v51  ;;  %7646 = vmatmul.msk.bf16.gmra.mxu3 %vm654_vm2, %v10006_v58  ;;  %v10044_v58 = vld [vmem:[#allocation2 + $0xb0] sm:$0xff] }
 0x13b   : > { %1094 = vmatpush.bf16.msrb.mxu3 %v10916_v48  ;;  %996 = vmatpush.bf16.msrb.mxu2 %v10000_v11 }
 0x13f   : > { %1095 = vmatpush.bf16.msrb.mxu3 %v10922_v45  ;;  %997 = vmatpush.bf16.msrb.mxu2 %v9999_v13 }
 0x143   : > { %1522 = vmatpush.bf16.msra.mxu3 %v10888_v32  ;;  %998 = vmatpush.bf16.msrb.mxu2 %v9998_v14  ;;  %v10031_v14 = vld [vmem:[#allocation2 + $0x84] sm:$0xff] }
 0x147   : > { %1523 = vmatpush.bf16.msra.mxu3 %v10895_v39  ;;  %999 = vmatpush.bf16.msrb.mxu2 %v9997_v15 }
 0x14a   : > { %7621 = vmatmul.msk.bf16.gmra.mxu2 %vm654_vm2, %v9994_v59  ;;  %7647 = vmatmul.msk.bf16.gmra.mxu3 %vm654_vm2, %v10007_v60  ;;  %v10026_v59 = vld [vmem:[%s12567_s4 + $0x98] sm:$0xff]  ;;  %v10025_v60 = vld [vmem:[%s12567_s4 + $0x90] sm:$0xff] }
 0x14b   : > { %1524 = vmatpush.bf16.msra.mxu3 %v10904_v46  ;;  %1201 = vmatpush.bf16.msrb.mxu0 %v10026_v59 }
 0x14f   : > { %1525 = vmatpush.bf16.msra.mxu3 %v10910_v54  ;;  %1202 = vmatpush.bf16.msrb.mxu0 %v10025_v60 }
 0x153   : > { %1526 = vmatpush.bf16.msra.mxu3 %v10916_v48 }
 0x157   : > { %1527 = vmatpush.bf16.msra.mxu3 %v10922_v45 }
 0x15a   : > { %7622 = vmatmul.msk.bf16.gmra.mxu2 %vm654_vm2, %v9995_v61  ;;  %7648 = vmatmul.msk.bf16.gmra.mxu3 %vm654_vm2, %v10008_v62 }
 0x16a   : > { %7623 = vmatmul.msk.bf16.gmra.mxu2 %vm654_vm2, %v9996_v63  ;;  %7649 = vmatmul.msk.bf16.gmra.mxu3 %vm654_vm2, %v10009_v0  ;;  %v10024_v63 = vld [vmem:[%s12567_s4 + $0x88] sm:$0xff]  ;;  %v10023_v0 = vld [vmem:[%s12567_s4 + $0x80] sm:$0xff] }
 0x16b   : > { %1203 = vmatpush.bf16.msrb.mxu0 %v10024_v63 }
 0x16f   : > { %1204 = vmatpush.bf16.msrb.mxu0 %v10023_v0  ;;  %v1257_v0 = vld [vmem:[#allocation2 + $0xac] sm:$0x1] }
 0x17a   : > { %7650 = vmatmul.msk.bf16.gmra.mxu3 %vm654_vm2, %v778_v5  ;;  %7624 = vmatmul.msk.bf16.gmra.mxu2 %vm654_vm2, %v653_v6  ;;  %v10045_v5 = vld [vmem:[#allocation2 + $0xb8] sm:$0xff] }
 0x18a   : > { %7751 = vmatmul.msk.bf16.vlgmr.msrb.gmra.mxu3 %vm654_vm2, %v10018_v12  ;;  %v10046_v12 = vld [vmem:[#allocation2 + $0xc0] sm:$0xff] }
 0x18b   : > { %1954 = vmatpush.bf16.msrb.mxu3 %v10888_v32 }
 0x18f   : > { %1955 = vmatpush.bf16.msrb.mxu3 %v10895_v39 }
 0x193   : > { %1956 = vmatpush.bf16.msrb.mxu3 %v10904_v46 }
 0x197   : > { %1957 = vmatpush.bf16.msrb.mxu3 %v10910_v54 }
 0x19a   : > { %7752 = vmatmul.msk.bf16.gmra.mxu3 %vm654_vm2, %v10019_v16 }
 0x19b   : > { %1958 = vmatpush.bf16.msrb.mxu3 %v10916_v48 }
 0x19f   : > { %1959 = vmatpush.bf16.msrb.mxu3 %v10922_v45 }
 0x1aa   : > { %7753 = vmatmul.msk.bf16.gmra.mxu3 %vm654_vm2, %v10020_v17  ;;  %v10047_v17 = vld [vmem:[#allocation2 + $0xc8] sm:$0xff] }
 0x1ad   : > { %v688_v18 = vpop.f32.mrf.mxu2  ;;  %v806_v19 = vpop.f32.mrf.mxu3 }
 0x1b5   : > { %v690_v20 = vpop.f32.mrf.mxu2  ;;  %v808_v21 = vpop.f32.mrf.mxu3 }
 0x1b6   : > { %v717_v22 = vpack.c.bf16 %v690_v20, %v688_v18  ;;  %v835_v23 = vpack.c.bf16 %v808_v21, %v806_v19  ;;  %v10032_v19 = vld [vmem:[#allocation2 + $0x8c] sm:$0xff] }
 0x1b8   : > { %914 = vmatmul.bf16.vlgmr.msrb.gmra.mxu1 %v835_v23  ;;  %1000 = vmatmul.bf16.vlgmr.msrb.gmra.mxu2 %v717_v22  ;;  %v10048_v22 = vld [vmem:[#allocation2 + $0xd0] sm:$0xff] }
 0x1b9   : > { %1738 = vmatpush.bf16.msrb.mxu1 %v10888_v32 }
 0x1ba   : > { %7754 = vmatmul.msk.bf16.gmra.mxu3 %vm654_vm2, %v10021_v25  ;;  %v1473_v25 = vld [vmem:[#allocation2 + $0xd8] sm:$0x1] }
 0x1bd   : > { %1739 = vmatpush.bf16.msrb.mxu1 %v10895_v39  ;;  %v693_v26 = vpop.f32.mrf.mxu2  ;;  %v811_v27 = vpop.f32.mrf.mxu3 }
 0x1c1   : > { %1740 = vmatpush.bf16.msrb.mxu1 %v10904_v46 }
 0x1c5   : > { %1741 = vmatpush.bf16.msrb.mxu1 %v10910_v54  ;;  %v695_v28 = vpop.f32.mrf.mxu2  ;;  %v813_v29 = vpop.f32.mrf.mxu3 }
 0x1c6   : > { %v836_v30 = vpack.c.bf16 %v813_v29, %v811_v27  ;;  %v718_v31 = vpack.c.bf16 %v695_v28, %v693_v26  ;;  %v1495_v26 = vunpack.c.l.b16 %v1473_v25  ;;  %v10033_v27 = vld [vmem:[#allocation2 + $0x94] sm:$0xff] }
 0x1c7   : > { %v10038_v25 = vld [vmem:[%s12567_s4 + $0xd0] sm:$0xff] }
 0x1c8   : > { %919 = vmatmul.bf16.gmra.mxu1 %v836_v30  ;;  %1005 = vmatmul.bf16.gmra.mxu2 %v718_v31  ;;  %v1501_v31 = vpack.c.b16 %v1495_v26, %v1495_v26  ;;  %v10049_v26 = vld [vmem:[%s12567_s4 + $0x100] sm:$0xff] }
 0x1c9   : > { %1742 = vmatpush.bf16.msrb.mxu1 %v10916_v48 }
 0x1ca   : > { %7755 = vmatmul.msk.bf16.gmra.mxu3 %vm654_vm2, %v10022_v33 }
 0x1cd   : > { %1743 = vmatpush.bf16.msrb.mxu1 %v10922_v45  ;;  %v698_v34 = vpop.f32.mrf.mxu2  ;;  %v816_v35 = vpop.f32.mrf.mxu3 }
 0x1d5   : > { %v700_v38 = vpop.f32.mrf.mxu2  ;;  %v818_v40 = vpop.f32.mrf.mxu3 }
 0x1d6   : > { %v837_v41 = vpack.c.bf16 %v818_v40, %v816_v35  ;;  %v719_v42 = vpack.c.bf16 %v700_v38, %v698_v34  ;;  %v10034_v38 = vld [vmem:[#allocation2 + $0x9c] sm:$0xff] }
 0x1d8   : > { %924 = vmatmul.bf16.gmra.mxu1 %v837_v41  ;;  %1010 = vmatmul.bf16.gmra.mxu2 %v719_v42 }
 0x1da   : > { %7756 = vmatmul.msk.bf16.gmra.mxu3 %vm654_vm2, %v1069_v43  ;;  %v10070_v43 = vld [vmem:[#allocation2 + $0x108] sm:$0xff] }
 0x1dd   : > { %v703_v50 = vpop.f32.mrf.mxu2  ;;  %v821_v52 = vpop.f32.mrf.mxu3 }
 0x1e5   : > { %v705_v53 = vpop.f32.mrf.mxu2  ;;  %v823_v56 = vpop.f32.mrf.mxu3 }
 0x1e6   : > { %v838_v57 = vpack.c.bf16 %v823_v56, %v821_v52  ;;  %v720_v51 = vpack.c.bf16 %v705_v53, %v703_v50 }
 0x1e8   : > { %929 = vmatmul.bf16.gmra.mxu1 %v838_v57  ;;  %1015 = vmatmul.bf16.gmra.mxu2 %v720_v51  ;;  %v10071_v51 = vld [vmem:[#allocation2 + $0x110] sm:$0xff] }
 0x1ea   : > { %7899 = vmatmul.msk.bf16.vlgmr.msra.gmra.mxu3 %vm654_vm2, %v10044_v58  ;;  %v10056_v58 = vld [vmem:[%s12567_s4 + $0x138] sm:$0xff] }
 0x1eb   : > { %2386 = vmatpush.bf16.msra.mxu3 %v10888_v32  ;;  %1629 = vmatpush.bf16.msra.mxu0 %v10056_v58 }
 0x1ed   : > { %v708_v61 = vpop.f32.mrf.mxu2  ;;  %v826_v62 = vpop.f32.mrf.mxu3 }
 0x1ef   : > { %2387 = vmatpush.bf16.msra.mxu3 %v10895_v39 }
 0x1f3   : > { %2388 = vmatpush.bf16.msra.mxu3 %v10904_v46 }
 0x1f5   : > { %v710_v1 = vpop.f32.mrf.mxu2  ;;  %v828_v2 = vpop.f32.mrf.mxu3 }
 0x1f6   : > { %v839_v3 = vpack.c.bf16 %v828_v2, %v826_v62  ;;  %v721_v4 = vpack.c.bf16 %v710_v1, %v708_v61  ;;  %v10055_v61 = vld [vmem:[%s12567_s4 + $0x130] sm:$0xff]  ;;  %v1279_v1 = vunpack.c.l.b16 %v1257_v0  ;;  %v10043_v2 = vld [vmem:[%s12567_s4 + $0xf8] sm:$0xff] }
 0x1f7   : > { %2389 = vmatpush.bf16.msra.mxu3 %v10910_v54  ;;  %1630 = vmatpush.bf16.msra.mxu0 %v10055_v61  ;;  %v10059_v0 = vld [vmem:[#allocation2 + $0xec] sm:$0xff] }
 0x1f8   : > { %934 = vmatmul.bf16.gmra.mxu1 %v839_v3  ;;  %1020 = vmatmul.bf16.gmra.mxu2 %v721_v4  ;;  %v10054_v3 = vld [vmem:[%s12567_s4 + $0x128] sm:$0xff] }
 0x1f9   : > { %1413 = vmatpush.bf16.msra.mxu2 %v10043_v2 }
 0x1fa   : > { %7900 = vmatmul.msk.bf16.gmra.mxu3 %vm654_vm2, %v10045_v5 }
 0x1fb   : > { %2390 = vmatpush.bf16.msra.mxu3 %v10916_v48  ;;  %1631 = vmatpush.bf16.msra.mxu0 %v10054_v3 }
 0x1fd   : > { %v831_v6 = vpop.f32.mrf.mxu3  ;;  %v713_v7 = vpop.f32.mrf.mxu2 }
 0x1fe   : > { %v840_v8 = vpack.c.bf16 %v831_v6, %v831_v6  ;;  %v722_v9 = vpack.c.bf16 %v713_v7, %v713_v7  ;;  %v1285_v6 = vpack.c.b16 %v1279_v1, %v1279_v1  ;;  %v10042_v7 = vld [vmem:[%s12567_s4 + $0xf0] sm:$0xff] }
 0x1ff   : > { %2391 = vmatpush.bf16.msra.mxu3 %v10922_v45  ;;  %1414 = vmatpush.bf16.msra.mxu2 %v10042_v7 }
 0x205   : > { %v833_v10 = vpop.f32.mrf.mxu3  ;;  %v715_v11 = vpop.f32.mrf.mxu2 }
 0x206   : > { %v10072_v11 = vld [vmem:[#allocation2 + $0x118] sm:$0xff] }
 0x208   : > { %939 = vmatmul.bf16.gmra.mxu1 %v840_v8  ;;  %1025 = vmatmul.bf16.gmra.mxu2 %v722_v9  ;;  %v10053_v8 = vld [vmem:[%s12567_s4 + $0x120] sm:$0xff] }
 0x209   : > { %1632 = vmatpush.bf16.msra.mxu0 %v10053_v8 }
 0x20a   : > { %7901 = vmatmul.msk.bf16.gmra.mxu3 %vm654_vm2, %v10046_v12  ;;  %v10041_v12 = vld [vmem:[%s12567_s4 + $0xe8] sm:$0xff] }
 0x20b   : > { %1415 = vmatpush.bf16.msra.mxu2 %v10041_v12 }
 0x20d   : > { %v1097_v13 = vpop.f32.mrf.mxu3 }
 0x215   : > { %v1099_v15 = vpop.f32.mrf.mxu3 }
 0x216   : > { %v1126_v16 = vpack.c.bf16 %v1099_v15, %v1097_v13  ;;  %v10052_v13 = vld [vmem:[%s12567_s4 + $0x118] sm:$0xff] }
 0x217   : > { %1633 = vmatpush.bf16.msra.mxu0 %v10052_v13 }
 0x218   : > { %1205 = vmatmul.bf16.vlgmr.msrb.gmra.mxu0 %v1126_v16  ;;  %7825 = vmatmul.msk.bf16.vlgmr.msra.gmra.mxu1 %vm654_vm2, %v10031_v14  ;;  %v10040_v16 = vld [vmem:[%s12567_s4 + $0xe0] sm:$0xff] }
 0x219   : > { %2170 = vmatpush.bf16.msra.mxu1 %v10888_v32  ;;  %1416 = vmatpush.bf16.msra.mxu2 %v10040_v16 }
 0x21a   : > { %7902 = vmatmul.msk.bf16.gmra.mxu3 %vm654_vm2, %v10047_v17  ;;  %v10051_v17 = vld [vmem:[%s12567_s4 + $0x110] sm:$0xff] }
 0x21b   : > { %1634 = vmatpush.bf16.msra.mxu0 %v10051_v17 }
 0x21d   : > { %2171 = vmatpush.bf16.msra.mxu1 %v10895_v39  ;;  %v1102_v18 = vpop.f32.mrf.mxu3 }
 0x221   : > { %2172 = vmatpush.bf16.msra.mxu1 %v10904_v46 }
 0x225   : > { %2173 = vmatpush.bf16.msra.mxu1 %v10910_v54  ;;  %v1104_v20 = vpop.f32.mrf.mxu3 }
 0x226   : > { %v1127_v21 = vpack.c.bf16 %v1104_v20, %v1102_v18  ;;  %v10039_v20 = vld [vmem:[%s12567_s4 + $0xd8] sm:$0xff] }
 0x227   : > { %1417 = vmatpush.bf16.msra.mxu2 %v10039_v20 }
 0x228   : > { %1210 = vmatmul.bf16.gmra.mxu0 %v1127_v21  ;;  %7826 = vmatmul.msk.bf16.gmra.mxu1 %vm654_vm2, %v10032_v19  ;;  %v10050_v21 = vld [vmem:[%s12567_s4 + $0x108] sm:$0xff] }
 0x229   : > { %2174 = vmatpush.bf16.msra.mxu1 %v10916_v48  ;;  %1635 = vmatpush.bf16.msra.mxu0 %v10050_v21 }
 0x22a   : > { %7903 = vmatmul.msk.bf16.gmra.mxu3 %vm654_vm2, %v10048_v22 }
 0x22b   : > { %1418 = vmatpush.bf16.msra.mxu2 %v10038_v25 }
 0x22d   : > { %2175 = vmatpush.bf16.msra.mxu1 %v10922_v45  ;;  %v1107_v23 = vpop.f32.mrf.mxu3  ;;  %1636 = vmatpush.bf16.msra.mxu0 %v10049_v26 }
 0x235   : > { %v915_v28 = vpop.f32.mrf.mxu1  ;;  %v1109_v29 = vpop.f32.mrf.mxu3 }
 0x236   : > { %v1128_v30 = vpack.c.bf16 %v1109_v29, %v1107_v23  ;;  %v10057_v23 = vld [vmem:[#allocation2 + $0xdc] sm:$0xff] }
 0x238   : > { %1215 = vmatmul.bf16.gmra.mxu0 %v1128_v30  ;;  %7827 = vmatmul.msk.bf16.gmra.mxu1 %vm654_vm2, %v10033_v27 }
 0x23a   : > { %7904 = vmatmul.msk.bf16.gmra.mxu3 %vm654_vm2, %v1501_v31  ;;  %v10037_v31 = vld [vmem:[%s12567_s4 + $0xc8] sm:$0xff] }
 0x23b   : > { %v1001_v33 = vpop.f32.mrf.mxu2  ;;  %1419 = vmatpush.bf16.msra.mxu2 %v10037_v31  ;;  %v10097_v31 = vld [vmem:[#allocation2 + $0x168] sm:$0xff] }
 0x23c   : > { %v11038_v34 = vadd.f32 %v1001_v33, %v915_v28  ;;  %v10073_v28 = vld [vmem:[#allocation2 + $0x120] sm:$0xff] }
 0x23d   : > { %v11040_v35 = vpop.f32.mrf.mxu1  ;;  %v1112_v36 = vpop.f32.mrf.mxu3 }
 0x243   : > { %v11042_v37 = vpop.f32.mrf.mxu2 }
 0x244   : > { %v1004_v8 = vadd.f32 %v11042_v37, %v11040_v35 }
 0x245   : > { %v920_v40 = vpop.f32.mrf.mxu1  ;;  %v1114_v41 = vpop.f32.mrf.mxu3 }
 0x246   : > { %v1129_v42 = vpack.c.bf16 %v1114_v41, %v1112_v36 }
 0x248   : > { %1220 = vmatmul.bf16.gmra.mxu0 %v1129_v42  ;;  %7828 = vmatmul.msk.bf16.gmra.mxu1 %vm654_vm2, %v10034_v38  ;;  %v10036_v38 = vld [vmem:[%s12567_s4 + $0xc0] sm:$0xff] }
 0x249   : > { %1420 = vmatpush.bf16.msra.mxu2 %v10036_v38  ;;  %v10081_v38 = vld [vmem:[%s12567_s4 + $0x1b0] sm:$0xff] }
 0x24a   : > { %8047 = vmatmul.msk.bf16.vlgmr.msrb.gmra.mxu3 %vm654_vm2, %v10070_v43  ;;  %v10058_v43 = vld [vmem:[#allocation2 + $0xe4] sm:$0xff] }
 0x24b   : > { %2818 = vmatpush.bf16.msrb.mxu3 %v10888_v32  ;;  %v1006_v44 = vpop.f32.mrf.mxu2 }
 0x24c   : > { %v11047_v49 = vadd.f32 %v1006_v44, %v920_v40 }
 0x24d   : > { %v11049_v50 = vpop.f32.mrf.mxu1  ;;  %v1117_v52 = vpop.f32.mrf.mxu3 }
 0x24f   : > { %2819 = vmatpush.bf16.msrb.mxu3 %v10895_v39 }
 0x253   : > { %2820 = vmatpush.bf16.msrb.mxu3 %v10904_v46  ;;  %v11053_v55 = vpop.f32.mrf.mxu2 }
 0x254   : > { %v1009_v35 = vadd.f32 %v11053_v55, %v11049_v50  ;;  %v10082_v55 = vld [vmem:[%s12567_s4 + $0x1b8] sm:$0xff] }
 0x255   : > { %v925_v53 = vpop.f32.mrf.mxu1  ;;  %v1119_v56 = vpop.f32.mrf.mxu3  ;;  %2061 = vmatpush.bf16.msrb.mxu0 %v10082_v55 }
 0x256   : > { %v1130_v57 = vpack.c.bf16 %v1119_v56, %v1117_v52  ;;  %v10074_v52 = vld [vmem:[#allocation2 + $0x128] sm:$0xff] }
 0x257   : > { %2821 = vmatpush.bf16.msrb.mxu3 %v10910_v54 }
 0x258   : > { %1225 = vmatmul.bf16.gmra.mxu0 %v1130_v57  ;;  %7829 = vmatmul.msk.bf16.gmra.mxu1 %vm654_vm2, %v10035_v47 }
 0x259   : > { %2062 = vmatpush.bf16.msrb.mxu0 %v10081_v38 }
 0x25a   : > { %8048 = vmatmul.msk.bf16.gmra.mxu3 %vm654_vm2, %v10071_v51 }
 0x25b   : > { %2822 = vmatpush.bf16.msrb.mxu3 %v10916_v48  ;;  %v1011_v59 = vpop.f32.mrf.mxu2 }
 0x25c   : > { %v11062_v60 = vadd.f32 %v1011_v59, %v925_v53  ;;  %v1905_v59 = vld [vmem:[#allocation2 + $0x130] sm:$0x1] }
 0x25d   : > { %v11067_v62 = vpop.f32.mrf.mxu1  ;;  %v1122_v63 = vpop.f32.mrf.mxu3  ;;  %v1927_v61 = vunpack.c.l.b16 %v1905_v59  ;;  %v10079_v59 = vld [vmem:[%s12567_s4 + $0x1a0] sm:$0xff] }
 0x25e   : > { %v1131_v5 = vpack.c.bf16 %v1122_v63, %v1122_v63 }
 0x25f   : > { %2823 = vmatpush.bf16.msrb.mxu3 %v10922_v45 }
 0x263   : > { %v11076_v4 = vpop.f32.mrf.mxu2 }
 0x265   : > { %v930_v9 = vpop.f32.mrf.mxu1  ;;  %v1124_v10 = vpop.f32.mrf.mxu3 }
 0x268   : > { %1230 = vmatmul.bf16.gmra.mxu0 %v1131_v5  ;;  %7830 = vmatmul.msk.bf16.gmra.mxu1 %vm654_vm2, %v1285_v6  ;;  %v1933_v5 = vpack.c.b16 %v1927_v61, %v1927_v61 }
 0x26a   : > { %8049 = vmatmul.msk.bf16.gmra.mxu3 %vm654_vm2, %v10072_v11 }
 0x26b   : > { %v1016_v14 = vpop.f32.mrf.mxu2 }
 0x26c   : > { %v11092_v15 = vadd.f32 %v1016_v14, %v930_v9 }
 0x26d   : > { %v11100_v18 = vpop.f32.mrf.mxu1  ;;  %v1529_v19 = vpop.f32.mrf.mxu3 }
 0x273   : > { %v11108_v22 = vpop.f32.mrf.mxu2 }
 0x275   : > { %v935_v27 = vpop.f32.mrf.mxu1  ;;  %v1531_v29 = vpop.f32.mrf.mxu3 }
 0x276   : > { %v1558_v30 = vpack.c.bf16 %v1531_v29, %v1529_v19  ;;  %v10096_v19 = vld [vmem:[#allocation2 + $0x160] sm:$0xff] }
 0x278   : > { %7973 = vmatmul.msk.bf16.vlgmr.msrb.gmra.mxu1 %vm654_vm2, %v10057_v23  ;;  %1637 = vmatmul.bf16.vlgmr.msra.gmra.mxu0 %v1558_v30 }
 0x279   : > { %2602 = vmatpush.bf16.msrb.mxu1 %v10888_v32 }
 0x27a   : > { %8050 = vmatmul.msk.bf16.gmra.mxu3 %vm654_vm2, %v10073_v28 }
 0x27b   : > { %v1021_v33 = vpop.f32.mrf.mxu2 }
 0x27c   : > { %v11122_v36 = vadd.f32 %v1021_v33, %v935_v27  ;;  %v10061_v27 = vld [vmem:[#allocation2 + $0xfc] sm:$0xff] }
 0x27d   : > { %2603 = vmatpush.bf16.msrb.mxu1 %v10895_v39  ;;  %v11128_v40 = vpop.f32.mrf.mxu1  ;;  %v1534_v41 = vpop.f32.mrf.mxu3 }
 0x281   : > { %2604 = vmatpush.bf16.msrb.mxu1 %v10904_v46 }
 0x283   : > { %v11131_v42 = vpop.f32.mrf.mxu2 }
 0x285   : > { %2605 = vmatpush.bf16.msrb.mxu1 %v10910_v54  ;;  %v940_v44 = vpop.f32.mrf.mxu1  ;;  %v1536_v47 = vpop.f32.mrf.mxu3 }
 0x286   : > { %v1559_v53 = vpack.c.bf16 %v1536_v47, %v1534_v41 }
 0x288   : > { %7974 = vmatmul.msk.bf16.gmra.mxu1 %vm654_vm2, %v10058_v43  ;;  %1642 = vmatmul.bf16.gmra.mxu0 %v1559_v53 }
 0x289   : > { %2606 = vmatpush.bf16.msrb.mxu1 %v10916_v48 }
 0x28a   : > { %8051 = vmatmul.msk.bf16.gmra.mxu3 %vm654_vm2, %v10074_v52 }
 0x28b   : > { %v1026_v56 = vpop.f32.mrf.mxu2 }
 0x28c   : > { %v11137_v57 = vadd.f32 %v1026_v56, %v940_v44  ;;  %v1689_v44 = vld [vmem:[#allocation2 + $0x104] sm:$0x1] }
 0x28d   : > { %2607 = vmatpush.bf16.msrb.mxu1 %v10922_v45  ;;  %v942_v51 = vpop.f32.mrf.mxu1  ;;  %v1539_v58 = vpop.f32.mrf.mxu3  ;;  %v1711_v56 = vunpack.c.l.b16 %v1689_v44 }
 0x28f   : > { %v1717_v51 = vpack.c.b16 %v1711_v56, %v1711_v56 }
 0x293   : > { %v1028_v63 = vpop.f32.mrf.mxu2 }
 0x295   : > { %v1206_v1 = vpop.f32.mrf.mxu0  ;;  %v1313_v2 = vpop.f32.mrf.mxu1 }
 0x296   : > { %v11141_v3 = vadd.f32 %v1206_v1, %v11038_v34  ;;  %v1541_v6 = vpop.f32.mrf.mxu3  ;;  %v10060_v34 = vld [vmem:[#allocation2 + $0xf4] sm:$0xff] }
 0x297   : > { %v1560_v7 = vpack.c.bf16 %v1541_v6, %v1539_v58  ;;  %v10068_v58 = vld [vmem:[%s12567_s4 + $0x170] sm:$0xff]  ;;  %v10067_v6 = vld [vmem:[%s12567_s4 + $0x168] sm:$0xff] }
 0x298   : > { %7975 = vmatmul.msk.bf16.gmra.mxu1 %vm654_vm2, %v10059_v0  ;;  %v10098_v1 = vld [vmem:[#allocation2 + $0x170] sm:$0xff] }
 0x299   : > { %1647 = vmatmul.bf16.gmra.mxu0 %v1560_v7  ;;  %v10078_v7 = vld [vmem:[%s12567_s4 + $0x198] sm:$0xff] }
 0x29a   : > { %8052 = vmatmul.msk.bf16.gmra.mxu3 %vm654_vm2, %v1933_v5 }
 0x29d   : > { %v1208_v9 = vpop.f32.mrf.mxu0  ;;  %v1315_v10 = vpop.f32.mrf.mxu1 }
 0x29e   : > { %v11147_v11 = vadd.f32 %v1208_v9, %v1004_v8  ;;  %v1342_v12 = vpack.c.bf16 %v1315_v10, %v1313_v2  ;;  %v1544_v13 = vpop.f32.mrf.mxu3  ;;  %v10066_v8 = vld [vmem:[%s12567_s4 + $0x160] sm:$0xff]  ;;  %v10077_v9 = vld [vmem:[%s12567_s4 + $0x190] sm:$0xff] }
 0x2a0   : > { %1421 = vmatmul.bf16.vlgmr.msra.gmra.mxu2 %v1342_v12 }
 0x2a5   : > { %v1211_v14 = vpop.f32.mrf.mxu0  ;;  %v1318_v16 = vpop.f32.mrf.mxu1 }
 0x2a6   : > { %v11150_v17 = vadd.f32 %v1211_v14, %v11047_v49  ;;  %v1546_v20 = vpop.f32.mrf.mxu3 }
 0x2a7   : > { %v1561_v21 = vpack.c.bf16 %v1546_v20, %v1544_v13  ;;  %v10075_v20 = vld [vmem:[%s12567_s4 + $0x180] sm:$0xff] }
 0x2a8   : > { %7976 = vmatmul.msk.bf16.gmra.mxu1 %vm654_vm2, %v10060_v34 }
 0x2a9   : > { %1652 = vmatmul.bf16.gmra.mxu0 %v1561_v21 }
 0x2aa   : > { %8195 = vmatmul.msk.bf16.vlgmr.msra.gmra.mxu3 %vm654_vm2, %v10096_v19  ;;  %v10064_v19 = vld [vmem:[%s12567_s4 + $0x150] sm:$0xff] }
 0x2ab   : > { %3250 = vmatpush.bf16.msra.mxu3 %v10888_v32 }
 0x2ad   : > { %v1213_v37 = vpop.f32.mrf.mxu0  ;;  %v1320_v23 = vpop.f32.mrf.mxu1 }
 0x2ae   : > { %v11157_v25 = vadd.f32 %v1213_v37, %v1009_v35  ;;  %v1343_v26 = vpack.c.bf16 %v1320_v23, %v1318_v16  ;;  %v1549_v49 = vpop.f32.mrf.mxu3  ;;  %v10083_v16 = vld [vmem:[#allocation2 + $0x134] sm:$0xff] }
 0x2af   : > { %3251 = vmatpush.bf16.msra.mxu3 %v10895_v39  ;;  %v10099_v23 = vld [vmem:[#allocation2 + $0x178] sm:$0xff] }
 0x2b0   : > { %1426 = vmatmul.bf16.gmra.mxu2 %v1343_v26 }
 0x2b3   : > { %3252 = vmatpush.bf16.msra.mxu3 %v10904_v46 }
 0x2b5   : > { %v1216_v28 = vpop.f32.mrf.mxu0  ;;  %v1323_v29 = vpop.f32.mrf.mxu1 }
 0x2b6   : > { %v11162_v30 = vadd.f32 %v1216_v28, %v11062_v60  ;;  %v1551_v33 = vpop.f32.mrf.mxu3  ;;  %v1014_v60 = vadd.f32 %v11076_v4, %v11067_v62  ;;  %v10069_v62 = vld [vmem:[%s12567_s4 + $0x178] sm:$0xff]  ;;  %v10080_v4 = vld [vmem:[%s12567_s4 + $0x1a8] sm:$0xff]  ;;  %v10062_v28 = vld [vmem:[%s12567_s4 + $0x140] sm:$0xff] }
 0x2b7   : > { %3253 = vmatpush.bf16.msra.mxu3 %v10910_v54  ;;  %v1562_v50 = vpack.c.bf16 %v1551_v33, %v1549_v49  ;;  %1845 = vmatpush.bf16.msrb.mxu2 %v10069_v62 }
 0x2b8   : > { %7977 = vmatmul.msk.bf16.gmra.mxu1 %vm654_vm2, %v10061_v27  ;;  %2063 = vmatpush.bf16.msrb.mxu0 %v10080_v4  ;;  %v10063_v27 = vld [vmem:[%s12567_s4 + $0x148] sm:$0xff] }
 0x2b9   : > { %1657 = vmatmul.bf16.gmra.mxu0 %v1562_v50  ;;  %v2337_v4 = vld [vmem:[#allocation2 + $0x188] sm:$0x1] }
 0x2ba   : > { %8196 = vmatmul.msk.bf16.gmra.mxu3 %vm654_vm2, %v10097_v31 }
 0x2bb   : > { %3254 = vmatpush.bf16.msra.mxu3 %v10916_v48  ;;  %1846 = vmatpush.bf16.msrb.mxu2 %v10068_v58 }
 0x2bc   : > { %2064 = vmatpush.bf16.msrb.mxu0 %v10079_v59 }
 0x2bd   : > { %v1218_v41 = vpop.f32.mrf.mxu0  ;;  %v1325_v43 = vpop.f32.mrf.mxu1 }
 0x2be   : > { %v11176_v52 = vadd.f32 %v1218_v41, %v1014_v60  ;;  %v1344_v47 = vpack.c.bf16 %v1325_v43, %v1323_v29  ;;  %v1554_v53 = vpop.f32.mrf.mxu3  ;;  %v10084_v60 = vld [vmem:[#allocation2 + $0x13c] sm:$0xff] }
 0x2bf   : > { %3255 = vmatpush.bf16.msra.mxu3 %v10922_v45  ;;  %v1563_v2 = vpack.c.bf16 %v1554_v53, %v1554_v53  ;;  %1847 = vmatpush.bf16.msrb.mxu2 %v10067_v6  ;;  %v10100_v41 = vld [vmem:[#allocation2 + $0x180] sm:$0xff] }
 0x2c0   : > { %1431 = vmatmul.bf16.gmra.mxu2 %v1344_v47  ;;  %2065 = vmatpush.bf16.msrb.mxu0 %v10078_v7 }
 0x2c3   : > { %1848 = vmatpush.bf16.msrb.mxu2 %v10066_v8 }
 0x2c4   : > { %2066 = vmatpush.bf16.msrb.mxu0 %v10077_v9  ;;  %v10122_v9 = vld [vmem:[#allocation2 + $0x1b8] sm:$0xff] }
 0x2c5   : > { %v1221_v61 = vpop.f32.mrf.mxu0  ;;  %v1328_v63 = vpop.f32.mrf.mxu1 }
 0x2c6   : > { %v11192_v0 = vadd.f32 %v1221_v61, %v11092_v15  ;;  %v1556_v5 = vpop.f32.mrf.mxu3  ;;  %v1019_v15 = vadd.f32 %v11108_v22, %v11100_v18  ;;  %v10065_v18 = vld [vmem:[%s12567_s4 + $0x158] sm:$0xff]  ;;  %v10076_v22 = vld [vmem:[%s12567_s4 + $0x188] sm:$0xff] }
 0x2c7   : > { %1849 = vmatpush.bf16.msrb.mxu2 %v10065_v18 }
 0x2c8   : > { %7978 = vmatmul.msk.bf16.gmra.mxu1 %vm654_vm2, %v1717_v51  ;;  %2067 = vmatpush.bf16.msrb.mxu0 %v10076_v22  ;;  %v10085_v51 = vld [vmem:[#allocation2 + $0x144] sm:$0xff] }
 0x2c9   : > { %1662 = vmatmul.bf16.gmra.mxu0 %v1563_v2 }
 0x2ca   : > { %8197 = vmatmul.msk.bf16.gmra.mxu3 %vm654_vm2, %v10098_v1 }
 0x2cb   : > { %1850 = vmatpush.bf16.msrb.mxu2 %v10064_v19  ;;  %v10087_v19 = vld [vmem:[#allocation2 + $0x154] sm:$0xff] }
 0x2cc   : > { %2068 = vmatpush.bf16.msrb.mxu0 %v10075_v20 }
 0x2cd   : > { %v1223_v10 = vpop.f32.mrf.mxu0  ;;  %v1330_v12 = vpop.f32.mrf.mxu1 }
 0x2ce   : > { %v11210_v13 = vadd.f32 %v1223_v10, %v1019_v15  ;;  %v1345_v34 = vpack.c.bf16 %v1330_v12, %v1328_v63  ;;  %v1961_v14 = vpop.f32.mrf.mxu3  ;;  %v10086_v15 = vld [vmem:[#allocation2 + $0x14c] sm:$0xff] }
 0x2cf   : > { %1851 = vmatpush.bf16.msrb.mxu2 %v10063_v27  ;;  %v10107_v27 = vld [vmem:[%s12567_s4 + $0x230] sm:$0xff] }
 0x2d0   : > { %1436 = vmatmul.bf16.gmra.mxu2 %v1345_v34 }
 0x2d3   : > { %1852 = vmatpush.bf16.msrb.mxu2 %v10062_v28  ;;  %v2121_v28 = vld [vmem:[#allocation2 + $0x15c] sm:$0x1] }
 0x2d5   : > { %v1226_v21 = vpop.f32.mrf.mxu0  ;;  %v1333_v35 = vpop.f32.mrf.mxu1 }
 0x2d6   : > { %v11225_v37 = vadd.f32 %v1226_v21, %v11122_v36  ;;  %v1963_v26 = vpop.f32.mrf.mxu3  ;;  %v1024_v36 = vadd.f32 %v11131_v42, %v11128_v40  ;;  %v10123_v21 = vld [vmem:[#allocation2 + $0x1c0] sm:$0xff] }
 0x2d7   : > { %v1990_v49 = vpack.c.bf16 %v1963_v26, %v1961_v14 }
 0x2d8   : > { %8121 = vmatmul.msk.bf16.vlgmr.msra.gmra.mxu1 %vm654_vm2, %v10083_v16 }
 0x2d9   : > { %3034 = vmatpush.bf16.msra.mxu1 %v10888_v32  ;;  %2069 = vmatmul.bf16.vlgmr.msrb.gmra.mxu0 %v1990_v49  ;;  %v10108_v49 = vld [vmem:[%s12567_s4 + $0x238] sm:$0xff] }
 0x2da   : > { %8198 = vmatmul.msk.bf16.gmra.mxu3 %vm654_vm2, %v10099_v23  ;;  %2493 = vmatpush.bf16.msra.mxu0 %v10108_v49 }
 0x2dd   : > { %3035 = vmatpush.bf16.msra.mxu1 %v10895_v39  ;;  %v1228_v29 = vpop.f32.mrf.mxu0  ;;  %v1335_v31 = vpop.f32.mrf.mxu1 }
 0x2de   : > { %v11239_v33 = vadd.f32 %v1228_v29, %v1024_v36  ;;  %v1346_v50 = vpack.c.bf16 %v1335_v31, %v1333_v35  ;;  %v1966_v55 = vpop.f32.mrf.mxu3  ;;  %2494 = vmatpush.bf16.msra.mxu0 %v10107_v27  ;;  %v10088_v27 = vld [vmem:[%s12567_s4 + $0x1c0] sm:$0xff] }
 0x2e0   : > { %1441 = vmatmul.bf16.gmra.mxu2 %v1346_v50 }
 0x2e1   : > { %3036 = vmatpush.bf16.msra.mxu1 %v10904_v46 }
 0x2e5   : > { %3037 = vmatpush.bf16.msra.mxu1 %v10910_v54  ;;  %v1231_v40 = vpop.f32.mrf.mxu0  ;;  %v1338_v42 = vpop.f32.mrf.mxu1 }
 0x2e6   : > { %v11244_v38 = vadd.f32 %v1231_v40, %v11137_v57  ;;  %v1968_v43 = vpop.f32.mrf.mxu3  ;;  %v1347_v56 = vpack.c.bf16 %v1338_v42, %v1338_v42  ;;  %v2359_v57 = vunpack.c.l.b16 %v2337_v4  ;;  %v10106_v40 = vld [vmem:[%s12567_s4 + $0x228] sm:$0xff] }
 0x2e7   : > { %v1991_v44 = vpack.c.bf16 %v1968_v43, %v1966_v55  ;;  %v2143_v55 = vunpack.c.l.b16 %v2121_v28  ;;  %2495 = vmatpush.bf16.msra.mxu0 %v10106_v40  ;;  %v10110_v40 = vld [vmem:[#allocation2 + $0x194] sm:$0xff] }
 0x2e8   : > { %8122 = vmatmul.msk.bf16.gmra.mxu1 %vm654_vm2, %v10084_v60  ;;  %v2365_v59 = vpack.c.b16 %v2359_v57, %v2359_v57  ;;  %v10095_v60 = vld [vmem:[%s12567_s4 + $0x1f8] sm:$0xff] }
 0x2e9   : > { %3038 = vmatpush.bf16.msra.mxu1 %v10916_v48  ;;  %2074 = vmatmul.bf16.gmra.mxu0 %v1991_v44  ;;  %v2149_v43 = vpack.c.b16 %v2143_v55, %v2143_v55  ;;  %v10094_v44 = vld [vmem:[%s12567_s4 + $0x1f0] sm:$0xff] }
 0x2ea   : > { %8199 = vmatmul.msk.bf16.gmra.mxu3 %vm654_vm2, %v10100_v41  ;;  %2277 = vmatpush.bf16.msra.mxu2 %v10095_v60 }
 0x2ed   : > { %3039 = vmatpush.bf16.msra.mxu1 %v10922_v45  ;;  %v1340_v47 = vpop.f32.mrf.mxu1  ;;  %v1233_v53 = vpop.f32.mrf.mxu0 }
 0x2ee   : > { %v1971_v62 = vpop.f32.mrf.mxu3  ;;  %v10105_v47 = vld [vmem:[%s12567_s4 + $0x220] sm:$0xff]  ;;  %2278 = vmatpush.bf16.msra.mxu2 %v10094_v44 }
 0x2ef   : > { %2496 = vmatpush.bf16.msra.mxu0 %v10105_v47 }
 0x2f0   : > { %1446 = vmatmul.bf16.gmra.mxu2 %v1347_v56  ;;  %v10124_v56 = vld [vmem:[#allocation2 + $0x1c8] sm:$0xff] }
 0x2f5   : > { %v1745_v58 = vpop.f32.mrf.mxu1  ;;  %v11250_v63 = vpop.f32.mrf.mxu0 }
 0x2f6   : > { %v1973_v61 = vpop.f32.mrf.mxu3 }
 0x2f7   : > { %v1992_v1 = vpack.c.bf16 %v1973_v61, %v1971_v62 }
 0x2f8   : > { %8123 = vmatmul.msk.bf16.gmra.mxu1 %vm654_vm2, %v10085_v51 }
 0x2f9   : > { %2079 = vmatmul.bf16.gmra.mxu0 %v1992_v1  ;;  %v10103_v1 = vld [vmem:[%s12567_s4 + $0x210] sm:$0xff] }
 0x2fa   : > { %8200 = vmatmul.msk.bf16.gmra.mxu3 %vm654_vm2, %v2365_v59 }
 0x2fd   : > { %v1747_v2 = vpop.f32.mrf.mxu1  ;;  %v11254_v7 = vpop.f32.mrf.mxu0 }
 0x2fe   : > { %v1774_v5 = vpack.c.bf16 %v1747_v2, %v1745_v58  ;;  %v1976_v6 = vpop.f32.mrf.mxu3  ;;  %v10104_v58 = vld [vmem:[%s12567_s4 + $0x218] sm:$0xff] }
 0x2ff   : > { %2497 = vmatpush.bf16.msra.mxu0 %v10104_v58 }
 0x300   : > { %1853 = vmatmul.bf16.vlgmr.msrb.gmra.mxu2 %v1774_v5 }
 0x303   : > { %2498 = vmatpush.bf16.msra.mxu0 %v10103_v1  ;;  %v10111_v1 = vld [vmem:[#allocation2 + $0x19c] sm:$0xff] }
 0x305   : > { %v1750_v8 = vpop.f32.mrf.mxu1  ;;  %v11256_v12 = vpop.f32.mrf.mxu0 }
 0x306   : > { %v1978_v10 = vpop.f32.mrf.mxu3 }
 0x307   : > { %v1993_v34 = vpack.c.bf16 %v1978_v10, %v1976_v6 }
 0x308   : > { %8124 = vmatmul.msk.bf16.gmra.mxu1 %vm654_vm2, %v10086_v15 }
 0x309   : > { %2084 = vmatmul.bf16.gmra.mxu0 %v1993_v34 }
 0x30a   : > { %8343 = vmatmul.msk.bf16.vlgmr.msrb.gmra.mxu3 %vm654_vm2, %v10122_v9  ;;  %v10102_v9 = vld [vmem:[%s12567_s4 + $0x208] sm:$0xff] }
 0x30b   : > { %3682 = vmatpush.bf16.msrb.mxu3 %v10888_v32  ;;  %2499 = vmatpush.bf16.msra.mxu0 %v10102_v9 }
 0x30d   : > { %v1752_v14 = vpop.f32.mrf.mxu1  ;;  %v11262_v16 = vpop.f32.mrf.mxu0 }
 0x30e   : > { %v1775_v18 = vpack.c.bf16 %v1752_v14, %v1750_v8  ;;  %v1981_v22 = vpop.f32.mrf.mxu3  ;;  %v10090_v14 = vld [vmem:[%s12567_s4 + $0x1d0] sm:$0xff] }
 0x30f   : > { %3683 = vmatpush.bf16.msrb.mxu3 %v10895_v39 }
 0x310   : > { %1858 = vmatmul.bf16.gmra.mxu2 %v1775_v18  ;;  %v10101_v18 = vld [vmem:[%s12567_s4 + $0x200] sm:$0xff] }
 0x311   : > { %2500 = vmatpush.bf16.msra.mxu0 %v10101_v18 }
 0x313   : > { %3684 = vmatpush.bf16.msrb.mxu3 %v10904_v46 }
 0x315   : > { %v1755_v20 = vpop.f32.mrf.mxu1 }
 0x316   : > { %v1983_v35 = vpop.f32.mrf.mxu3  ;;  %v11266_v23 = vpop.f32.mrf.mxu0 }
 0x317   : > { %3685 = vmatpush.bf16.msrb.mxu3 %v10910_v54  ;;  %v1994_v26 = vpack.c.bf16 %v1983_v35, %v1981_v22 }
 0x318   : > { %8125 = vmatmul.msk.bf16.gmra.mxu1 %vm654_vm2, %v10087_v19  ;;  %v10125_v19 = vld [vmem:[#allocation2 + $0x1d0] sm:$0xff] }
 0x319   : > { %2089 = vmatmul.bf16.gmra.mxu0 %v1994_v26 }
 0x31a   : > { %8344 = vmatmul.msk.bf16.gmra.mxu3 %vm654_vm2, %v10123_v21 }
 0x31b   : > { %3686 = vmatpush.bf16.msrb.mxu3 %v10916_v48 }
 0x31d   : > { %v1757_v36 = vpop.f32.mrf.mxu1 }
 0x31e   : > { %v1776_v29 = vpack.c.bf16 %v1757_v36, %v1755_v20  ;;  %v1986_v31 = vpop.f32.mrf.mxu3  ;;  %v11278_v50 = vpop.f32.mrf.mxu0 }
 0x31f   : > { %3687 = vmatpush.bf16.msrb.mxu3 %v10922_v45  ;;  %v1995_v62 = vpack.c.bf16 %v1986_v31, %v1986_v31 }
 0x320   : > { %1863 = vmatmul.bf16.gmra.mxu2 %v1776_v29 }
 0x323   : > { %v1422_v42 = vpop.f32.mrf.mxu2 }
 0x324   : > { %v1451_v41 = vadd.f32 %v1422_v42, %v11141_v3  ;;  %v10093_v3 = vld [vmem:[%s12567_s4 + $0x1e8] sm:$0xff] }
 0x325   : > { %v1760_v53 = vpop.f32.mrf.mxu1  ;;  %2279 = vmatpush.bf16.msra.mxu2 %v10093_v3  ;;  %v2769_v3 = vld [vmem:[#allocation2 + $0x1e0] sm:$0x1] }
 0x326   : > { %v1988_v4 = vpop.f32.mrf.mxu3  ;;  %v11294_v57 = vadd.f32 %v11250_v63, %v1451_v41  ;;  %v11296_v51 = vpop.f32.mrf.mxu0  ;;  %v10092_v63 = vld [vmem:[%s12567_s4 + $0x1e0] sm:$0xff]  ;;  %v10126_v41 = vld [vmem:[#allocation2 + $0x1d8] sm:$0xff] }
 0x328   : > { %8126 = vmatmul.msk.bf16.gmra.mxu1 %vm654_vm2, %v2149_v43 }
 0x329   : > { %2094 = vmatmul.bf16.gmra.mxu0 %v1995_v62  ;;  %2280 = vmatpush.bf16.msra.mxu2 %v10092_v63 }
 0x32a   : > { %8345 = vmatmul.msk.bf16.gmra.mxu3 %vm654_vm2, %v10124_v56 }
 0x32b   : > { %v1424_v59 = vpop.f32.mrf.mxu2 }
 0x32c   : > { %v1452_v61 = vadd.f32 %v1424_v59, %v11147_v11  ;;  %v10091_v11 = vld [vmem:[%s12567_s4 + $0x1d8] sm:$0xff]  ;;  %v2791_v59 = vunpack.c.l.b16 %v2769_v3 }
 0x32d   : > { %v1762_v2 = vpop.f32.mrf.mxu1  ;;  %2281 = vmatpush.bf16.msra.mxu2 %v10091_v11 }
 0x32e   : > { %v1777_v5 = vpack.c.bf16 %v1762_v2, %v1760_v53  ;;  %v2393_v6 = vpop.f32.mrf.mxu3  ;;  %v11314_v15 = vadd.f32 %v11254_v7, %v1452_v61  ;;  %v11316_v8 = vpop.f32.mrf.mxu0  ;;  %v10109_v7 = vld [vmem:[#allocation2 + $0x18c] sm:$0xff] }
 0x330   : > { %1868 = vmatmul.bf16.gmra.mxu2 %v1777_v5  ;;  %v2797_v5 = vpack.c.b16 %v2791_v59, %v2791_v59  ;;  %v10121_v59 = vld [vmem:[%s12567_s4 + $0x278] sm:$0xff] }
 0x331   : > { %2282 = vmatpush.bf16.msra.mxu2 %v10090_v14 }
 0x333   : > { %v1427_v10 = vpop.f32.mrf.mxu2 }
 0x334   : > { %v1453_v34 = vadd.f32 %v1427_v10, %v11150_v17  ;;  %v10089_v17 = vld [vmem:[%s12567_s4 + $0x1c8] sm:$0xff] }
 0x335   : > { %v1765_v22 = vpop.f32.mrf.mxu1  ;;  %2283 = vmatpush.bf16.msra.mxu2 %v10089_v17 }
 0x336   : > { %v2395_v20 = vpop.f32.mrf.mxu3  ;;  %v11332_v21 = vadd.f32 %v11256_v12, %v1453_v34  ;;  %v11334_v35 = vpop.f32.mrf.mxu0 }
 0x337   : > { %v2422_v26 = vpack.c.bf16 %v2395_v20, %v2393_v6 }
 0x338   : > { %8269 = vmatmul.msk.bf16.vlgmr.msrb.gmra.mxu1 %vm654_vm2, %v10109_v7 }
 0x339   : > { %3466 = vmatpush.bf16.msrb.mxu1 %v10888_v32  ;;  %2501 = vmatmul.bf16.vlgmr.msra.gmra.mxu0 %v2422_v26  ;;  %v10148_v26 = vld [vmem:[#allocation2 + $0x210] sm:$0xff] }
 0x33a   : > { %8346 = vmatmul.msk.bf16.gmra.mxu3 %vm654_vm2, %v10125_v19  ;;  %2284 = vmatpush.bf16.msra.mxu2 %v10088_v27  ;;  %v10112_v19 = vld [vmem:[#allocation2 + $0x1a4] sm:$0xff] }
 0x33b   : > { %v1429_v49 = vpop.f32.mrf.mxu2 }
 0x33c   : > { %v1454_v12 = vadd.f32 %v1429_v49, %v11157_v25 }
 0x33d   : > { %3467 = vmatpush.bf16.msrb.mxu1 %v10895_v39  ;;  %v1767_v36 = vpop.f32.mrf.mxu1 }
 0x33e   : > { %v1778_v28 = vpack.c.bf16 %v1767_v36, %v1765_v22  ;;  %v2398_v29 = vpop.f32.mrf.mxu3  ;;  %v11348_v31 = vadd.f32 %v11262_v16, %v1454_v12  ;;  %v11350_v55 = vpop.f32.mrf.mxu0  ;;  %2709 = vmatpush.bf16.msrb.mxu2 %v10121_v59 }
 0x340   : > { %1873 = vmatmul.bf16.gmra.mxu2 %v1778_v28 }
 0x341   : > { %3468 = vmatpush.bf16.msrb.mxu1 %v10904_v46 }
 0x343   : > { %v1432_v60 = vpop.f32.mrf.mxu2 }
 0x344   : > { %v1455_v25 = vadd.f32 %v1432_v60, %v11162_v30 }
 0x345   : > { %3469 = vmatpush.bf16.msrb.mxu1 %v10910_v54  ;;  %v1770_v42 = vpop.f32.mrf.mxu1 }
 0x346   : > { %v2400_v43 = vpop.f32.mrf.mxu3  ;;  %v11356_v44 = vadd.f32 %v11266_v23, %v1455_v25  ;;  %v11358_v16 = vpop.f32.mrf.mxu0  ;;  %v1779_v62 = vpack.c.bf16 %v1770_v42, %v1770_v42 }
 0x347   : > { %v2423_v47 = vpack.c.bf16 %v2400_v43, %v2398_v29 }
 0x348   : > { %8270 = vmatmul.msk.bf16.gmra.mxu1 %vm654_vm2, %v10110_v40  ;;  %v10113_v40 = vld [vmem:[#allocation2 + $0x1ac] sm:$0xff] }
 0x349   : > { %3470 = vmatpush.bf16.msrb.mxu1 %v10916_v48  ;;  %2506 = vmatmul.bf16.gmra.mxu0 %v2423_v47 }
 0x34a   : > { %8347 = vmatmul.msk.bf16.gmra.mxu3 %vm654_vm2, %v10126_v41  ;;  %v10149_v41 = vld [vmem:[#allocation2 + $0x218] sm:$0xff] }
 0x34b   : > { %v1434_v30 = vpop.f32.mrf.mxu2 }
 0x34c   : > { %v1456_v53 = vadd.f32 %v1434_v30, %v11176_v52  ;;  %v10134_v30 = vld [vmem:[%s12567_s4 + $0x2b8] sm:$0xff] }
 0x34d   : > { %3471 = vmatpush.bf16.msrb.mxu1 %v10922_v45  ;;  %v1772_v56 = vpop.f32.mrf.mxu1  ;;  %2925 = vmatpush.bf16.msrb.mxu0 %v10134_v30 }
 0x34e   : > { %v2403_v4 = vpop.f32.mrf.mxu3  ;;  %v11366_v23 = vadd.f32 %v11278_v50, %v1456_v53  ;;  %v1665_v58 = vpop.f32.mrf.mxu0  ;;  %v2553_v56 = vld [vmem:[#allocation2 + $0x1b4] sm:$0x1] }
 0x34f   : > { %v2575_v58 = vunpack.c.l.b16 %v2553_v56 }
 0x350   : > { %1878 = vmatmul.bf16.gmra.mxu2 %v1779_v62 }
 0x353   : > { %v1437_v61 = vpop.f32.mrf.mxu2 }
 0x354   : > { %v1457_v63 = vadd.f32 %v1437_v61, %v11192_v0  ;;  %v10132_v61 = vld [vmem:[%s12567_s4 + $0x2a8] sm:$0xff] }
 0x355   : > { %v2177_v2 = vpop.f32.mrf.mxu1 }
 0x356   : > { %v2405_v6 = vpop.f32.mrf.mxu3  ;;  %v11370_v52 = vadd.f32 %v11296_v51, %v1457_v63  ;;  %v11372_v11 = vpop.f32.mrf.mxu0 }
 0x357   : > { %v2424_v9 = vpack.c.bf16 %v2405_v6, %v2403_v4  ;;  %v10131_v6 = vld [vmem:[%s12567_s4 + $0x2a0] sm:$0xff] }
 0x358   : > { %8271 = vmatmul.msk.bf16.gmra.mxu1 %vm654_vm2, %v10111_v1 }
 0x359   : > { %2511 = vmatmul.bf16.gmra.mxu0 %v2424_v9 }
 0x35a   : > { %8348 = vmatmul.msk.bf16.gmra.mxu3 %vm654_vm2, %v2797_v5  ;;  %v10120_v5 = vld [vmem:[%s12567_s4 + $0x270] sm:$0xff] }
 0x35b   : > { %v1439_v50 = vpop.f32.mrf.mxu2  ;;  %2710 = vmatpush.bf16.msrb.mxu2 %v10120_v5 }
 0x35c   : > { %v1458_v10 = vadd.f32 %v1439_v50, %v11210_v13  ;;  %v10150_v50 = vld [vmem:[#allocation2 + $0x220] sm:$0xff] }
 0x35d   : > { %v2179_v34 = vpop.f32.mrf.mxu1 }
 0x35e   : > { %v2206_v0 = vpack.c.bf16 %v2179_v34, %v2177_v2  ;;  %v2408_v7 = vpop.f32.mrf.mxu3  ;;  %v11378_v14 = vadd.f32 %v11316_v8, %v1458_v10  ;;  %v11380_v18 = vpop.f32.mrf.mxu0  ;;  %v2581_v2 = vpack.c.b16 %v2575_v58, %v2575_v58 }
 0x360   : > { %2285 = vmatmul.bf16.vlgmr.msra.gmra.mxu2 %v2206_v0 }
 0x363   : > { %v1442_v51 = vpop.f32.mrf.mxu2 }
 0x364   : > { %v1459_v22 = vadd.f32 %v1442_v51, %v11225_v37  ;;  %v10130_v51 = vld [vmem:[%s12567_s4 + $0x298] sm:$0xff] }
 0x365   : > { %v2182_v20 = vpop.f32.mrf.mxu1 }
 0x366   : > { %v2410_v17 = vpop.f32.mrf.mxu3  ;;  %v11384_v49 = vadd.f32 %v11334_v35, %v1459_v22  ;;  %v11386_v13 = vpop.f32.mrf.mxu0 }
 0x367   : > { %v2425_v12 = vpack.c.bf16 %v2410_v17, %v2408_v7 }
 0x368   : > { %8272 = vmatmul.msk.bf16.gmra.mxu1 %vm654_vm2, %v10112_v19  ;;  %v10118_v19 = vld [vmem:[%s12567_s4 + $0x260] sm:$0xff] }
 0x369   : > { %2516 = vmatmul.bf16.gmra.mxu0 %v2425_v12 }
 0x36a   : > { %8491 = vmatmul.msk.bf16.vlgmr.msra.gmra.mxu3 %vm654_vm2, %v10148_v26 }
 0x36b   : > { %4114 = vmatpush.bf16.msra.mxu3 %v10888_v32  ;;  %v1444_v8 = vpop.f32.mrf.mxu2 }
 0x36c   : > { %v1460_v37 = vadd.f32 %v1444_v8, %v11239_v33 }
 0x36d   : > { %v2184_v27 = vpop.f32.mrf.mxu1 }
 0x36e   : > { %v2207_v36 = vpack.c.bf16 %v2184_v27, %v2182_v20  ;;  %v2413_v28 = vpop.f32.mrf.mxu3  ;;  %v11393_v29 = vadd.f32 %v11350_v55, %v1460_v37  ;;  %v11396_v35 = vpop.f32.mrf.mxu0  ;;  %v10129_v20 = vld [vmem:[%s12567_s4 + $0x290] sm:$0xff]  ;;  %v10128_v27 = vld [vmem:[%s12567_s4 + $0x288] sm:$0xff] }
 0x36f   : > { %4115 = vmatpush.bf16.msra.mxu3 %v10895_v39 }
 0x370   : > { %2290 = vmatmul.bf16.gmra.mxu2 %v2207_v36 }
 0x373   : > { %4116 = vmatpush.bf16.msra.mxu3 %v10904_v46  ;;  %v1447_v60 = vpop.f32.mrf.mxu2 }
 0x374   : > { %v1461_v25 = vadd.f32 %v1447_v60, %v11244_v38  ;;  %v10116_v60 = vld [vmem:[%s12567_s4 + $0x250] sm:$0xff] }
 0x375   : > { %v2187_v42 = vpop.f32.mrf.mxu1 }
 0x376   : > { %v2415_v33 = vpop.f32.mrf.mxu3  ;;  %v11401_v43 = vadd.f32 %v11358_v16, %v1461_v25  ;;  %v11404_v55 = vpop.f32.mrf.mxu0  ;;  %v10133_v16 = vld [vmem:[%s12567_s4 + $0x2b0] sm:$0xff]  ;;  %v10127_v25 = vld [vmem:[%s12567_s4 + $0x280] sm:$0xff] }
 0x377   : > { %4117 = vmatpush.bf16.msra.mxu3 %v10910_v54  ;;  %v2426_v47 = vpack.c.bf16 %v2415_v33, %v2413_v28  ;;  %2926 = vmatpush.bf16.msrb.mxu0 %v10133_v16  ;;  %v10114_v16 = vld [vmem:[%s12567_s4 + $0x240] sm:$0xff] }
 0x378   : > { %8273 = vmatmul.msk.bf16.gmra.mxu1 %vm654_vm2, %v10113_v40 }
 0x379   : > { %2521 = vmatmul.bf16.gmra.mxu0 %v2426_v47 }
 0x37a   : > { %8492 = vmatmul.msk.bf16.gmra.mxu3 %vm654_vm2, %v10149_v41 }
 0x37b   : > { %4118 = vmatpush.bf16.msra.mxu3 %v10916_v48  ;;  %v1449_v38 = vpop.f32.mrf.mxu2  ;;  %2927 = vmatpush.bf16.msrb.mxu0 %v10132_v61  ;;  %v10136_v61 = vld [vmem:[#allocation2 + $0x1ec] sm:$0xff] }
 0x37d   : > { %v2189_v53 = vpop.f32.mrf.mxu1 }
 0x37e   : > { %v2208_v62 = vpack.c.bf16 %v2189_v53, %v2187_v42  ;;  %v2418_v4 = vpop.f32.mrf.mxu3  ;;  %v11416_v3 = vpop.f32.mrf.mxu0  ;;  %v10151_v42 = vld [vmem:[#allocation2 + $0x228] sm:$0xff] }
 0x37f   : > { %4119 = vmatpush.bf16.msra.mxu3 %v10922_v45  ;;  %v2427_v10 = vpack.c.bf16 %v2418_v4, %v2418_v4  ;;  %2928 = vmatpush.bf16.msrb.mxu0 %v10131_v6 }
 0x380   : > { %2295 = vmatmul.bf16.gmra.mxu2 %v2208_v62 }
 0x383   : > { %v1854_v63 = vpop.f32.mrf.mxu2  ;;  %2929 = vmatpush.bf16.msrb.mxu0 %v10130_v51 }
 0x384   : > { %v1883_v1 = vadd.f32 %v1854_v63, %v11294_v57  ;;  %v10119_v57 = vld [vmem:[%s12567_s4 + $0x268] sm:$0xff] }
 0x385   : > { %v2192_v9 = vpop.f32.mrf.mxu1  ;;  %2711 = vmatpush.bf16.msrb.mxu2 %v10119_v57  ;;  %v3201_v57 = vld [vmem:[#allocation2 + $0x238] sm:$0x1] }
 0x386   : > { %v2420_v34 = vpop.f32.mrf.mxu3  ;;  %v11432_v0 = vadd.f32 %v11372_v11, %v1883_v1  ;;  %v11434_v7 = vpop.f32.mrf.mxu0  ;;  %v10152_v1 = vld [vmem:[#allocation2 + $0x230] sm:$0xff] }
 0x387   : > { %2930 = vmatpush.bf16.msrb.mxu0 %v10129_v20  ;;  %v10137_v20 = vld [vmem:[#allocation2 + $0x1f4] sm:$0xff] }
 0x388   : > { %8274 = vmatmul.msk.bf16.gmra.mxu1 %vm654_vm2, %v2581_v2 }
 0x389   : > { %2526 = vmatmul.bf16.gmra.mxu0 %v2427_v10  ;;  %2712 = vmatpush.bf16.msrb.mxu2 %v10118_v19 }
 0x38a   : > { %8493 = vmatmul.msk.bf16.gmra.mxu3 %vm654_vm2, %v10150_v50 }
 0x38b   : > { %v1856_v22 = vpop.f32.mrf.mxu2  ;;  %2931 = vmatpush.bf16.msrb.mxu0 %v10128_v27 }
 0x38c   : > { %v1884_v11 = vadd.f32 %v1856_v22, %v11314_v15  ;;  %v10117_v15 = vld [vmem:[%s12567_s4 + $0x258] sm:$0xff]  ;;  %v3223_v22 = vunpack.c.l.b16 %v3201_v57 }
 0x38d   : > { %v2194_v26 = vpop.f32.mrf.mxu1  ;;  %2713 = vmatpush.bf16.msrb.mxu2 %v10117_v15 }
 0x38e   : > { %v2209_v17 = vpack.c.bf16 %v2194_v26, %v2192_v9  ;;  %v2825_v12 = vpop.f32.mrf.mxu3  ;;  %v11452_v8 = vadd.f32 %v11380_v18, %v1884_v11  ;;  %v11454_v37 = vpop.f32.mrf.mxu0  ;;  %v10135_v18 = vld [vmem:[#allocation2 + $0x1e4] sm:$0xff] }
 0x38f   : > { %2932 = vmatpush.bf16.msrb.mxu0 %v10127_v25 }
 0x390   : > { %2300 = vmatmul.bf16.gmra.mxu2 %v2209_v17  ;;  %v3229_v17 = vpack.c.b16 %v3223_v22, %v3223_v22  ;;  %v10147_v22 = vld [vmem:[%s12567_s4 + $0x2f8] sm:$0xff] }
 0x391   : > { %2714 = vmatpush.bf16.msrb.mxu2 %v10116_v60 }
 0x393   : > { %v1859_v36 = vpop.f32.mrf.mxu2 }
 0x394   : > { %v1885_v28 = vadd.f32 %v1859_v36, %v11332_v21  ;;  %v10115_v21 = vld [vmem:[%s12567_s4 + $0x248] sm:$0xff] }
 0x395   : > { %v2197_v40 = vpop.f32.mrf.mxu1  ;;  %2715 = vmatpush.bf16.msrb.mxu2 %v10115_v21 }
 0x396   : > { %v2827_v41 = vpop.f32.mrf.mxu3  ;;  %v11470_v33 = vadd.f32 %v11386_v13, %v1885_v28  ;;  %v11472_v47 = vpop.f32.mrf.mxu0 }
 0x397   : > { %v2854_v30 = vpack.c.bf16 %v2827_v41, %v2825_v12 }
 0x398   : > { %8417 = vmatmul.msk.bf16.vlgmr.msra.gmra.mxu1 %vm654_vm2, %v10135_v18 }
 0x399   : > { %3898 = vmatpush.bf16.msra.mxu1 %v10888_v32  ;;  %2933 = vmatmul.bf16.vlgmr.msrb.gmra.mxu0 %v2854_v30  ;;  %v10174_v30 = vld [vmem:[#allocation2 + $0x268] sm:$0xff] }
 0x39a   : > { %8494 = vmatmul.msk.bf16.gmra.mxu3 %vm654_vm2, %v10151_v42  ;;  %2716 = vmatpush.bf16.msrb.mxu2 %v10114_v16  ;;  %v10138_v42 = vld [vmem:[#allocation2 + $0x1fc] sm:$0xff] }
 0x39b   : > { %v1861_v38 = vpop.f32.mrf.mxu2 }
 0x39c   : > { %v1886_v13 = vadd.f32 %v1861_v38, %v11348_v31 }
 0x39d   : > { %3899 = vmatpush.bf16.msra.mxu1 %v10895_v39  ;;  %v2199_v53 = vpop.f32.mrf.mxu1 }
 0x39e   : > { %v2210_v56 = vpack.c.bf16 %v2199_v53, %v2197_v40  ;;  %v2830_v62 = vpop.f32.mrf.mxu3  ;;  %v11486_v4 = vadd.f32 %v11396_v35, %v1886_v13  ;;  %v11488_v58 = vpop.f32.mrf.mxu0  ;;  %3141 = vmatpush.bf16.msra.mxu2 %v10147_v22 }
 0x3a0   : > { %2305 = vmatmul.bf16.gmra.mxu2 %v2210_v56 }
 0x3a1   : > { %3900 = vmatpush.bf16.msra.mxu1 %v10904_v46 }
 0x3a3   : > { %v1864_v59 = vpop.f32.mrf.mxu2 }
 0x3a4   : > { %v1887_v31 = vadd.f32 %v1864_v59, %v11356_v44 }
 0x3a5   : > { %3901 = vmatpush.bf16.msra.mxu1 %v10910_v54  ;;  %v2202_v63 = vpop.f32.mrf.mxu1 }
 0x3a6   : > { %v2832_v2 = vpop.f32.mrf.mxu3  ;;  %v11494_v5 = vadd.f32 %v11404_v55, %v1887_v31  ;;  %v11496_v35 = vpop.f32.mrf.mxu0  ;;  %v2211_v10 = vpack.c.bf16 %v2202_v63, %v2202_v63 }
 0x3a7   : > { %v2855_v6 = vpack.c.bf16 %v2832_v2, %v2830_v62 }
 0x3a8   : > { %8418 = vmatmul.msk.bf16.gmra.mxu1 %vm654_vm2, %v10136_v61  ;;  %v10139_v61 = vld [vmem:[#allocation2 + $0x204] sm:$0xff] }
 0x3a9   : > { %3902 = vmatpush.bf16.msra.mxu1 %v10916_v48  ;;  %2938 = vmatmul.bf16.gmra.mxu0 %v2855_v6 }
 0x3aa   : > { %8495 = vmatmul.msk.bf16.gmra.mxu3 %vm654_vm2, %v10152_v1  ;;  %v10175_v1 = vld [vmem:[#allocation2 + $0x270] sm:$0xff] }
 0x3ab   : > { %v1866_v44 = vpop.f32.mrf.mxu2 }
 0x3ac   : > { %v1888_v9 = vadd.f32 %v1866_v44, %v11366_v23  ;;  %v10160_v44 = vld [vmem:[%s12567_s4 + $0x338] sm:$0xff] }
 0x3ad   : > { %3903 = vmatpush.bf16.msra.mxu1 %v10922_v45  ;;  %v2204_v50 = vpop.f32.mrf.mxu1  ;;  %3357 = vmatpush.bf16.msra.mxu0 %v10160_v44 }
 0x3ae   : > { %v2835_v34 = vpop.f32.mrf.mxu3  ;;  %v11504_v55 = vadd.f32 %v11416_v3, %v1888_v9  ;;  %v2097_v51 = vpop.f32.mrf.mxu0  ;;  %v2985_v50 = vld [vmem:[#allocation2 + $0x20c] sm:$0x1] }
 0x3af   : > { %v3007_v51 = vunpack.c.l.b16 %v2985_v50 }
 0x3b0   : > { %2310 = vmatmul.bf16.gmra.mxu2 %v2211_v10 }
 0x3b3   : > { %v1869_v11 = vpop.f32.mrf.mxu2 }
 0x3b4   : > { %v1889_v19 = vadd.f32 %v1869_v11, %v11370_v52  ;;  %v10158_v11 = vld [vmem:[%s12567_s4 + $0x328] sm:$0xff] }
 0x3b5   : > { %v2609_v26 = vpop.f32.mrf.mxu1 }
 0x3b6   : > { %v2837_v12 = vpop.f32.mrf.mxu3  ;;  %v11508_v23 = vadd.f32 %v11434_v7, %v1889_v19  ;;  %v11510_v15 = vpop.f32.mrf.mxu0 }
 0x3b7   : > { %v2856_v27 = vpack.c.bf16 %v2837_v12, %v2835_v34  ;;  %v10157_v12 = vld [vmem:[%s12567_s4 + $0x320] sm:$0xff] }
 0x3b8   : > { %8419 = vmatmul.msk.bf16.gmra.mxu1 %vm654_vm2, %v10137_v20 }
 0x3b9   : > { %2943 = vmatmul.bf16.gmra.mxu0 %v2856_v27 }
 0x3ba   : > { %8496 = vmatmul.msk.bf16.gmra.mxu3 %vm654_vm2, %v3229_v17  ;;  %v10146_v17 = vld [vmem:[%s12567_s4 + $0x2f0] sm:$0xff] }
 0x3bb   : > { %v1871_v3 = vpop.f32.mrf.mxu2  ;;  %3142 = vmatpush.bf16.msra.mxu2 %v10146_v17 }
 0x3bc   : > { %v1890_v36 = vadd.f32 %v1871_v3, %v11378_v14  ;;  %v10176_v3 = vld [vmem:[#allocation2 + $0x278] sm:$0xff] }
 0x3bd   : > { %v2611_v28 = vpop.f32.mrf.mxu1 }
 0x3be   : > { %v2638_v52 = vpack.c.bf16 %v2611_v28, %v2609_v26  ;;  %v2840_v18 = vpop.f32.mrf.mxu3  ;;  %v11516_v60 = vadd.f32 %v11454_v37, %v1890_v36  ;;  %v11518_v25 = vpop.f32.mrf.mxu0  ;;  %v3013_v26 = vpack.c.b16 %v3007_v51, %v3007_v51 }
 0x3c0   : > { %2717 = vmatmul.bf16.vlgmr.msrb.gmra.mxu2 %v2638_v52 }
 0x3c3   : > { %v1874_v7 = vpop.f32.mrf.mxu2 }
 0x3c4   : > { %v1891_v40 = vadd.f32 %v1874_v7, %v11384_v49  ;;  %v10156_v7 = vld [vmem:[%s12567_s4 + $0x318] sm:$0xff] }
 0x3c5   : > { %v2614_v41 = vpop.f32.mrf.mxu1 }
 0x3c6   : > { %v2842_v21 = vpop.f32.mrf.mxu3  ;;  %v11522_v38 = vadd.f32 %v11472_v47, %v1891_v40  ;;  %v11524_v14 = vpop.f32.mrf.mxu0 }
 0x3c7   : > { %v2857_v13 = vpack.c.bf16 %v2842_v21, %v2840_v18 }
 0x3c8   : > { %8420 = vmatmul.msk.bf16.gmra.mxu1 %vm654_vm2, %v10138_v42  ;;  %v10144_v42 = vld [vmem:[%s12567_s4 + $0x2e0] sm:$0xff] }
 0x3c9   : > { %2948 = vmatmul.bf16.gmra.mxu0 %v2857_v13 }
 0x3ca   : > { %8639 = vmatmul.msk.bf16.vlgmr.msrb.gmra.mxu3 %vm654_vm2, %v10174_v30 }
 0x3cb   : > { %4546 = vmatpush.bf16.msrb.mxu3 %v10888_v32  ;;  %v1876_v37 = vpop.f32.mrf.mxu2 }
 0x3cc   : > { %v1892_v49 = vadd.f32 %v1876_v37, %v11393_v29 }
 0x3cd   : > { %v2616_v16 = vpop.f32.mrf.mxu1 }
 0x3ce   : > { %v2639_v53 = vpack.c.bf16 %v2616_v16, %v2614_v41  ;;  %v2845_v56 = vpop.f32.mrf.mxu3  ;;  %v11531_v62 = vadd.f32 %v11488_v58, %v1892_v49  ;;  %v11534_v47 = vpop.f32.mrf.mxu0  ;;  %v10155_v41 = vld [vmem:[%s12567_s4 + $0x310] sm:$0xff]  ;;  %v10154_v16 = vld [vmem:[%s12567_s4 + $0x308] sm:$0xff] }
 0x3cf   : > { %4547 = vmatpush.bf16.msrb.mxu3 %v10895_v39 }
 0x3d0   : > { %2722 = vmatmul.bf16.gmra.mxu2 %v2639_v53 }
 0x3d3   : > { %4548 = vmatpush.bf16.msrb.mxu3 %v10904_v46  ;;  %v1879_v59 = vpop.f32.mrf.mxu2 }
 0x3d4   : > { %v1893_v31 = vadd.f32 %v1879_v59, %v11401_v43  ;;  %v10142_v59 = vld [vmem:[%s12567_s4 + $0x2d0] sm:$0xff] }
 0x3d5   : > { %v2619_v63 = vpop.f32.mrf.mxu1 }
 0x3d6   : > { %v2847_v29 = vpop.f32.mrf.mxu3  ;;  %v11539_v2 = vadd.f32 %v11496_v35, %v1893_v31  ;;  %v11542_v58 = vpop.f32.mrf.mxu0  ;;  %v10159_v35 = vld [vmem:[%s12567_s4 + $0x330] sm:$0xff]  ;;  %v10153_v31 = vld [vmem:[%s12567_s4 + $0x300] sm:$0xff] }
 0x3d7   : > { %4549 = vmatpush.bf16.msrb.mxu3 %v10910_v54  ;;  %v2858_v6 = vpack.c.bf16 %v2847_v29, %v2845_v56  ;;  %3358 = vmatpush.bf16.msra.mxu0 %v10159_v35  ;;  %v10140_v35 = vld [vmem:[%s12567_s4 + $0x2c0] sm:$0xff] }
 0x3d8   : > { %8421 = vmatmul.msk.bf16.gmra.mxu1 %vm654_vm2, %v10139_v61 }
 0x3d9   : > { %2953 = vmatmul.bf16.gmra.mxu0 %v2858_v6 }
 0x3da   : > { %8640 = vmatmul.msk.bf16.gmra.mxu3 %vm654_vm2, %v10175_v1 }
 0x3db   : > { %4550 = vmatpush.bf16.msrb.mxu3 %v10916_v48  ;;  %v1881_v43 = vpop.f32.mrf.mxu2  ;;  %3359 = vmatpush.bf16.msra.mxu0 %v10158_v11  ;;  %v10162_v11 = vld [vmem:[#allocation2 + $0x244] sm:$0xff] }
 0x3dd   : > { %v2621_v9 = vpop.f32.mrf.mxu1 }
 0x3de   : > { %v2640_v10 = vpack.c.bf16 %v2621_v9, %v2619_v63  ;;  %v2850_v34 = vpop.f32.mrf.mxu3  ;;  %v11554_v57 = vpop.f32.mrf.mxu0  ;;  %v10177_v63 = vld [vmem:[#allocation2 + $0x280] sm:$0xff] }
 0x3df   : > { %4551 = vmatpush.bf16.msrb.mxu3 %v10922_v45  ;;  %v2859_v36 = vpack.c.bf16 %v2850_v34, %v2850_v34  ;;  %3360 = vmatpush.bf16.msra.mxu0 %v10157_v12 }
 0x3e0   : > { %2727 = vmatmul.bf16.gmra.mxu2 %v2640_v10 }
 0x3e3   : > { %v2286_v19 = vpop.f32.mrf.mxu2  ;;  %3361 = vmatpush.bf16.msra.mxu0 %v10156_v7 }
 0x3e4   : > { %v2315_v20 = vadd.f32 %v2286_v19, %v11432_v0  ;;  %v10145_v0 = vld [vmem:[%s12567_s4 + $0x2e8] sm:$0xff] }
 0x3e5   : > { %v2624_v27 = vpop.f32.mrf.mxu1  ;;  %3143 = vmatpush.bf16.msra.mxu2 %v10145_v0  ;;  %v3633_v0 = vld [vmem:[#allocation2 + $0x290] sm:$0x1] }
 0x3e6   : > { %v2852_v28 = vpop.f32.mrf.mxu3  ;;  %v11570_v52 = vadd.f32 %v11510_v15, %v2315_v20  ;;  %v11572_v18 = vpop.f32.mrf.mxu0  ;;  %v10178_v20 = vld [vmem:[#allocation2 + $0x288] sm:$0xff] }
 0x3e7   : > { %3362 = vmatpush.bf16.msra.mxu0 %v10155_v41  ;;  %v10163_v41 = vld [vmem:[#allocation2 + $0x24c] sm:$0xff] }
 0x3e8   : > { %8422 = vmatmul.msk.bf16.gmra.mxu1 %vm654_vm2, %v3013_v26 }
 0x3e9   : > { %2958 = vmatmul.bf16.gmra.mxu0 %v2859_v36  ;;  %3144 = vmatpush.bf16.msra.mxu2 %v10144_v42 }
 0x3ea   : > { %8641 = vmatmul.msk.bf16.gmra.mxu3 %vm654_vm2, %v10176_v3 }
 0x3eb   : > { %v2288_v40 = vpop.f32.mrf.mxu2  ;;  %3363 = vmatpush.bf16.msra.mxu0 %v10154_v16 }
 0x3ec   : > { %v2316_v15 = vadd.f32 %v2288_v40, %v11452_v8  ;;  %v10143_v8 = vld [vmem:[%s12567_s4 + $0x2d8] sm:$0xff]  ;;  %v3655_v40 = vunpack.c.l.b16 %v3633_v0 }
 0x3ed   : > { %v2626_v30 = vpop.f32.mrf.mxu1  ;;  %3145 = vmatpush.bf16.msra.mxu2 %v10143_v8 }
 0x3ee   : > { %v2641_v21 = vpack.c.bf16 %v2626_v30, %v2624_v27  ;;  %v3257_v13 = vpop.f32.mrf.mxu3  ;;  %v11590_v37 = vadd.f32 %v11518_v25, %v2316_v15  ;;  %v11592_v49 = vpop.f32.mrf.mxu0  ;;  %v10161_v25 = vld [vmem:[#allocation2 + $0x23c] sm:$0xff] }
 0x3ef   : > { %3364 = vmatpush.bf16.msra.mxu0 %v10153_v31 }
 0x3f0   : > { %2732 = vmatmul.bf16.gmra.mxu2 %v2641_v21  ;;  %v3661_v21 = vpack.c.b16 %v3655_v40, %v3655_v40  ;;  %v10173_v40 = vld [vmem:[%s12567_s4 + $0x378] sm:$0xff] }
 0x3f1   : > { %3146 = vmatpush.bf16.msra.mxu2 %v10142_v59 }
 0x3f3   : > { %v2291_v53 = vpop.f32.mrf.mxu2 }
 0x3f4   : > { %v2317_v56 = vadd.f32 %v2291_v53, %v11470_v33  ;;  %v10141_v33 = vld [vmem:[%s12567_s4 + $0x2c8] sm:$0xff] }
 0x3f5   : > { %v2629_v61 = vpop.f32.mrf.mxu1  ;;  %3147 = vmatpush.bf16.msra.mxu2 %v10141_v33 }
 0x3f6   : > { %v3259_v1 = vpop.f32.mrf.mxu3  ;;  %v11608_v29 = vadd.f32 %v11524_v14, %v2317_v56  ;;  %v11610_v6 = vpop.f32.mrf.mxu0 }
 0x3f7   : > { %v3286_v44 = vpack.c.bf16 %v3259_v1, %v3257_v13 }
 0x3f8   : > { %8565 = vmatmul.msk.bf16.vlgmr.msrb.gmra.mxu1 %vm654_vm2, %v10161_v25 }
 0x3f9   : > { %4330 = vmatpush.bf16.msrb.mxu1 %v10888_v32  ;;  %3365 = vmatmul.bf16.vlgmr.msra.gmra.mxu0 %v3286_v44  ;;  %v10200_v44 = vld [vmem:[#allocation2 + $0x2c0] sm:$0xff] }
 0x3fa   : > { %8642 = vmatmul.msk.bf16.gmra.mxu3 %vm654_vm2, %v10177_v63  ;;  %3148 = vmatpush.bf16.msra.mxu2 %v10140_v35  ;;  %v10164_v63 = vld [vmem:[#allocation2 + $0x254] sm:$0xff] }
 0x3fb   : > { %v2293_v43 = vpop.f32.mrf.mxu2 }
 0x3fc   : > { %v2318_v14 = vadd.f32 %v2293_v43, %v11486_v4 }
 0x3fd   : > { %4331 = vmatpush.bf16.msrb.mxu1 %v10895_v39  ;;  %v2631_v9 = vpop.f32.mrf.mxu1 }
 0x3fe   : > { %v2642_v50 = vpack.c.bf16 %v2631_v9, %v2629_v61  ;;  %v3262_v10 = vpop.f32.mrf.mxu3  ;;  %v11624_v34 = vadd.f32 %v11534_v47, %v2318_v14  ;;  %v11626_v51 = vpop.f32.mrf.mxu0  ;;  %3573 = vmatpush.bf16.msrb.mxu2 %v10173_v40 }
 0x400   : > { %2737 = vmatmul.bf16.gmra.mxu2 %v2642_v50 }
 0x401   : > { %4332 = vmatpush.bf16.msrb.mxu1 %v10904_v46 }
 0x403   : > { %v2296_v22 = vpop.f32.mrf.mxu2 }
 0x404   : > { %v2319_v4 = vadd.f32 %v2296_v22, %v11494_v5 }
 0x405   : > { %4333 = vmatpush.bf16.msrb.mxu1 %v10910_v54  ;;  %v2634_v19 = vpop.f32.mrf.mxu1 }
 0x406   : > { %v3264_v26 = vpop.f32.mrf.mxu3  ;;  %v11632_v17 = vadd.f32 %v11542_v58, %v2319_v4  ;;  %v11634_v47 = vpop.f32.mrf.mxu0  ;;  %v2643_v36 = vpack.c.bf16 %v2634_v19, %v2634_v19 }
 0x407   : > { %v3287_v12 = vpack.c.bf16 %v3264_v26, %v3262_v10 }
 0x408   : > { %8566 = vmatmul.msk.bf16.gmra.mxu1 %vm654_vm2, %v10162_v11  ;;  %v10165_v11 = vld [vmem:[#allocation2 + $0x25c] sm:$0xff] }
 0x409   : > { %4334 = vmatpush.bf16.msrb.mxu1 %v10916_v48  ;;  %3370 = vmatmul.bf16.gmra.mxu0 %v3287_v12 }
 0x40a   : > { %8643 = vmatmul.msk.bf16.gmra.mxu3 %vm654_vm2, %v10178_v20  ;;  %v10201_v20 = vld [vmem:[#allocation2 + $0x2c8] sm:$0xff] }
 0x40b   : > { %v2298_v5 = vpop.f32.mrf.mxu2 }
 0x40c   : > { %v2320_v27 = vadd.f32 %v2298_v5, %v11504_v55  ;;  %v10186_v5 = vld [vmem:[%s12567_s4 + $0x3b8] sm:$0xff] }
 0x40d   : > { %4335 = vmatpush.bf16.msrb.mxu1 %v10922_v45  ;;  %v2636_v3 = vpop.f32.mrf.mxu1  ;;  %3789 = vmatpush.bf16.msrb.mxu0 %v10186_v5 }
 0x40e   : > { %v3267_v28 = vpop.f32.mrf.mxu3  ;;  %v11642_v58 = vadd.f32 %v11554_v57, %v2320_v27  ;;  %v2529_v7 = vpop.f32.mrf.mxu0  ;;  %v3417_v3 = vld [vmem:[#allocation2 + $0x264] sm:$0x1] }
 0x40f   : > { %v3439_v7 = vunpack.c.l.b16 %v3417_v3 }
 0x410   : > { %2742 = vmatmul.bf16.gmra.mxu2 %v2643_v36 }
 0x413   : > { %v2301_v15 = vpop.f32.mrf.mxu2 }
 0x414   : > { %v2321_v42 = vadd.f32 %v2301_v15, %v11508_v23  ;;  %v10184_v15 = vld [vmem:[%s12567_s4 + $0x3a8] sm:$0xff] }
 0x415   : > { %v3041_v30 = vpop.f32.mrf.mxu1 }
 0x416   : > { %v3269_v13 = vpop.f32.mrf.mxu3  ;;  %v11646_v55 = vadd.f32 %v11572_v18, %v2321_v42  ;;  %v11648_v8 = vpop.f32.mrf.mxu0 }
 0x417   : > { %v3288_v16 = vpack.c.bf16 %v3269_v13, %v3267_v28  ;;  %v10183_v13 = vld [vmem:[%s12567_s4 + $0x3a0] sm:$0xff] }
 0x418   : > { %8567 = vmatmul.msk.bf16.gmra.mxu1 %vm654_vm2, %v10163_v41 }
 0x419   : > { %3375 = vmatmul.bf16.gmra.mxu0 %v3288_v16 }
 0x41a   : > { %8644 = vmatmul.msk.bf16.gmra.mxu3 %vm654_vm2, %v3661_v21  ;;  %v10172_v21 = vld [vmem:[%s12567_s4 + $0x370] sm:$0xff] }
 0x41b   : > { %v2303_v57 = vpop.f32.mrf.mxu2  ;;  %3574 = vmatpush.bf16.msrb.mxu2 %v10172_v21 }
 0x41c   : > { %v2322_v53 = vadd.f32 %v2303_v57, %v11516_v60  ;;  %v10202_v57 = vld [vmem:[#allocation2 + $0x2d0] sm:$0xff] }
 0x41d   : > { %v3043_v56 = vpop.f32.mrf.mxu1 }
 0x41e   : > { %v3070_v23 = vpack.c.bf16 %v3043_v56, %v3041_v30  ;;  %v3272_v25 = vpop.f32.mrf.mxu3  ;;  %v11654_v59 = vadd.f32 %v11592_v49, %v2322_v53  ;;  %v11656_v31 = vpop.f32.mrf.mxu0  ;;  %v3445_v30 = vpack.c.b16 %v3439_v7, %v3439_v7 }
 0x420   : > { %3149 = vmatmul.bf16.vlgmr.msra.gmra.mxu2 %v3070_v23 }
 0x423   : > { %v2306_v18 = vpop.f32.mrf.mxu2 }
 0x424   : > { %v2323_v61 = vadd.f32 %v2306_v18, %v11522_v38  ;;  %v10182_v18 = vld [vmem:[%s12567_s4 + $0x398] sm:$0xff] }
 0x425   : > { %v3046_v1 = vpop.f32.mrf.mxu1 }
 0x426   : > { %v3274_v33 = vpop.f32.mrf.mxu3  ;;  %v11660_v43 = vadd.f32 %v11610_v6, %v2323_v61  ;;  %v11662_v60 = vpop.f32.mrf.mxu0 }
 0x427   : > { %v3289_v14 = vpack.c.bf16 %v3274_v33, %v3272_v25 }
 0x428   : > { %8568 = vmatmul.msk.bf16.gmra.mxu1 %vm654_vm2, %v10164_v63  ;;  %v10170_v63 = vld [vmem:[%s12567_s4 + $0x360] sm:$0xff] }
 0x429   : > { %3380 = vmatmul.bf16.gmra.mxu0 %v3289_v14 }
 0x42a   : > { %8787 = vmatmul.msk.bf16.vlgmr.msra.gmra.mxu3 %vm654_vm2, %v10200_v44 }
 0x42b   : > { %4978 = vmatpush.bf16.msra.mxu3 %v10888_v32  ;;  %v2308_v49 = vpop.f32.mrf.mxu2 }
 0x42c   : > { %v2324_v38 = vadd.f32 %v2308_v49, %v11531_v62 }
 0x42d   : > { %v3048_v35 = vpop.f32.mrf.mxu1 }
 0x42e   : > { %v3071_v9 = vpack.c.bf16 %v3048_v35, %v3046_v1  ;;  %v3277_v50 = vpop.f32.mrf.mxu3  ;;  %v11669_v10 = vadd.f32 %v11626_v51, %v2324_v38  ;;  %v11672_v6 = vpop.f32.mrf.mxu0  ;;  %v10181_v1 = vld [vmem:[%s12567_s4 + $0x390] sm:$0xff]  ;;  %v10180_v35 = vld [vmem:[%s12567_s4 + $0x388] sm:$0xff] }
 0x42f   : > { %4979 = vmatpush.bf16.msra.mxu3 %v10895_v39 }
 0x430   : > { %3154 = vmatmul.bf16.gmra.mxu2 %v3071_v9 }
 0x433   : > { %4980 = vmatpush.bf16.msra.mxu3 %v10904_v46  ;;  %v2311_v22 = vpop.f32.mrf.mxu2 }
 0x434   : > { %v2325_v4 = vadd.f32 %v2311_v22, %v11539_v2  ;;  %v10168_v22 = vld [vmem:[%s12567_s4 + $0x350] sm:$0xff] }
 0x435   : > { %v3051_v19 = vpop.f32.mrf.mxu1 }
 0x436   : > { %v3279_v62 = vpop.f32.mrf.mxu3  ;;  %v11677_v26 = vadd.f32 %v11634_v47, %v2325_v4  ;;  %v11680_v51 = vpop.f32.mrf.mxu0  ;;  %v10185_v47 = vld [vmem:[%s12567_s4 + $0x3b0] sm:$0xff]  ;;  %v10179_v4 = vld [vmem:[%s12567_s4 + $0x380] sm:$0xff] }
 0x437   : > { %4981 = vmatpush.bf16.msra.mxu3 %v10910_v54  ;;  %v3290_v12 = vpack.c.bf16 %v3279_v62, %v3277_v50  ;;  %3790 = vmatpush.bf16.msrb.mxu0 %v10185_v47  ;;  %v10166_v47 = vld [vmem:[%s12567_s4 + $0x340] sm:$0xff] }
 0x438   : > { %8569 = vmatmul.msk.bf16.gmra.mxu1 %vm654_vm2, %v10165_v11 }
 0x439   : > { %3385 = vmatmul.bf16.gmra.mxu0 %v3290_v12 }
 0x43a   : > { %8788 = vmatmul.msk.bf16.gmra.mxu3 %vm654_vm2, %v10201_v20 }
 0x43b   : > { %4982 = vmatpush.bf16.msra.mxu3 %v10916_v48  ;;  %v2313_v2 = vpop.f32.mrf.mxu2  ;;  %3791 = vmatpush.bf16.msrb.mxu0 %v10184_v15  ;;  %v10188_v15 = vld [vmem:[#allocation2 + $0x29c] sm:$0xff] }
 0x43d   : > { %v3053_v27 = vpop.f32.mrf.mxu1 }
 0x43e   : > { %v3072_v36 = vpack.c.bf16 %v3053_v27, %v3051_v19  ;;  %v3282_v28 = vpop.f32.mrf.mxu3  ;;  %v11692_v0 = vpop.f32.mrf.mxu0  ;;  %v10203_v19 = vld [vmem:[#allocation2 + $0x2d8] sm:$0xff] }
 0x43f   : > { %4983 = vmatpush.bf16.msra.mxu3 %v10922_v45  ;;  %v3291_v53 = vpack.c.bf16 %v3282_v28, %v3282_v28  ;;  %3792 = vmatpush.bf16.msrb.mxu0 %v10183_v13 }
 0x440   : > { %3159 = vmatmul.bf16.gmra.mxu2 %v3072_v36 }
 0x443   : > { %v2718_v42 = vpop.f32.mrf.mxu2  ;;  %3793 = vmatpush.bf16.msrb.mxu0 %v10182_v18 }
 0x444   : > { %v2747_v41 = vadd.f32 %v2718_v42, %v11570_v52  ;;  %v10171_v52 = vld [vmem:[%s12567_s4 + $0x368] sm:$0xff] }
 0x445   : > { %v3056_v16 = vpop.f32.mrf.mxu1  ;;  %3575 = vmatpush.bf16.msrb.mxu2 %v10171_v52  ;;  %v4065_v52 = vld [vmem:[#allocation2 + $0x2e8] sm:$0x1] }
 0x446   : > { %v3284_v56 = vpop.f32.mrf.mxu3  ;;  %v11708_v23 = vadd.f32 %v11648_v8, %v2747_v41  ;;  %v11710_v25 = vpop.f32.mrf.mxu0  ;;  %v10204_v41 = vld [vmem:[#allocation2 + $0x2e0] sm:$0xff] }
 0x447   : > { %3794 = vmatpush.bf16.msrb.mxu0 %v10181_v1  ;;  %v10189_v1 = vld [vmem:[#allocation2 + $0x2a4] sm:$0xff] }
 0x448   : > { %8570 = vmatmul.msk.bf16.gmra.mxu1 %vm654_vm2, %v3445_v30 }
 0x449   : > { %3390 = vmatmul.bf16.gmra.mxu0 %v3291_v53  ;;  %3576 = vmatpush.bf16.msrb.mxu2 %v10170_v63 }
 0x44a   : > { %8789 = vmatmul.msk.bf16.gmra.mxu3 %vm654_vm2, %v10202_v57 }
 0x44b   : > { %v2720_v61 = vpop.f32.mrf.mxu2  ;;  %3795 = vmatpush.bf16.msrb.mxu0 %v10180_v35 }
 0x44c   : > { %v2748_v8 = vadd.f32 %v2720_v61, %v11590_v37  ;;  %v10169_v37 = vld [vmem:[%s12567_s4 + $0x358] sm:$0xff]  ;;  %v4087_v61 = vunpack.c.l.b16 %v4065_v52 }
 0x44d   : > { %v3058_v44 = vpop.f32.mrf.mxu1  ;;  %3577 = vmatpush.bf16.msrb.mxu2 %v10169_v37 }
 0x44e   : > { %v3073_v33 = vpack.c.bf16 %v3058_v44, %v3056_v16  ;;  %v3689_v14 = vpop.f32.mrf.mxu3  ;;  %v11728_v49 = vadd.f32 %v11656_v31, %v2748_v8  ;;  %v11730_v38 = vpop.f32.mrf.mxu0  ;;  %v10187_v31 = vld [vmem:[#allocation2 + $0x294] sm:$0xff] }
 0x44f   : > { %3796 = vmatpush.bf16.msrb.mxu0 %v10179_v4 }
 0x450   : > { %3164 = vmatmul.bf16.gmra.mxu2 %v3073_v33  ;;  %v4093_v33 = vpack.c.b16 %v4087_v61, %v4087_v61  ;;  %v10199_v61 = vld [vmem:[%s12567_s4 + $0x3f8] sm:$0xff] }
 0x451   : > { %3578 = vmatpush.bf16.msrb.mxu2 %v10168_v22 }
 0x453   : > { %v2723_v9 = vpop.f32.mrf.mxu2 }
 0x454   : > { %v2749_v50 = vadd.f32 %v2723_v9, %v11608_v29  ;;  %v10167_v29 = vld [vmem:[%s12567_s4 + $0x348] sm:$0xff] }
 0x455   : > { %v3061_v11 = vpop.f32.mrf.mxu1  ;;  %3579 = vmatpush.bf16.msrb.mxu2 %v10167_v29 }
 0x456   : > { %v3691_v20 = vpop.f32.mrf.mxu3  ;;  %v11746_v62 = vadd.f32 %v11662_v60, %v2749_v50  ;;  %v11748_v12 = vpop.f32.mrf.mxu0 }
 0x457   : > { %v3718_v5 = vpack.c.bf16 %v3691_v20, %v3689_v14 }
 0x458   : > { %8713 = vmatmul.msk.bf16.vlgmr.msra.gmra.mxu1 %vm654_vm2, %v10187_v31 }
 0x459   : > { %4762 = vmatpush.bf16.msra.mxu1 %v10888_v32  ;;  %3797 = vmatmul.bf16.vlgmr.msrb.gmra.mxu0 %v3718_v5  ;;  %v10226_v5 = vld [vmem:[#allocation2 + $0x318] sm:$0xff] }
 0x45a   : > { %8790 = vmatmul.msk.bf16.gmra.mxu3 %vm654_vm2, %v10203_v19  ;;  %3580 = vmatpush.bf16.msrb.mxu2 %v10166_v47  ;;  %v10190_v19 = vld [vmem:[#allocation2 + $0x2ac] sm:$0xff] }
 0x45b   : > { %v2725_v2 = vpop.f32.mrf.mxu2 }
 0x45c   : > { %v2750_v60 = vadd.f32 %v2725_v2, %v11624_v34 }
 0x45d   : > { %4763 = vmatpush.bf16.msra.mxu1 %v10895_v39  ;;  %v3063_v27 = vpop.f32.mrf.mxu1 }
 0x45e   : > { %v3074_v3 = vpack.c.bf16 %v3063_v27, %v3061_v11  ;;  %v3694_v36 = vpop.f32.mrf.mxu3  ;;  %v11762_v28 = vadd.f32 %v11672_v6, %v2750_v60  ;;  %v11764_v7 = vpop.f32.mrf.mxu0  ;;  %4005 = vmatpush.bf16.msra.mxu2 %v10199_v61 }
 0x460   : > { %3169 = vmatmul.bf16.gmra.mxu2 %v3074_v3 }
 0x461   : > { %4764 = vmatpush.bf16.msra.mxu1 %v10904_v46 }
 0x463   : > { %v2728_v40 = vpop.f32.mrf.mxu2 }
 0x464   : > { %v2751_v34 = vadd.f32 %v2728_v40, %v11632_v17 }
 0x465   : > { %4765 = vmatpush.bf16.msra.mxu1 %v10910_v54  ;;  %v3066_v42 = vpop.f32.mrf.mxu1 }
 0x466   : > { %v3696_v30 = vpop.f32.mrf.mxu3  ;;  %v11770_v21 = vadd.f32 %v11680_v51, %v2751_v34  ;;  %v11772_v6 = vpop.f32.mrf.mxu0  ;;  %v3075_v53 = vpack.c.bf16 %v3066_v42, %v3066_v42 }
 0x467   : > { %v3719_v13 = vpack.c.bf16 %v3696_v30, %v3694_v36 }
 0x468   : > { %8714 = vmatmul.msk.bf16.gmra.mxu1 %vm654_vm2, %v10188_v15  ;;  %v10191_v15 = vld [vmem:[#allocation2 + $0x2b4] sm:$0xff] }
 0x469   : > { %4766 = vmatpush.bf16.msra.mxu1 %v10916_v48  ;;  %3802 = vmatmul.bf16.gmra.mxu0 %v3719_v13 }
 0x46a   : > { %8791 = vmatmul.msk.bf16.gmra.mxu3 %vm654_vm2, %v10204_v41  ;;  %v10227_v41 = vld [vmem:[#allocation2 + $0x320] sm:$0xff] }
 0x46b   : > { %v2730_v17 = vpop.f32.mrf.mxu2 }
 0x46c   : > { %v2752_v16 = vadd.f32 %v2730_v17, %v11642_v58  ;;  %v10212_v17 = vld [vmem:[%s12567_s4 + $0x438] sm:$0xff] }
 0x46d   : > { %4767 = vmatpush.bf16.msra.mxu1 %v10922_v45  ;;  %v3068_v57 = vpop.f32.mrf.mxu1  ;;  %4221 = vmatpush.bf16.msra.mxu0 %v10212_v17 }
 0x46e   : > { %v3699_v56 = vpop.f32.mrf.mxu3  ;;  %v11780_v51 = vadd.f32 %v11692_v0, %v2752_v16  ;;  %v2961_v18 = vpop.f32.mrf.mxu0  ;;  %v3849_v57 = vld [vmem:[#allocation2 + $0x2bc] sm:$0x1] }
 0x46f   : > { %v3871_v18 = vunpack.c.l.b16 %v3849_v57 }
 0x470   : > { %3174 = vmatmul.bf16.gmra.mxu2 %v3075_v53 }
 0x473   : > { %v2733_v8 = vpop.f32.mrf.mxu2 }
 0x474   : > { %v2753_v63 = vadd.f32 %v2733_v8, %v11646_v55  ;;  %v10210_v8 = vld [vmem:[%s12567_s4 + $0x428] sm:$0xff] }
 0x475   : > { %v3473_v44 = vpop.f32.mrf.mxu1 }
 0x476   : > { %v3701_v14 = vpop.f32.mrf.mxu3  ;;  %v11784_v58 = vadd.f32 %v11710_v25, %v2753_v63  ;;  %v11786_v37 = vpop.f32.mrf.mxu0 }
 0x477   : > { %v3720_v35 = vpack.c.bf16 %v3701_v14, %v3699_v56  ;;  %v10209_v14 = vld [vmem:[%s12567_s4 + $0x420] sm:$0xff] }
 0x478   : > { %8715 = vmatmul.msk.bf16.gmra.mxu1 %vm654_vm2, %v10189_v1 }
 0x479   : > { %3807 = vmatmul.bf16.gmra.mxu0 %v3720_v35 }
 0x47a   : > { %8792 = vmatmul.msk.bf16.gmra.mxu3 %vm654_vm2, %v4093_v33  ;;  %v10198_v33 = vld [vmem:[%s12567_s4 + $0x3f0] sm:$0xff] }
 0x47b   : > { %v2735_v0 = vpop.f32.mrf.mxu2  ;;  %4006 = vmatpush.bf16.msra.mxu2 %v10198_v33 }
 0x47c   : > { %v2754_v9 = vadd.f32 %v2735_v0, %v11654_v59  ;;  %v10228_v0 = vld [vmem:[#allocation2 + $0x328] sm:$0xff] }
 0x47d   : > { %v3475_v50 = vpop.f32.mrf.mxu1 }
 0x47e   : > { %v3502_v55 = vpack.c.bf16 %v3475_v50, %v3473_v44  ;;  %v3704_v31 = vpop.f32.mrf.mxu3  ;;  %v11792_v22 = vadd.f32 %v11730_v38, %v2754_v9  ;;  %v11794_v4 = vpop.f32.mrf.mxu0  ;;  %v3877_v44 = vpack.c.b16 %v3871_v18, %v3871_v18 }
 0x480   : > { %3581 = vmatmul.bf16.vlgmr.msrb.gmra.mxu2 %v3502_v55 }
 0x483   : > { %v2738_v25 = vpop.f32.mrf.mxu2 }
 0x484   : > { %v2755_v11 = vadd.f32 %v2738_v25, %v11660_v43  ;;  %v10208_v25 = vld [vmem:[%s12567_s4 + $0x418] sm:$0xff] }
 0x485   : > { %v3478_v20 = vpop.f32.mrf.mxu1 }
 0x486   : > { %v3706_v29 = vpop.f32.mrf.mxu3  ;;  %v11798_v2 = vadd.f32 %v11748_v12, %v2755_v11  ;;  %v11800_v59 = vpop.f32.mrf.mxu0 }
 0x487   : > { %v3721_v60 = vpack.c.bf16 %v3706_v29, %v3704_v31 }
 0x488   : > { %8716 = vmatmul.msk.bf16.gmra.mxu1 %vm654_vm2, %v10190_v19  ;;  %v10196_v19 = vld [vmem:[%s12567_s4 + $0x3e0] sm:$0xff] }
 0x489   : > { %3812 = vmatmul.bf16.gmra.mxu0 %v3721_v60 }
 0x48a   : > { %8935 = vmatmul.msk.bf16.vlgmr.msrb.gmra.mxu3 %vm654_vm2, %v10226_v5 }
 0x48b   : > { %5410 = vmatpush.bf16.msrb.mxu3 %v10888_v32  ;;  %v2740_v38 = vpop.f32.mrf.mxu2 }
 0x48c   : > { %v2756_v43 = vadd.f32 %v2740_v38, %v11669_v10 }
 0x48d   : > { %v3480_v47 = vpop.f32.mrf.mxu1 }
 0x48e   : > { %v3503_v27 = vpack.c.bf16 %v3480_v47, %v3478_v20  ;;  %v3709_v3 = vpop.f32.mrf.mxu3  ;;  %v11807_v36 = vadd.f32 %v11764_v7, %v2756_v43  ;;  %v11810_v12 = vpop.f32.mrf.mxu0  ;;  %v10207_v20 = vld [vmem:[%s12567_s4 + $0x410] sm:$0xff]  ;;  %v10206_v47 = vld [vmem:[%s12567_s4 + $0x408] sm:$0xff] }
 0x48f   : > { %5411 = vmatpush.bf16.msrb.mxu3 %v10895_v39 }
 0x490   : > { %3586 = vmatmul.bf16.gmra.mxu2 %v3503_v27 }
 0x493   : > { %5412 = vmatpush.bf16.msrb.mxu3 %v10904_v46  ;;  %v2743_v40 = vpop.f32.mrf.mxu2 }
 0x494   : > { %v2757_v34 = vadd.f32 %v2743_v40, %v11677_v26  ;;  %v10194_v40 = vld [vmem:[%s12567_s4 + $0x3d0] sm:$0xff] }
 0x495   : > { %v3483_v42 = vpop.f32.mrf.mxu1 }
 0x496   : > { %v3711_v10 = vpop.f32.mrf.mxu3  ;;  %v11815_v30 = vadd.f32 %v11772_v6, %v2757_v34  ;;  %v11818_v7 = vpop.f32.mrf.mxu0  ;;  %v10211_v6 = vld [vmem:[%s12567_s4 + $0x430] sm:$0xff]  ;;  %v10205_v34 = vld [vmem:[%s12567_s4 + $0x400] sm:$0xff] }
 0x497   : > { %5413 = vmatpush.bf16.msrb.mxu3 %v10910_v54  ;;  %v3722_v13 = vpack.c.bf16 %v3711_v10, %v3709_v3  ;;  %4222 = vmatpush.bf16.msra.mxu0 %v10211_v6  ;;  %v10192_v6 = vld [vmem:[%s12567_s4 + $0x3c0] sm:$0xff] }
 0x498   : > { %8717 = vmatmul.msk.bf16.gmra.mxu1 %vm654_vm2, %v10191_v15 }
 0x499   : > { %3817 = vmatmul.bf16.gmra.mxu0 %v3722_v13 }
 0x49a   : > { %8936 = vmatmul.msk.bf16.gmra.mxu3 %vm654_vm2, %v10227_v41 }
 0x49b   : > { %5414 = vmatpush.bf16.msrb.mxu3 %v10916_v48  ;;  %v2745_v26 = vpop.f32.mrf.mxu2  ;;  %4223 = vmatpush.bf16.msra.mxu0 %v10210_v8  ;;  %v10214_v8 = vld [vmem:[#allocation2 + $0x2f4] sm:$0xff] }
 0x49d   : > { %v3485_v16 = vpop.f32.mrf.mxu1 }
 0x49e   : > { %v3504_v53 = vpack.c.bf16 %v3485_v16, %v3483_v42  ;;  %v3714_v56 = vpop.f32.mrf.mxu3  ;;  %v11830_v52 = vpop.f32.mrf.mxu0  ;;  %v10229_v42 = vld [vmem:[#allocation2 + $0x330] sm:$0xff] }
 0x49f   : > { %5415 = vmatpush.bf16.msrb.mxu3 %v10922_v45  ;;  %v3723_v9 = vpack.c.bf16 %v3714_v56, %v3714_v56  ;;  %4224 = vmatpush.bf16.msra.mxu0 %v10209_v14 }
 0x4a0   : > { %3591 = vmatmul.bf16.gmra.mxu2 %v3504_v53 }
 0x4a3   : > { %v3150_v63 = vpop.f32.mrf.mxu2  ;;  %4225 = vmatpush.bf16.msra.mxu0 %v10208_v25 }
 0x4a4   : > { %v3179_v1 = vadd.f32 %v3150_v63, %v11708_v23  ;;  %v10197_v23 = vld [vmem:[%s12567_s4 + $0x3e8] sm:$0xff] }
 0x4a5   : > { %v3488_v35 = vpop.f32.mrf.mxu1  ;;  %4007 = vmatpush.bf16.msra.mxu2 %v10197_v23  ;;  %v4497_v23 = vld [vmem:[#allocation2 + $0x340] sm:$0x1] }
 0x4a6   : > { %v3716_v50 = vpop.f32.mrf.mxu3  ;;  %v11846_v55 = vadd.f32 %v11786_v37, %v3179_v1  ;;  %v11848_v31 = vpop.f32.mrf.mxu0  ;;  %v10230_v1 = vld [vmem:[#allocation2 + $0x338] sm:$0xff] }
 0x4a7   : > { %4226 = vmatpush.bf16.msra.mxu0 %v10207_v20  ;;  %v10215_v20 = vld [vmem:[#allocation2 + $0x2fc] sm:$0xff] }
 0x4a8   : > { %8718 = vmatmul.msk.bf16.gmra.mxu1 %vm654_vm2, %v3877_v44 }
 0x4a9   : > { %3822 = vmatmul.bf16.gmra.mxu0 %v3723_v9  ;;  %4008 = vmatpush.bf16.msra.mxu2 %v10196_v19 }
 0x4aa   : > { %8937 = vmatmul.msk.bf16.gmra.mxu3 %vm654_vm2, %v10228_v0 }
 0x4ab   : > { %v3152_v11 = vpop.f32.mrf.mxu2  ;;  %4227 = vmatpush.bf16.msra.mxu0 %v10206_v47 }
 0x4ac   : > { %v3180_v37 = vadd.f32 %v3152_v11, %v11728_v49  ;;  %v10195_v49 = vld [vmem:[%s12567_s4 + $0x3d8] sm:$0xff]  ;;  %v4519_v11 = vunpack.c.l.b16 %v4497_v23 }
 0x4ad   : > { %v3490_v5 = vpop.f32.mrf.mxu1  ;;  %4009 = vmatpush.bf16.msra.mxu2 %v10195_v49 }
 0x4ae   : > { %v3505_v29 = vpack.c.bf16 %v3490_v5, %v3488_v35  ;;  %v4121_v60 = vpop.f32.mrf.mxu3  ;;  %v11866_v38 = vadd.f32 %v11794_v4, %v3180_v37  ;;  %v11868_v43 = vpop.f32.mrf.mxu0  ;;  %v10213_v4 = vld [vmem:[#allocation2 + $0x2ec] sm:$0xff] }
 0x4af   : > { %4228 = vmatpush.bf16.msra.mxu0 %v10205_v34 }
 0x4b0   : > { %3596 = vmatmul.bf16.gmra.mxu2 %v3505_v29  ;;  %v4525_v29 = vpack.c.b16 %v4519_v11, %v4519_v11  ;;  %v10225_v11 = vld [vmem:[%s12567_s4 + $0x478] sm:$0xff] }
 0x4b1   : > { %4010 = vmatpush.bf16.msra.mxu2 %v10194_v40 }
 0x4b3   : > { %v3155_v27 = vpop.f32.mrf.mxu2 }
 0x4b4   : > { %v3181_v3 = vadd.f32 %v3155_v27, %v11746_v62  ;;  %v10193_v62 = vld [vmem:[%s12567_s4 + $0x3c8] sm:$0xff] }
 0x4b5   : > { %v3493_v15 = vpop.f32.mrf.mxu1  ;;  %4011 = vmatpush.bf16.msra.mxu2 %v10193_v62 }
 0x4b6   : > { %v4123_v41 = vpop.f32.mrf.mxu3  ;;  %v11884_v10 = vadd.f32 %v11800_v59, %v3181_v3  ;;  %v11886_v13 = vpop.f32.mrf.mxu0 }
 0x4b7   : > { %v4150_v17 = vpack.c.bf16 %v4123_v41, %v4121_v60 }
 0x4b8   : > { %8861 = vmatmul.msk.bf16.vlgmr.msrb.gmra.mxu1 %vm654_vm2, %v10213_v4 }
 0x4b9   : > { %5194 = vmatpush.bf16.msrb.mxu1 %v10888_v32  ;;  %4229 = vmatmul.bf16.vlgmr.msra.gmra.mxu0 %v4150_v17  ;;  %v10252_v17 = vld [vmem:[#allocation2 + $0x370] sm:$0xff] }
 0x4ba   : > { %8938 = vmatmul.msk.bf16.gmra.mxu3 %vm654_vm2, %v10229_v42  ;;  %4012 = vmatpush.bf16.msra.mxu2 %v10192_v6  ;;  %v10216_v42 = vld [vmem:[#allocation2 + $0x304] sm:$0xff] }
 0x4bb   : > { %v3157_v26 = vpop.f32.mrf.mxu2 }
 0x4bc   : > { %v3182_v59 = vadd.f32 %v3157_v26, %v11762_v28 }
 0x4bd   : > { %5195 = vmatpush.bf16.msrb.mxu1 %v10895_v39  ;;  %v3495_v16 = vpop.f32.mrf.mxu1 }
 0x4be   : > { %v3506_v57 = vpack.c.bf16 %v3495_v16, %v3493_v15  ;;  %v4126_v53 = vpop.f32.mrf.mxu3  ;;  %v11900_v56 = vadd.f32 %v11810_v12, %v3182_v59  ;;  %v11902_v18 = vpop.f32.mrf.mxu0  ;;  %4437 = vmatpush.bf16.msrb.mxu2 %v10225_v11  ;;  %v10240_v11 = vld [vmem:[#allocation2 + $0x34c] sm:$0xff] }
 0x4c0   : > { %3601 = vmatmul.bf16.gmra.mxu2 %v3506_v57 }
 0x4c1   : > { %5196 = vmatpush.bf16.msrb.mxu1 %v10904_v46 }
 0x4c3   : > { %v3160_v61 = vpop.f32.mrf.mxu2 }
 0x4c4   : > { %v3183_v28 = vadd.f32 %v3160_v61, %v11770_v21 }
 0x4c5   : > { %5197 = vmatpush.bf16.msrb.mxu1 %v10910_v54  ;;  %v3498_v63 = vpop.f32.mrf.mxu1 }
 0x4c6   : > { %v4128_v44 = vpop.f32.mrf.mxu3  ;;  %v11908_v33 = vadd.f32 %v11818_v7, %v3183_v28  ;;  %v11910_v12 = vpop.f32.mrf.mxu0  ;;  %v3507_v9 = vpack.c.bf16 %v3498_v63, %v3498_v63 }
 0x4c7   : > { %v4151_v14 = vpack.c.bf16 %v4128_v44, %v4126_v53 }
 0x4c8   : > { %8862 = vmatmul.msk.bf16.gmra.mxu1 %vm654_vm2, %v10214_v8  ;;  %v10217_v8 = vld [vmem:[#allocation2 + $0x30c] sm:$0xff] }
 0x4c9   : > { %5198 = vmatpush.bf16.msrb.mxu1 %v10916_v48  ;;  %4234 = vmatmul.bf16.gmra.mxu0 %v4151_v14  ;;  %v10238_v14 = vld [vmem:[%s12567_s4 + $0x4b8] sm:$0xff] }
 0x4ca   : > { %8939 = vmatmul.msk.bf16.gmra.mxu3 %vm654_vm2, %v10230_v1  ;;  %4653 = vmatpush.bf16.msrb.mxu0 %v10238_v14 }
 0x4cb   : > { %v3162_v21 = vpop.f32.mrf.mxu2 }
 0x4cc   : > { %v3184_v35 = vadd.f32 %v3162_v21, %v11780_v51  ;;  %v10253_v21 = vld [vmem:[#allocation2 + $0x378] sm:$0xff] }
 0x4cd   : > { %5199 = vmatpush.bf16.msrb.mxu1 %v10922_v45  ;;  %v3500_v0 = vpop.f32.mrf.mxu1 }
 0x4ce   : > { %v4131_v50 = vpop.f32.mrf.mxu3  ;;  %v11918_v7 = vadd.f32 %v11830_v52, %v3184_v35  ;;  %v3393_v25 = vpop.f32.mrf.mxu0  ;;  %v4281_v0 = vld [vmem:[#allocation2 + $0x314] sm:$0x1] }
 0x4cf   : > { %v4303_v25 = vunpack.c.l.b16 %v4281_v0 }
 0x4d0   : > { %3606 = vmatmul.bf16.gmra.mxu2 %v3507_v9 }
 0x4d3   : > { %v3165_v37 = vpop.f32.mrf.mxu2 }
 0x4d4   : > { %v3185_v19 = vadd.f32 %v3165_v37, %v11784_v58  ;;  %v10236_v37 = vld [vmem:[%s12567_s4 + $0x4a8] sm:$0xff] }
 0x4d5   : > { %v3905_v5 = vpop.f32.mrf.mxu1 }
 0x4d6   : > { %v4133_v60 = vpop.f32.mrf.mxu3  ;;  %v11922_v51 = vadd.f32 %v11848_v31, %v3185_v19  ;;  %v11924_v49 = vpop.f32.mrf.mxu0 }
 0x4d7   : > { %v4152_v47 = vpack.c.bf16 %v4133_v60, %v4131_v50  ;;  %v10235_v60 = vld [vmem:[%s12567_s4 + $0x4a0] sm:$0xff] }
 0x4d8   : > { %8863 = vmatmul.msk.bf16.gmra.mxu1 %vm654_vm2, %v10215_v20 }
 0x4d9   : > { %4239 = vmatmul.bf16.gmra.mxu0 %v4152_v47 }
 0x4da   : > { %8940 = vmatmul.msk.bf16.gmra.mxu3 %vm654_vm2, %v4525_v29  ;;  %v10224_v29 = vld [vmem:[%s12567_s4 + $0x470] sm:$0xff] }
 0x4db   : > { %v3167_v52 = vpop.f32.mrf.mxu2  ;;  %4438 = vmatpush.bf16.msrb.mxu2 %v10224_v29 }
 0x4dc   : > { %v3186_v27 = vadd.f32 %v3167_v52, %v11792_v22 }
 0x4dd   : > { %v3907_v3 = vpop.f32.mrf.mxu1 }
 0x4de   : > { %v3934_v58 = vpack.c.bf16 %v3907_v3, %v3905_v5  ;;  %v4136_v4 = vpop.f32.mrf.mxu3  ;;  %v11930_v40 = vadd.f32 %v11868_v43, %v3186_v27  ;;  %v11932_v34 = vpop.f32.mrf.mxu0  ;;  %v4309_v5 = vpack.c.b16 %v4303_v25, %v4303_v25 }
 0x4e0   : > { %4013 = vmatmul.bf16.vlgmr.msra.gmra.mxu2 %v3934_v58 }
 0x4e3   : > { %v3170_v31 = vpop.f32.mrf.mxu2 }
 0x4e4   : > { %v3187_v15 = vadd.f32 %v3170_v31, %v11798_v2  ;;  %v10254_v31 = vld [vmem:[#allocation2 + $0x380] sm:$0xff] }
 0x4e5   : > { %v3910_v41 = vpop.f32.mrf.mxu1 }
 0x4e6   : > { %v4138_v62 = vpop.f32.mrf.mxu3  ;;  %v11936_v26 = vadd.f32 %v11886_v13, %v3187_v15  ;;  %v11938_v22 = vpop.f32.mrf.mxu0 }
 0x4e7   : > { %v4153_v59 = vpack.c.bf16 %v4138_v62, %v4136_v4  ;;  %v10234_v4 = vld [vmem:[%s12567_s4 + $0x498] sm:$0xff] }
 0x4e8   : > { %8864 = vmatmul.msk.bf16.gmra.mxu1 %vm654_vm2, %v10216_v42  ;;  %v10222_v42 = vld [vmem:[%s12567_s4 + $0x460] sm:$0xff] }
 0x4e9   : > { %4244 = vmatmul.bf16.gmra.mxu0 %v4153_v59 }
 0x4ea   : > { %9083 = vmatmul.msk.bf16.vlgmr.msra.gmra.mxu3 %vm654_vm2, %v10252_v17 }
 0x4eb   : > { %5842 = vmatpush.bf16.msra.mxu3 %v10888_v32  ;;  %v3172_v43 = vpop.f32.mrf.mxu2 }
 0x4ec   : > { %v3188_v2 = vadd.f32 %v3172_v43, %v11807_v36 }
 0x4ed   : > { %v3912_v6 = vpop.f32.mrf.mxu1 }
 0x4ee   : > { %v3935_v16 = vpack.c.bf16 %v3912_v6, %v3910_v41  ;;  %v4141_v57 = vpop.f32.mrf.mxu3  ;;  %v11945_v53 = vadd.f32 %v11902_v18, %v3188_v2  ;;  %v11948_v13 = vpop.f32.mrf.mxu0  ;;  %v10233_v41 = vld [vmem:[%s12567_s4 + $0x490] sm:$0xff]  ;;  %v10232_v6 = vld [vmem:[%s12567_s4 + $0x488] sm:$0xff] }
 0x4ef   : > { %5843 = vmatpush.bf16.msra.mxu3 %v10895_v39 }
 0x4f0   : > { %4018 = vmatmul.bf16.gmra.mxu2 %v3935_v16 }
 0x4f3   : > { %5844 = vmatpush.bf16.msra.mxu3 %v10904_v46  ;;  %v3175_v61 = vpop.f32.mrf.mxu2 }
 0x4f4   : > { %v3189_v28 = vadd.f32 %v3175_v61, %v11815_v30  ;;  %v10239_v61 = vld [vmem:[#allocation2 + $0x344] sm:$0xff] }
 0x4f5   : > { %v3915_v63 = vpop.f32.mrf.mxu1 }
 0x4f6   : > { %v4143_v1 = vpop.f32.mrf.mxu3  ;;  %v11953_v36 = vadd.f32 %v11910_v12, %v3189_v28  ;;  %v11956_v18 = vpop.f32.mrf.mxu0  ;;  %v10237_v12 = vld [vmem:[%s12567_s4 + $0x4b0] sm:$0xff]  ;;  %v10231_v28 = vld [vmem:[%s12567_s4 + $0x480] sm:$0xff] }
 0x4f7   : > { %5845 = vmatpush.bf16.msra.mxu3 %v10910_v54  ;;  %v4154_v44 = vpack.c.bf16 %v4143_v1, %v4141_v57  ;;  %4654 = vmatpush.bf16.msrb.mxu0 %v10237_v12 }
 0x4f8   : > { %8865 = vmatmul.msk.bf16.gmra.mxu1 %vm654_vm2, %v10217_v8 }
 0x4f9   : > { %4249 = vmatmul.bf16.gmra.mxu0 %v4154_v44 }
 0x4fa   : > { %9084 = vmatmul.msk.bf16.gmra.mxu3 %vm654_vm2, %v10253_v21  ;;  %v10255_v21 = vld [vmem:[#allocation2 + $0x388] sm:$0xff] }
 0x4fb   : > { %5846 = vmatpush.bf16.msra.mxu3 %v10916_v48  ;;  %v3177_v30 = vpop.f32.mrf.mxu2  ;;  %4655 = vmatpush.bf16.msrb.mxu0 %v10236_v37 }
 0x4fd   : > { %v3917_v35 = vpop.f32.mrf.mxu1 }
 0x4fe   : > { %v3936_v9 = vpack.c.bf16 %v3917_v35, %v3915_v63  ;;  %v4146_v50 = vpop.f32.mrf.mxu3  ;;  %v11968_v23 = vpop.f32.mrf.mxu0 }
 0x4ff   : > { %5847 = vmatpush.bf16.msra.mxu3 %v10922_v45  ;;  %v4155_v52 = vpack.c.bf16 %v4146_v50, %v4146_v50  ;;  %4656 = vmatpush.bf16.msrb.mxu0 %v10235_v60 }
 0x500   : > { %4023 = vmatmul.bf16.gmra.mxu2 %v3936_v9 }
 0x503   : > { %v3582_v19 = vpop.f32.mrf.mxu2  ;;  %4657 = vmatpush.bf16.msrb.mxu0 %v10234_v4 }
 0x504   : > { %v3611_v20 = vadd.f32 %v3582_v19, %v11846_v55  ;;  %v10223_v55 = vld [vmem:[%s12567_s4 + $0x468] sm:$0xff] }
 0x505   : > { %v3920_v47 = vpop.f32.mrf.mxu1  ;;  %4439 = vmatpush.bf16.msrb.mxu2 %v10223_v55 }
 0x506   : > { %v4148_v27 = vpop.f32.mrf.mxu3  ;;  %v11984_v3 = vadd.f32 %v11924_v49, %v3611_v20  ;;  %v11986_v58 = vpop.f32.mrf.mxu0 }
 0x507   : > { %4658 = vmatpush.bf16.msrb.mxu0 %v10233_v41 }
 0x508   : > { %8866 = vmatmul.msk.bf16.gmra.mxu1 %vm654_vm2, %v4309_v5  ;;  %v10256_v5 = vld [vmem:[#allocation2 + $0x390] sm:$0xff] }
 0x509   : > { %4254 = vmatmul.bf16.gmra.mxu0 %v4155_v52  ;;  %4440 = vmatpush.bf16.msrb.mxu2 %v10222_v42 }
 0x50a   : > { %9085 = vmatmul.msk.bf16.gmra.mxu3 %vm654_vm2, %v10254_v31  ;;  %v4929_v31 = vld [vmem:[#allocation2 + $0x398] sm:$0x1] }
 0x50b   : > { %v3584_v15 = vpop.f32.mrf.mxu2  ;;  %4659 = vmatpush.bf16.msrb.mxu0 %v10232_v6 }
 0x50c   : > { %v3612_v49 = vadd.f32 %v3584_v15, %v11866_v38  ;;  %v10221_v38 = vld [vmem:[%s12567_s4 + $0x458] sm:$0xff] }
 0x50d   : > { %v3922_v17 = vpop.f32.mrf.mxu1  ;;  %4441 = vmatpush.bf16.msrb.mxu2 %v10221_v38 }
 0x50e   : > { %v3937_v62 = vpack.c.bf16 %v3922_v17, %v3920_v47  ;;  %v4553_v59 = vpop.f32.mrf.mxu3  ;;  %v12004_v43 = vadd.f32 %v11932_v34, %v3612_v49  ;;  %v12006_v2 = vpop.f32.mrf.mxu0  ;;  %v10220_v34 = vld [vmem:[%s12567_s4 + $0x450] sm:$0xff]  ;;  %v4951_v49 = vunpack.c.l.b16 %v4929_v31 }
 0x50f   : > { %4660 = vmatpush.bf16.msrb.mxu0 %v10231_v28 }
 0x510   : > { %4028 = vmatmul.bf16.gmra.mxu2 %v3937_v62 }
 0x511   : > { %4442 = vmatpush.bf16.msrb.mxu2 %v10220_v34 }
 0x513   : > { %v3587_v16 = vpop.f32.mrf.mxu2 }
 0x514   : > { %v3613_v57 = vadd.f32 %v3587_v16, %v11884_v10  ;;  %v10219_v10 = vld [vmem:[%s12567_s4 + $0x448] sm:$0xff]  ;;  %v10242_v16 = vld [vmem:[#allocation2 + $0x35c] sm:$0xff] }
 0x515   : > { %v3925_v8 = vpop.f32.mrf.mxu1  ;;  %4443 = vmatpush.bf16.msrb.mxu2 %v10219_v10 }
 0x516   : > { %v4555_v63 = vpop.f32.mrf.mxu3  ;;  %v12022_v1 = vadd.f32 %v11938_v22, %v3613_v57  ;;  %v12024_v44 = vpop.f32.mrf.mxu0  ;;  %v10218_v22 = vld [vmem:[%s12567_s4 + $0x440] sm:$0xff] }
 0x517   : > { %v4582_v14 = vpack.c.bf16 %v4555_v63, %v4553_v59 }
 0x518   : > { %9009 = vmatmul.msk.bf16.vlgmr.msra.gmra.mxu1 %vm654_vm2, %v10239_v61 }
 0x519   : > { %5626 = vmatpush.bf16.msra.mxu1 %v10888_v32  ;;  %4661 = vmatmul.bf16.vlgmr.msrb.gmra.mxu0 %v4582_v14 }
 0x51a   : > { %9086 = vmatmul.msk.bf16.gmra.mxu3 %vm654_vm2, %v10255_v21  ;;  %4444 = vmatpush.bf16.msrb.mxu2 %v10218_v22  ;;  %v10243_v22 = vld [vmem:[#allocation2 + $0x364] sm:$0xff] }
 0x51b   : > { %v3589_v30 = vpop.f32.mrf.mxu2 }
 0x51c   : > { %v3614_v12 = vadd.f32 %v3589_v30, %v11900_v56 }
 0x51d   : > { %5627 = vmatpush.bf16.msra.mxu1 %v10895_v39  ;;  %v3927_v35 = vpop.f32.mrf.mxu1 }
 0x51e   : > { %v3938_v0 = vpack.c.bf16 %v3927_v35, %v3925_v8  ;;  %v4558_v9 = vpop.f32.mrf.mxu3  ;;  %v12038_v50 = vadd.f32 %v11948_v13, %v3614_v12  ;;  %v12040_v32 = vpop.f32.mrf.mxu0  ;;  %v10278_v8 = vld [vmem:[#allocation2 + $0x3c8] sm:$0xff] }
 0x520   : > { %4033 = vmatmul.bf16.gmra.mxu2 %v3938_v0 }
 0x521   : > { %5628 = vmatpush.bf16.msra.mxu1 %v10904_v46 }
 0x523   : > { %v3592_v56 = vpop.f32.mrf.mxu2 }
 0x524   : > { %v3615_v25 = vadd.f32 %v3592_v56, %v11908_v33 }
 0x525   : > { %5629 = vmatpush.bf16.msra.mxu1 %v10910_v54  ;;  %v3930_v37 = vpop.f32.mrf.mxu1 }
 0x526   : > { %v4560_v39 = vpop.f32.mrf.mxu3  ;;  %v12046_v19 = vadd.f32 %v11956_v18, %v3615_v25  ;;  %v12048_v20 = vpop.f32.mrf.mxu0  ;;  %v3939_v29 = vpack.c.bf16 %v3930_v37, %v3930_v37  ;;  %v10279_v25 = vld [vmem:[#allocation2 + $0x3d0] sm:$0xff] }
 0x527   : > { %v4583_v13 = vpack.c.bf16 %v4560_v39, %v4558_v9  ;;  %v4713_v39 = vld [vmem:[#allocation2 + $0x36c] sm:$0x1] }
 0x528   : > { %9010 = vmatmul.msk.bf16.gmra.mxu1 %vm654_vm2, %v10240_v11 }
 0x529   : > { %5630 = vmatpush.bf16.msra.mxu1 %v10916_v48  ;;  %4666 = vmatmul.bf16.gmra.mxu0 %v4583_v13  ;;  %v10241_v48 = vld [vmem:[#allocation2 + $0x354] sm:$0xff] }
 0x52a   : > { %9087 = vmatmul.msk.bf16.gmra.mxu3 %vm654_vm2, %v10256_v5 }
 0x52b   : > { %v3594_v46 = vpop.f32.mrf.mxu2 }
 0x52c   : > { %v3616_v33 = vadd.f32 %v3594_v46, %v11918_v7  ;;  %v4735_v46 = vunpack.c.l.b16 %v4713_v39  ;;  %v10266_v39 = vld [vmem:[#allocation2 + $0x3a4] sm:$0xff] }
 0x52d   : > { %5631 = vmatpush.bf16.msra.mxu1 %v10922_v45  ;;  %v3932_v54 = vpop.f32.mrf.mxu1 }
 0x52e   : > { %v4563_v18 = vpop.f32.mrf.mxu3  ;;  %v12056_v60 = vadd.f32 %v11968_v23, %v3616_v33  ;;  %v3825_v47 = vpop.f32.mrf.mxu0  ;;  %v4957_v23 = vpack.c.b16 %v4951_v49, %v4951_v49  ;;  %v10251_v33 = vld [vmem:[%s12567_s4 + $0x4f8] sm:$0xff]  ;;  %v10262_v54 = vld [vmem:[%s12567_s4 + $0x528] sm:$0xff] }
 0x52f   : > { %4869 = vmatpush.bf16.msra.mxu2 %v10251_v33  ;;  %v4741_v47 = vpack.c.b16 %v4735_v46, %v4735_v46  ;;  %v10260_v49 = vld [vmem:[%s12567_s4 + $0x518] sm:$0xff] }
 0x530   : > { %4038 = vmatmul.bf16.gmra.mxu2 %v3939_v29 }
 0x533   : > { %v3597_v52 = vpop.f32.mrf.mxu2 }
 0x534   : > { %v3617_v27 = vadd.f32 %v3597_v52, %v11922_v51  ;;  %v10250_v52 = vld [vmem:[%s12567_s4 + $0x4f0] sm:$0xff] }
 0x535   : > { %v4337_v55 = vpop.f32.mrf.mxu1  ;;  %4870 = vmatpush.bf16.msra.mxu2 %v10250_v52 }
 0x536   : > { %v4565_v4 = vpop.f32.mrf.mxu3  ;;  %v12060_v7 = vadd.f32 %v11986_v58, %v3617_v27  ;;  %v12062_v15 = vpop.f32.mrf.mxu0  ;;  %v10261_v27 = vld [vmem:[%s12567_s4 + $0x520] sm:$0xff] }
 0x537   : > { %v4584_v45 = vpack.c.bf16 %v4565_v4, %v4563_v18 }
 0x538   : > { %9011 = vmatmul.msk.bf16.gmra.mxu1 %vm654_vm2, %v10241_v48 }
 0x539   : > { %4671 = vmatmul.bf16.gmra.mxu0 %v4584_v45 }
 0x53a   : > { %9088 = vmatmul.msk.bf16.gmra.mxu3 %vm654_vm2, %v4957_v23  ;;  %v10280_v23 = vld [vmem:[#allocation2 + $0x3d8] sm:$0xff] }
 0x53b   : > { %v3599_v42 = vpop.f32.mrf.mxu2 }
 0x53c   : > { %v3618_v41 = vadd.f32 %v3599_v42, %v11930_v40 }
 0x53d   : > { %v4339_v51 = vpop.f32.mrf.mxu1 }
 0x53e   : > { %v4366_v17 = vpack.c.bf16 %v4339_v51, %v4337_v55  ;;  %v4568_v62 = vpop.f32.mrf.mxu3  ;;  %v12068_v59 = vadd.f32 %v12006_v2, %v3618_v41  ;;  %v12070_v58 = vpop.f32.mrf.mxu0  ;;  %v10248_v41 = vld [vmem:[%s12567_s4 + $0x4e0] sm:$0xff]  ;;  %v10259_v51 = vld [vmem:[%s12567_s4 + $0x510] sm:$0xff] }
 0x540   : > { %4445 = vmatmul.bf16.vlgmr.msrb.gmra.mxu2 %v4366_v17 }
 0x543   : > { %v3602_v38 = vpop.f32.mrf.mxu2 }
 0x544   : > { %v3619_v6 = vadd.f32 %v3602_v38, %v11936_v26 }
 0x545   : > { %v4342_v57 = vpop.f32.mrf.mxu1 }
 0x546   : > { %v4570_v61 = vpop.f32.mrf.mxu3  ;;  %v12074_v34 = vadd.f32 %v12024_v44, %v3619_v6  ;;  %v12076_v40 = vpop.f32.mrf.mxu0 }
 0x547   : > { %v4585_v28 = vpack.c.bf16 %v4570_v61, %v4568_v62 }
 0x548   : > { %9012 = vmatmul.msk.bf16.gmra.mxu1 %vm654_vm2, %v10242_v16 }
 0x549   : > { %4676 = vmatmul.bf16.gmra.mxu0 %v4585_v28 }
 0x54a   : > { %9231 = vmatmul.msk.bf16.vlgmr.msrb.gmra.mxu3 %vm654_vm2, %v10278_v8  ;;  %v10265_v8 = vld [vmem:[#allocation2 + $0x39c] sm:$0xff] }
 0x54b   : > { %v3604_v2 = vpop.f32.mrf.mxu2 }
 0x54c   : > { %v3620_v63 = vadd.f32 %v3604_v2, %v11945_v53  ;;  %v10257_v2 = vld [vmem:[%s12567_s4 + $0x500] sm:$0xff] }
 0x54d   : > { %v4344_v14 = vpop.f32.mrf.mxu1 }
 0x54e   : > { %v4367_v26 = vpack.c.bf16 %v4344_v14, %v4342_v57  ;;  %v4573_v10 = vpop.f32.mrf.mxu3  ;;  %v12082_v21 = vadd.f32 %v12040_v32, %v3620_v63  ;;  %v12084_v44 = vpop.f32.mrf.mxu0  ;;  %v10264_v32 = vld [vmem:[%s12567_s4 + $0x538] sm:$0xff]  ;;  %v10258_v57 = vld [vmem:[%s12567_s4 + $0x508] sm:$0xff] }
 0x54f   : > { %5085 = vmatpush.bf16.msra.mxu0 %v10264_v32 }
 0x550   : > { %4450 = vmatmul.bf16.gmra.mxu2 %v4367_v26 }
 0x553   : > { %v3607_v30 = vpop.f32.mrf.mxu2 }
 0x554   : > { %v3621_v12 = vadd.f32 %v3607_v30, %v11953_v36  ;;  %v10263_v36 = vld [vmem:[%s12567_s4 + $0x530] sm:$0xff] }
 0x555   : > { %v4347_v35 = vpop.f32.mrf.mxu1  ;;  %5086 = vmatpush.bf16.msra.mxu0 %v10263_v36 }
 0x556   : > { %v4575_v0 = vpop.f32.mrf.mxu3  ;;  %v12088_v9 = vadd.f32 %v12048_v20, %v3621_v12  ;;  %v12090_v53 = vpop.f32.mrf.mxu0  ;;  %v10281_v12 = vld [vmem:[#allocation2 + $0x3e0] sm:$0xff] }
 0x557   : > { %v4586_v56 = vpack.c.bf16 %v4575_v0, %v4573_v10 }
 0x558   : > { %9013 = vmatmul.msk.bf16.gmra.mxu1 %vm654_vm2, %v10243_v22 }
 0x559   : > { %4681 = vmatmul.bf16.gmra.mxu0 %v4586_v56 }
 0x55a   : > { %9232 = vmatmul.msk.bf16.gmra.mxu3 %vm654_vm2, %v10279_v25  ;;  %5087 = vmatpush.bf16.msra.mxu0 %v10262_v54  ;;  %v10282_v54 = vld [vmem:[#allocation2 + $0x3e8] sm:$0xff] }
 0x55b   : > { %v3609_v11 = vpop.f32.mrf.mxu2 }
 0x55d   : > { %v4349_v37 = vpop.f32.mrf.mxu1 }
 0x55e   : > { %v4368_v20 = vpack.c.bf16 %v4349_v37, %v4347_v35  ;;  %v4578_v13 = vpop.f32.mrf.mxu3  ;;  %v12100_v5 = vpop.f32.mrf.mxu0  ;;  %5088 = vmatpush.bf16.msra.mxu0 %v10261_v27 }
 0x55f   : > { %v4587_v55 = vpack.c.bf16 %v4578_v13, %v4578_v13 }
 0x560   : > { %4455 = vmatmul.bf16.gmra.mxu2 %v4368_v20 }
 0x562   : > { %5089 = vmatpush.bf16.msra.mxu0 %v10260_v49 }
 0x563   : > { %v4014_v29 = vpop.f32.mrf.mxu2 }
 0x564   : > { %v4043_v18 = vadd.f32 %v4014_v29, %v11984_v3  ;;  %v10249_v3 = vld [vmem:[%s12567_s4 + $0x4e8] sm:$0xff] }
 0x565   : > { %v4352_v48 = vpop.f32.mrf.mxu1  ;;  %4871 = vmatpush.bf16.msra.mxu2 %v10249_v3  ;;  %v5361_v3 = vld [vmem:[#allocation2 + $0x3f0] sm:$0x1] }
 0x566   : > { %v4580_v4 = vpop.f32.mrf.mxu3  ;;  %v12116_v31 = vadd.f32 %v12062_v15, %v4043_v18  ;;  %v12118_v45 = vpop.f32.mrf.mxu0  ;;  %5090 = vmatpush.bf16.msra.mxu0 %v10259_v51 }
 0x568   : > { %9014 = vmatmul.msk.bf16.gmra.mxu1 %vm654_vm2, %v4741_v47 }
 0x569   : > { %4686 = vmatmul.bf16.gmra.mxu0 %v4587_v55  ;;  %4872 = vmatpush.bf16.msra.mxu2 %v10248_v41  ;;  %v10267_v55 = vld [vmem:[#allocation2 + $0x3ac] sm:$0xff] }
 0x56a   : > { %9233 = vmatmul.msk.bf16.gmra.mxu3 %vm654_vm2, %v10280_v23  ;;  %5091 = vmatpush.bf16.msra.mxu0 %v10258_v57 }
 0x56b   : > { %v4016_v42 = vpop.f32.mrf.mxu2 }
 0x56c   : > { %v4044_v15 = vadd.f32 %v4016_v42, %v12004_v43  ;;  %v10247_v43 = vld [vmem:[%s12567_s4 + $0x4d8] sm:$0xff]  ;;  %v5383_v42 = vunpack.c.l.b16 %v5361_v3 }
 0x56d   : > { %v4354_v17 = vpop.f32.mrf.mxu1  ;;  %4873 = vmatpush.bf16.msra.mxu2 %v10247_v43 }
 0x56e   : > { %v4369_v62 = vpack.c.bf16 %v4354_v17, %v4352_v48  ;;  %v4985_v38 = vpop.f32.mrf.mxu3  ;;  %v12136_v6 = vadd.f32 %v12070_v58, %v4044_v15  ;;  %v12138_v16 = vpop.f32.mrf.mxu0  ;;  %v10246_v58 = vld [vmem:[%s12567_s4 + $0x4d0] sm:$0xff]  ;;  %5092 = vmatpush.bf16.msra.mxu0 %v10257_v2  ;;  %v5389_v15 = vpack.c.b16 %v5383_v42, %v5383_v42 }
 0x570   : > { %4460 = vmatmul.bf16.gmra.mxu2 %v4369_v62 }
 0x571   : > { %4874 = vmatpush.bf16.msra.mxu2 %v10246_v58 }
 0x573   : > { %v4019_v61 = vpop.f32.mrf.mxu2 }
 0x574   : > { %v4045_v28 = vadd.f32 %v4019_v61, %v12022_v1  ;;  %v10245_v1 = vld [vmem:[%s12567_s4 + $0x4c8] sm:$0xff]  ;;  %v10268_v61 = vld [vmem:[#allocation2 + $0x3b4] sm:$0xff] }
 0x575   : > { %v4357_v63 = vpop.f32.mrf.mxu1  ;;  %4875 = vmatpush.bf16.msra.mxu2 %v10245_v1 }
 0x576   : > { %v4987_v14 = vpop.f32.mrf.mxu3  ;;  %v12154_v26 = vadd.f32 %v12076_v40, %v4045_v28  ;;  %v12156_v10 = vpop.f32.mrf.mxu0  ;;  %v10244_v40 = vld [vmem:[%s12567_s4 + $0x4c0] sm:$0xff] }
 0x577   : > { %v5014_v30 = vpack.c.bf16 %v4987_v14, %v4985_v38 }
 0x578   : > { %9157 = vmatmul.msk.bf16.vlgmr.msrb.gmra.mxu1 %vm654_vm2, %v10265_v8 }
 0x579   : > { %5093 = vmatmul.bf16.vlgmr.msra.gmra.mxu0 %v5014_v30  ;;  %4876 = vmatpush.bf16.msra.mxu2 %v10244_v40  ;;  %v10269_v40 = vld [vmem:[#allocation2 + $0x3bc] sm:$0xff] }
 0x57a   : > { %9234 = vmatmul.msk.bf16.gmra.mxu3 %vm654_vm2, %v10281_v12 }
 0x57b   : > { %v4021_v22 = vpop.f32.mrf.mxu2 }
 0x57c   : > { %v4046_v35 = vadd.f32 %v4021_v22, %v12038_v50 }
 0x57d   : > { %v4359_v0 = vpop.f32.mrf.mxu1 }
 0x57e   : > { %v4370_v56 = vpack.c.bf16 %v4359_v0, %v4357_v63  ;;  %v12168_v32 = vadd.f32 %v12084_v44, %v4046_v35  ;;  %v4252_v25 = vpop.f32.mrf.mxu0  ;;  %v4990_v11 = vpop.f32.mrf.mxu3 }
 0x580   : > { %4465 = vmatmul.bf16.gmra.mxu2 %v4370_v56 }
 0x583   : > { %v4024_v36 = vpop.f32.mrf.mxu2 }
 0x584   : > { %v4047_v37 = vadd.f32 %v4024_v36, %v12046_v19 }
 0x585   : > { %v4362_v50 = vpop.f32.mrf.mxu1 }
 0x586   : > { %v12172_v20 = vadd.f32 %v12090_v53, %v4047_v37  ;;  %v4255_v13 = vpop.f32.mrf.mxu0  ;;  %v4992_v46 = vpop.f32.mrf.mxu3  ;;  %v4371_v47 = vpack.c.bf16 %v4362_v50, %v4362_v50  ;;  %v10305_v37 = vld [vmem:[#allocation2 + $0x428] sm:$0xff] }
 0x587   : > { %v5015_v33 = vpack.c.bf16 %v4992_v46, %v4990_v11 }
 0x588   : > { %9158 = vmatmul.msk.bf16.gmra.mxu1 %vm654_vm2, %v10266_v39 }
 0x589   : > { %5098 = vmatmul.bf16.gmra.mxu0 %v5015_v33 }
 0x58a   : > { %9235 = vmatmul.msk.bf16.gmra.mxu3 %vm654_vm2, %v10282_v54 }
 0x58b   : > { %v4026_v44 = vpop.f32.mrf.mxu2 }
 0x58c   : > { %v4048_v29 = vadd.f32 %v4026_v44, %v12056_v60 }
 0x58d   : > { %v4364_v18 = vpop.f32.mrf.mxu1 }
 0x58e   : > { %v12178_v19 = vadd.f32 %v12100_v5, %v4048_v29  ;;  %v4257_v52 = vpop.f32.mrf.mxu0  ;;  %v4995_v53 = vpop.f32.mrf.mxu3  ;;  %v10277_v29 = vld [vmem:[%s12567_s4 + $0x578] sm:$0xff]  ;;  %v10288_v18 = vld [vmem:[%s12567_s4 + $0x5a8] sm:$0xff] }
 0x58f   : > { %5301 = vmatpush.bf16.msrb.mxu2 %v10277_v29 }
 0x590   : > { %4470 = vmatmul.bf16.gmra.mxu2 %v4371_v47 }
 0x593   : > { %v4029_v27 = vpop.f32.mrf.mxu2 }
 0x594   : > { %v4049_v48 = vadd.f32 %v4029_v27, %v12060_v7  ;;  %v10276_v27 = vld [vmem:[%s12567_s4 + $0x570] sm:$0xff] }
 0x595   : > { %v4769_v4 = vpop.f32.mrf.mxu1  ;;  %5302 = vmatpush.bf16.msrb.mxu2 %v10276_v27 }
 0x596   : > { %v12182_v49 = vadd.f32 %v12118_v45, %v4049_v48  ;;  %v12184_v60 = vpop.f32.mrf.mxu0  ;;  %v4997_v23 = vpop.f32.mrf.mxu3  ;;  %v10287_v48 = vld [vmem:[%s12567_s4 + $0x5a0] sm:$0xff] }
 0x597   : > { %v5016_v5 = vpack.c.bf16 %v4997_v23, %v4995_v53 }
 0x598   : > { %9159 = vmatmul.msk.bf16.gmra.mxu1 %vm654_vm2, %v10267_v55 }
 0x599   : > { %5103 = vmatmul.bf16.gmra.mxu0 %v5016_v5  ;;  %v10286_v5 = vld [vmem:[%s12567_s4 + $0x598] sm:$0xff] }
 0x59a   : > { %9236 = vmatmul.msk.bf16.gmra.mxu3 %vm654_vm2, %v5389_v15  ;;  %v10306_v15 = vld [vmem:[#allocation2 + $0x430] sm:$0xff] }
 0x59b   : > { %v4031_v41 = vpop.f32.mrf.mxu2 }
 0x59c   : > { %v4050_v51 = vadd.f32 %v4031_v41, %v12068_v59 }
 0x59d   : > { %v4771_v7 = vpop.f32.mrf.mxu1 }
 0x59e   : > { %v4798_v17 = vpack.c.bf16 %v4771_v7, %v4769_v4  ;;  %v12190_v62 = vadd.f32 %v12138_v16, %v4050_v51  ;;  %v12192_v45 = vpop.f32.mrf.mxu0  ;;  %v5000_v38 = vpop.f32.mrf.mxu3  ;;  %v10304_v16 = vld [vmem:[#allocation2 + $0x420] sm:$0xff]  ;;  %v10285_v7 = vld [vmem:[%s12567_s4 + $0x590] sm:$0xff] }
 0x59f   : > { %v10274_v51 = vld [vmem:[%s12567_s4 + $0x560] sm:$0xff] }
 0x5a0   : > { %4877 = vmatmul.bf16.vlgmr.msra.gmra.mxu2 %v4798_v17 }
 0x5a3   : > { %v4034_v43 = vpop.f32.mrf.mxu2 }
 0x5a4   : > { %v4051_v57 = vadd.f32 %v4034_v43, %v12074_v34 }
 0x5a5   : > { %v4774_v28 = vpop.f32.mrf.mxu1 }
 0x5a6   : > { %v12196_v8 = vadd.f32 %v12156_v10, %v4051_v57  ;;  %v12198_v59 = vpop.f32.mrf.mxu0  ;;  %v5002_v58 = vpop.f32.mrf.mxu3 }
 0x5a7   : > { %v5017_v2 = vpack.c.bf16 %v5002_v58, %v5000_v38 }
 0x5a8   : > { %9160 = vmatmul.msk.bf16.gmra.mxu1 %vm654_vm2, %v10268_v61 }
 0x5a9   : > { %5108 = vmatmul.bf16.gmra.mxu0 %v5017_v2 }
 0x5aa   : > { %9379 = vmatmul.msk.bf16.vlgmr.msra.gmra.mxu3 %vm654_vm2, %v10304_v16  ;;  %v10272_v16 = vld [vmem:[%s12567_s4 + $0x550] sm:$0xff] }
 0x5ab   : > { %v4036_v63 = vpop.f32.mrf.mxu2 }
 0x5ac   : > { %v4052_v14 = vadd.f32 %v4036_v63, %v12082_v21  ;;  %v10283_v63 = vld [vmem:[%s12567_s4 + $0x580] sm:$0xff] }
 0x5ad   : > { %v4776_v30 = vpop.f32.mrf.mxu1 }
 0x5ae   : > { %v4799_v34 = vpack.c.bf16 %v4776_v30, %v4774_v28  ;;  %v12203_v1 = vadd.f32 %v4252_v25, %v4052_v14  ;;  %v12205_v12 = vpop.f32.mrf.mxu0  ;;  %v5005_v10 = vpop.f32.mrf.mxu3  ;;  %v10290_v25 = vld [vmem:[%s12567_s4 + $0x5b8] sm:$0xff]  ;;  %v10284_v28 = vld [vmem:[%s12567_s4 + $0x588] sm:$0xff] }
 0x5af   : > { %5517 = vmatpush.bf16.msrb.mxu0 %v10290_v25 }
 0x5b0   : > { %4882 = vmatmul.bf16.gmra.mxu2 %v4799_v34 }
 0x5b3   : > { %v4039_v22 = vpop.f32.mrf.mxu2 }
 0x5b4   : > { %v4053_v35 = vadd.f32 %v4039_v22, %v12088_v9  ;;  %v10289_v9 = vld [vmem:[%s12567_s4 + $0x5b0] sm:$0xff]  ;;  %v10271_v22 = vld [vmem:[%s12567_s4 + $0x548] sm:$0xff] }
 0x5b5   : > { %v4779_v0 = vpop.f32.mrf.mxu1  ;;  %5518 = vmatpush.bf16.msrb.mxu0 %v10289_v9 }
 0x5b6   : > { %v12208_v56 = vadd.f32 %v4255_v13, %v4053_v35  ;;  %v12210_v11 = vpop.f32.mrf.mxu0  ;;  %v5007_v21 = vpop.f32.mrf.mxu3  ;;  %v5145_v13 = vld [vmem:[#allocation2 + $0x3c4] sm:$0x1]  ;;  %v10307_v35 = vld [vmem:[#allocation2 + $0x438] sm:$0xff] }
 0x5b7   : > { %v5018_v36 = vpack.c.bf16 %v5007_v21, %v5005_v10  ;;  %v5167_v44 = vunpack.c.l.b16 %v5145_v13  ;;  %v10292_v13 = vld [vmem:[#allocation2 + $0x3fc] sm:$0xff] }
 0x5b8   : > { %9161 = vmatmul.msk.bf16.gmra.mxu1 %vm654_vm2, %v10269_v40 }
 0x5b9   : > { %5113 = vmatmul.bf16.gmra.mxu0 %v5018_v36  ;;  %v5173_v53 = vpack.c.b16 %v5167_v44, %v5167_v44 }
 0x5ba   : > { %9380 = vmatmul.msk.bf16.gmra.mxu3 %vm654_vm2, %v10305_v37  ;;  %5519 = vmatpush.bf16.msrb.mxu0 %v10288_v18  ;;  %v10308_v18 = vld [vmem:[#allocation2 + $0x440] sm:$0xff] }
 0x5bb   : > { %v4041_v39 = vpop.f32.mrf.mxu2 }
 0x5bd   : > { %v4781_v50 = vpop.f32.mrf.mxu1 }
 0x5be   : > { %v4800_v46 = vpack.c.bf16 %v4781_v50, %v4779_v0  ;;  %v12220_v33 = vpop.f32.mrf.mxu0  ;;  %v5010_v54 = vpop.f32.mrf.mxu3  ;;  %5520 = vmatpush.bf16.msrb.mxu0 %v10287_v48 }
 0x5bf   : > { %v5019_v4 = vpack.c.bf16 %v5010_v54, %v5010_v54 }
 0x5c0   : > { %4887 = vmatmul.bf16.gmra.mxu2 %v4800_v46 }
 0x5c2   : > { %5521 = vmatpush.bf16.msrb.mxu0 %v10286_v5 }
 0x5c3   : > { %v4446_v47 = vpop.f32.mrf.mxu2 }
 0x5c4   : > { %v4475_v52 = vadd.f32 %v4446_v47, %v12116_v31  ;;  %v10275_v31 = vld [vmem:[%s12567_s4 + $0x568] sm:$0xff] }
 0x5c5   : > { %v4784_v55 = vpop.f32.mrf.mxu1  ;;  %5303 = vmatpush.bf16.msrb.mxu2 %v10275_v31 }
 0x5c6   : > { %v12236_v3 = vadd.f32 %v12184_v60, %v4475_v52  ;;  %v12238_v23 = vpop.f32.mrf.mxu0  ;;  %v5012_v42 = vpop.f32.mrf.mxu3  ;;  %5522 = vmatpush.bf16.msrb.mxu0 %v10285_v7 }
 0x5c8   : > { %9162 = vmatmul.msk.bf16.gmra.mxu1 %vm654_vm2, %v5173_v53 }
 0x5c9   : > { %5118 = vmatmul.bf16.gmra.mxu0 %v5019_v4  ;;  %5304 = vmatpush.bf16.msrb.mxu2 %v10274_v51  ;;  %v10293_v4 = vld [vmem:[#allocation2 + $0x404] sm:$0xff] }
 0x5ca   : > { %9381 = vmatmul.msk.bf16.gmra.mxu3 %vm654_vm2, %v10306_v15  ;;  %5523 = vmatpush.bf16.msrb.mxu0 %v10284_v28  ;;  %v5793_v28 = vld [vmem:[#allocation2 + $0x448] sm:$0x1] }
 0x5cb   : > { %v4448_v41 = vpop.f32.mrf.mxu2 }
 0x5cc   : > { %v4476_v60 = vadd.f32 %v4448_v41, %v12136_v6  ;;  %v10273_v6 = vld [vmem:[%s12567_s4 + $0x558] sm:$0xff] }
 0x5cd   : > { %v4786_v17 = vpop.f32.mrf.mxu1  ;;  %5305 = vmatpush.bf16.msrb.mxu2 %v10273_v6 }
 0x5ce   : > { %v4801_v38 = vpack.c.bf16 %v4786_v17, %v4784_v55  ;;  %v12256_v43 = vadd.f32 %v12192_v45, %v4476_v60  ;;  %v12258_v57 = vpop.f32.mrf.mxu0  ;;  %v5417_v61 = vpop.f32.mrf.mxu3  ;;  %v10291_v45 = vld [vmem:[#allocation2 + $0x3f4] sm:$0xff]  ;;  %5524 = vmatpush.bf16.msrb.mxu0 %v10283_v63 }
 0x5d0   : > { %4892 = vmatmul.bf16.gmra.mxu2 %v4801_v38 }
 0x5d1   : > { %5306 = vmatpush.bf16.msrb.mxu2 %v10272_v16 }
 0x5d3   : > { %v4451_v58 = vpop.f32.mrf.mxu2 }
 0x5d4   : > { %v4477_v2 = vadd.f32 %v4451_v58, %v12154_v26 }
 0x5d5   : > { %v4789_v14 = vpop.f32.mrf.mxu1  ;;  %5307 = vmatpush.bf16.msrb.mxu2 %v10271_v22 }
 0x5d6   : > { %v12274_v30 = vadd.f32 %v12198_v59, %v4477_v2  ;;  %v12276_v34 = vpop.f32.mrf.mxu0  ;;  %v5419_v10 = vpop.f32.mrf.mxu3  ;;  %v10270_v59 = vld [vmem:[%s12567_s4 + $0x540] sm:$0xff] }
 0x5d7   : > { %v5446_v26 = vpack.c.bf16 %v5419_v10, %v5417_v61  ;;  %v10294_v61 = vld [vmem:[#allocation2 + $0x40c] sm:$0xff] }
 0x5d8   : > { %9305 = vmatmul.msk.bf16.vlgmr.msra.gmra.mxu1 %vm654_vm2, %v10291_v45  ;;  %v5815_v45 = vunpack.c.l.b16 %v5793_v28 }
 0x5d9   : > { %5525 = vmatmul.bf16.vlgmr.msrb.gmra.mxu0 %v5446_v26  ;;  %5308 = vmatpush.bf16.msrb.mxu2 %v10270_v59 }
 0x5da   : > { %9382 = vmatmul.msk.bf16.gmra.mxu3 %vm654_vm2, %v10307_v35  ;;  %v5821_v16 = vpack.c.b16 %v5815_v45, %v5815_v45  ;;  %v10309_v45 = vld [vmem:[%s12567_s4 + $0x600] sm:$0xff] }
 0x5db   : > { %v4453_v40 = vpop.f32.mrf.mxu2 }
 0x5dc   : > { %v4478_v0 = vadd.f32 %v4453_v40, %v12168_v32 }
 0x5dd   : > { %v4791_v21 = vpop.f32.mrf.mxu1 }
 0x5de   : > { %v4802_v36 = vpack.c.bf16 %v4791_v21, %v4789_v14  ;;  %v12288_v25 = vadd.f32 %v12205_v12, %v4478_v0  ;;  %v4684_v37 = vpop.f32.mrf.mxu0  ;;  %v5422_v39 = vpop.f32.mrf.mxu3  ;;  %v10295_v0 = vld [vmem:[#allocation2 + $0x414] sm:$0xff] }
 0x5df   : > { %v10316_v21 = vld [vmem:[%s12567_s4 + $0x638] sm:$0xff] }
 0x5e0   : > { %4897 = vmatmul.bf16.gmra.mxu2 %v4802_v36  ;;  %5949 = vmatpush.bf16.msra.mxu0 %v10316_v21 }
 0x5e3   : > { %v4456_v9 = vpop.f32.mrf.mxu2 }
 0x5e4   : > { %v4479_v50 = vadd.f32 %v4456_v9, %v12172_v20 }
 0x5e5   : > { %v4794_v32 = vpop.f32.mrf.mxu1 }
 0x5e6   : > { %v12292_v46 = vadd.f32 %v12210_v11, %v4479_v50  ;;  %v4687_v54 = vpop.f32.mrf.mxu0  ;;  %v5424_v44 = vpop.f32.mrf.mxu3  ;;  %v4803_v53 = vpack.c.bf16 %v4794_v32, %v4794_v32 }
 0x5e7   : > { %v5447_v29 = vpack.c.bf16 %v5424_v44, %v5422_v39 }
 0x5e8   : > { %9306 = vmatmul.msk.bf16.gmra.mxu1 %vm654_vm2, %v10292_v13  ;;  %v5577_v13 = vld [vmem:[#allocation2 + $0x41c] sm:$0x1] }
 0x5e9   : > { %5530 = vmatmul.bf16.gmra.mxu0 %v5447_v29  ;;  %v5599_v29 = vunpack.c.l.b16 %v5577_v13 }
 0x5ea   : > { %9383 = vmatmul.msk.bf16.gmra.mxu3 %vm654_vm2, %v10308_v18  ;;  %v10303_v18 = vld [vmem:[%s12567_s4 + $0x5f8] sm:$0xff] }
 0x5eb   : > { %v4458_v12 = vpop.f32.mrf.mxu2  ;;  %5733 = vmatpush.bf16.msra.mxu2 %v10303_v18 }
 0x5ec   : > { %v4480_v47 = vadd.f32 %v4458_v12, %v12178_v19  ;;  %v10314_v12 = vld [vmem:[%s12567_s4 + $0x628] sm:$0xff] }
 0x5ed   : > { %v4796_v52 = vpop.f32.mrf.mxu1 }
 0x5ee   : > { %v12298_v20 = vadd.f32 %v12220_v33, %v4480_v47  ;;  %v4689_v27 = vpop.f32.mrf.mxu0  ;;  %v5427_v11 = vpop.f32.mrf.mxu3 }
 0x5ef   : > { %v10302_v27 = vld [vmem:[%s12567_s4 + $0x5f0] sm:$0xff] }
 0x5f0   : > { %4902 = vmatmul.bf16.gmra.mxu2 %v4803_v53  ;;  %v5605_v53 = vpack.c.b16 %v5599_v29, %v5599_v29 }
 0x5f1   : > { %5734 = vmatpush.bf16.msra.mxu2 %v10302_v27 }
 0x5f3   : > { %v4461_v48 = vpop.f32.mrf.mxu2 }
 0x5f4   : > { %v4481_v55 = vadd.f32 %v4461_v48, %v12182_v49 }
 0x5f5   : > { %v5201_v42 = vpop.f32.mrf.mxu1 }
 0x5f6   : > { %v12302_v31 = vadd.f32 %v12238_v23, %v4481_v55  ;;  %v12304_v5 = vpop.f32.mrf.mxu0  ;;  %v5429_v19 = vpop.f32.mrf.mxu3 }
 0x5f7   : > { %v5448_v15 = vpack.c.bf16 %v5429_v19, %v5427_v11  ;;  %v10313_v11 = vld [vmem:[%s12567_s4 + $0x620] sm:$0xff] }
 0x5f8   : > { %9307 = vmatmul.msk.bf16.gmra.mxu1 %vm654_vm2, %v10293_v4  ;;  %v10301_v4 = vld [vmem:[%s12567_s4 + $0x5e8] sm:$0xff] }
 0x5f9   : > { %5535 = vmatmul.bf16.gmra.mxu0 %v5448_v15  ;;  %v10312_v15 = vld [vmem:[%s12567_s4 + $0x618] sm:$0xff]  ;;  %5735 = vmatpush.bf16.msra.mxu2 %v10301_v4 }
 0x5fa   : > { %9384 = vmatmul.msk.bf16.gmra.mxu3 %vm654_vm2, %v5821_v16  ;;  %v10297_v16 = vld [vmem:[%s12567_s4 + $0x5c8] sm:$0xff] }
 0x5fb   : > { %v4463_v33 = vpop.f32.mrf.mxu2 }
 0x5fc   : > { %v4482_v41 = vadd.f32 %v4463_v33, %v12190_v62 }
 0x5fd   : > { %v5203_v60 = vpop.f32.mrf.mxu1 }
 0x5fe   : > { %v5230_v51 = vpack.c.bf16 %v5203_v60, %v5201_v42  ;;  %v12309_v7 = vadd.f32 %v12258_v57, %v4482_v41  ;;  %v12311_v49 = vpop.f32.mrf.mxu0  ;;  %v5432_v17 = vpop.f32.mrf.mxu3  ;;  %v10311_v60 = vld [vmem:[%s12567_s4 + $0x610] sm:$0xff] }
 0x600   : > { %5309 = vmatmul.bf16.vlgmr.msrb.gmra.mxu2 %v5230_v51 }
 0x603   : > { %v4466_v23 = vpop.f32.mrf.mxu2 }
 0x604   : > { %v4483_v38 = vadd.f32 %v4466_v23, %v12196_v8 }
 0x605   : > { %v5206_v6 = vpop.f32.mrf.mxu1 }
 0x606   : > { %v12315_v58 = vadd.f32 %v12276_v34, %v4483_v38  ;;  %v12317_v2 = vpop.f32.mrf.mxu0  ;;  %v5434_v62 = vpop.f32.mrf.mxu3 }
 0x607   : > { %v5449_v57 = vpack.c.bf16 %v5434_v62, %v5432_v17 }
 0x608   : > { %9308 = vmatmul.msk.bf16.gmra.mxu1 %vm654_vm2, %v10294_v61 }
 0x609   : > { %5540 = vmatmul.bf16.gmra.mxu0 %v5449_v57 }
 0x60b   : > { %v4468_v63 = vpop.f32.mrf.mxu2 }
 0x60c   : > { %v4484_v8 = vadd.f32 %v4468_v63, %v12203_v1 }
 0x60d   : > { %v5208_v14 = vpop.f32.mrf.mxu1 }
 0x60e   : > { %v5231_v10 = vpack.c.bf16 %v5208_v14, %v5206_v6  ;;  %v12322_v26 = vadd.f32 %v4684_v37, %v4484_v8  ;;  %v12324_v34 = vpop.f32.mrf.mxu0  ;;  %v5437_v22 = vpop.f32.mrf.mxu3  ;;  %v10310_v6 = vld [vmem:[%s12567_s4 + $0x608] sm:$0xff] }
 0x610   : > { %5314 = vmatmul.bf16.gmra.mxu2 %v5231_v10 }
 0x613   : > { %v4471_v35 = vpop.f32.mrf.mxu2 }
 0x614   : > { %v4485_v40 = vadd.f32 %v4471_v35, %v12208_v56  ;;  %v10315_v56 = vld [vmem:[%s12567_s4 + $0x630] sm:$0xff]  ;;  %v10296_v35 = vld [vmem:[%s12567_s4 + $0x5c0] sm:$0xff] }
 0x615   : > { %v5211_v59 = vpop.f32.mrf.mxu1  ;;  %5950 = vmatpush.bf16.msra.mxu0 %v10315_v56 }
 0x616   : > { %v12330_v36 = vadd.f32 %v4687_v54, %v4485_v40  ;;  %v12332_v1 = vpop.f32.mrf.mxu0  ;;  %v5439_v39 = vpop.f32.mrf.mxu3 }
 0x617   : > { %v5450_v37 = vpack.c.bf16 %v5439_v39, %v5437_v22 }
 0x618   : > { %9309 = vmatmul.msk.bf16.gmra.mxu1 %vm654_vm2, %v10295_v0 }
 0x619   : > { %5545 = vmatmul.bf16.gmra.mxu0 %v5450_v37 }
 0x61a   : > { %5951 = vmatpush.bf16.msra.mxu0 %v10314_v12 }
 0x61b   : > { %v4473_v9 = vpop.f32.mrf.mxu2 }
 0x61d   : > { %v5213_v50 = vpop.f32.mrf.mxu1 }
 0x61e   : > { %v5232_v32 = vpack.c.bf16 %v5213_v50, %v5211_v59  ;;  %v12338_v44 = vpop.f32.mrf.mxu0  ;;  %v5442_v54 = vpop.f32.mrf.mxu3  ;;  %5952 = vmatpush.bf16.msra.mxu0 %v10313_v11 }
 0x61f   : > { %v5451_v55 = vpack.c.bf16 %v5442_v54, %v5442_v54 }
 0x620   : > { %5319 = vmatmul.bf16.gmra.mxu2 %v5232_v32 }
 0x622   : > { %5953 = vmatpush.bf16.msra.mxu0 %v10312_v15 }
 0x623   : > { %v4878_v47 = vpop.f32.mrf.mxu2 }
 0x624   : > { %v4907_v52 = vadd.f32 %v4878_v47, %v12236_v3 }
 0x625   : > { %v5216_v48 = vpop.f32.mrf.mxu1 }
 0x626   : > { %v12357_v42 = vadd.f32 %v12304_v5, %v4907_v52  ;;  %v12359_v3 = vpop.f32.mrf.mxu0  ;;  %v5444_v19 = vpop.f32.mrf.mxu3  ;;  %v10300_v5 = vld [vmem:[%s12567_s4 + $0x5e0] sm:$0xff]  ;;  %5954 = vmatpush.bf16.msra.mxu0 %v10311_v60 }
 0x627   : > { %5736 = vmatpush.bf16.msra.mxu2 %v10300_v5 }
 0x628   : > { %9310 = vmatmul.msk.bf16.gmra.mxu1 %vm654_vm2, %v5605_v53 }
 0x629   : > { %5550 = vmatmul.bf16.gmra.mxu0 %v5451_v55 }
 0x62a   : > { %5955 = vmatpush.bf16.msra.mxu0 %v10310_v6 }
 0x62b   : > { %v4880_v33 = vpop.f32.mrf.mxu2 }
 0x62c   : > { %v4908_v41 = vadd.f32 %v4880_v33, %v12256_v43  ;;  %v10299_v43 = vld [vmem:[%s12567_s4 + $0x5d8] sm:$0xff] }
 0x62d   : > { %v5218_v51 = vpop.f32.mrf.mxu1  ;;  %5737 = vmatpush.bf16.msra.mxu2 %v10299_v43 }
 0x62e   : > { %v5233_v17 = vpack.c.bf16 %v5218_v51, %v5216_v48  ;;  %v12373_v23 = vadd.f32 %v12311_v49, %v4908_v41  ;;  %v5111_v38 = vpop.f32.mrf.mxu0  ;;  %v5849_v61 = vpop.f32.mrf.mxu3  ;;  %v10298_v49 = vld [vmem:[%s12567_s4 + $0x5d0] sm:$0xff]  ;;  %5956 = vmatpush.bf16.msra.mxu0 %v10309_v45 }
 0x630   : > { %5324 = vmatmul.bf16.gmra.mxu2 %v5233_v17 }
 0x631   : > { %5738 = vmatpush.bf16.msra.mxu2 %v10298_v49 }
 0x633   : > { %v4883_v28 = vpop.f32.mrf.mxu2 }
 0x634   : > { %v4909_v62 = vadd.f32 %v4883_v28, %v12274_v30 }
 0x635   : > { %v5221_v57 = vpop.f32.mrf.mxu1  ;;  %5739 = vmatpush.bf16.msra.mxu2 %v10297_v16 }
 0x636   : > { %v12392_v63 = vadd.f32 %v12317_v2, %v4909_v62  ;;  %v5114_v8 = vpop.f32.mrf.mxu0  ;;  %v5851_v14 = vpop.f32.mrf.mxu3 }
 0x637   : > { %v5878_v30 = vpack.c.bf16 %v5851_v14, %v5849_v61 }
 0x639   : > { %5957 = vmatmul.bf16.vlgmr.msra.gmra.mxu0 %v5878_v30  ;;  %5740 = vmatpush.bf16.msra.mxu2 %v10296_v35 }
 0x63b   : > { %v4885_v10 = vpop.f32.mrf.mxu2 }
 0x63c   : > { %v4910_v22 = vadd.f32 %v4885_v10, %v12288_v25 }
 0x63d   : > { %v5223_v40 = vpop.f32.mrf.mxu1 }
 0x63e   : > { %v5234_v0 = vpack.c.bf16 %v5223_v40, %v5221_v57  ;;  %v12399_v59 = vadd.f32 %v12324_v34, %v4910_v22  ;;  %v5116_v2 = vpop.f32.mrf.mxu0  ;;  %v5854_v21 = vpop.f32.mrf.mxu3 }
 0x640   : > { %5329 = vmatmul.bf16.gmra.mxu2 %v5234_v0 }
 0x643   : > { %v4888_v39 = vpop.f32.mrf.mxu2 }
 0x644   : > { %v4911_v37 = vadd.f32 %v4888_v39, %v12292_v46 }
 0x645   : > { %v5226_v9 = vpop.f32.mrf.mxu1 }
 0x646   : > { %v12403_v56 = vadd.f32 %v12332_v1, %v4911_v37  ;;  %v5119_v25 = vpop.f32.mrf.mxu0  ;;  %v5856_v50 = vpop.f32.mrf.mxu3  ;;  %v5235_v34 = vpack.c.bf16 %v5226_v9, %v5226_v9 }
 0x647   : > { %v5879_v13 = vpack.c.bf16 %v5856_v50, %v5854_v21 }
 0x649   : > { %5962 = vmatmul.bf16.gmra.mxu0 %v5879_v13 }
 0x64b   : > { %v4890_v32 = vpop.f32.mrf.mxu2 }
 0x64c   : > { %v4912_v54 = vadd.f32 %v4890_v32, %v12298_v20 }
 0x64d   : > { %v5228_v29 = vpop.f32.mrf.mxu1 }
 0x64e   : > { %v12407_v18 = vadd.f32 %v12338_v44, %v4912_v54  ;;  %v5121_v12 = vpop.f32.mrf.mxu0  ;;  %v5859_v47 = vpop.f32.mrf.mxu3 }
 0x650   : > { %5334 = vmatmul.bf16.gmra.mxu2 %v5235_v34 }
 0x653   : > { %v4893_v46 = vpop.f32.mrf.mxu2 }
 0x654   : > { %v4913_v52 = vadd.f32 %v4893_v46, %v12302_v31 }
 0x655   : > { %v5633_v1 = vpop.f32.mrf.mxu1 }
 0x656   : > { %v12411_v53 = vadd.f32 %v12359_v3, %v4913_v52  ;;  %v5526_v27 = vpop.f32.mrf.mxu0  ;;  %v5861_v11 = vpop.f32.mrf.mxu3 }
 0x657   : > { %v5880_v48 = vpack.c.bf16 %v5861_v11, %v5859_v47 }
 0x659   : > { %5967 = vmatmul.bf16.gmra.mxu0 %v5880_v48 }
 0x65b   : > { %v4895_v20 = vpop.f32.mrf.mxu2 }
 0x65c   : > { %v4914_v55 = vadd.f32 %v4895_v20, %v12309_v7 }
 0x65d   : > { %v5635_v4 = vpop.f32.mrf.mxu1 }
 0x65e   : > { %v5662_v44 = vpack.c.bf16 %v5635_v4, %v5633_v1  ;;  %v12414_v19 = vadd.f32 %v5111_v38, %v4914_v55  ;;  %v12416_v15 = vpop.f32.mrf.mxu0  ;;  %v5864_v33 = vpop.f32.mrf.mxu3 }
 0x660   : > { %5741 = vmatmul.bf16.vlgmr.msra.gmra.mxu2 %v5662_v44 }
 0x663   : > { %v4898_v31 = vpop.f32.mrf.mxu2 }
 0x664   : > { %v4915_v41 = vadd.f32 %v4898_v31, %v12315_v58 }
 0x665   : > { %v5638_v3 = vpop.f32.mrf.mxu1 }
 0x666   : > { %v12419_v5 = vadd.f32 %v5114_v8, %v4915_v41  ;;  %v5531_v60 = vpop.f32.mrf.mxu0  ;;  %v5866_v51 = vpop.f32.mrf.mxu3 }
 0x667   : > { %v5881_v17 = vpack.c.bf16 %v5866_v51, %v5864_v33 }
 0x669   : > { %5972 = vmatmul.bf16.gmra.mxu0 %v5881_v17 }
 0x66b   : > { %v4900_v61 = vpop.f32.mrf.mxu2 }
 0x66c   : > { %v4916_v7 = vadd.f32 %v4900_v61, %v12322_v26 }
 0x66d   : > { %v5640_v43 = vpop.f32.mrf.mxu1 }
 0x66e   : > { %v5663_v38 = vpack.c.bf16 %v5640_v43, %v5638_v3  ;;  %v5132_v6 = vadd.f32 %v5116_v2, %v4916_v7  ;;  %v12422_v28 = vpop.f32.mrf.mxu0  ;;  %v5869_v62 = vpop.f32.mrf.mxu3 }
 0x670   : > { %5746 = vmatmul.bf16.gmra.mxu2 %v5663_v38 }
 0x673   : > { %v4903_v49 = vpop.f32.mrf.mxu2 }
 0x674   : > { %v4917_v58 = vadd.f32 %v4903_v49, %v12330_v36 }
 0x675   : > { %v5643_v45 = vpop.f32.mrf.mxu1 }
 0x676   : > { %v5133_v57 = vadd.f32 %v5119_v25, %v4917_v58  ;;  %v5536_v16 = vpop.f32.mrf.mxu0  ;;  %v5871_v8 = vpop.f32.mrf.mxu3 }
 0x677   : > { %v5882_v14 = vpack.c.bf16 %v5871_v8, %v5869_v62 }
 0x679   : > { %5977 = vmatmul.bf16.gmra.mxu0 %v5882_v14 }
 0x67b   : > { %v4905_v30 = vpop.f32.mrf.mxu2 }
 0x67d   : > { %v5645_v10 = vpop.f32.mrf.mxu1 }
 0x67e   : > { %v5664_v22 = vpack.c.bf16 %v5645_v10, %v5643_v45  ;;  %v12425_v26 = vpop.f32.mrf.mxu0  ;;  %v5874_v9 = vpop.f32.mrf.mxu3 }
 0x67f   : > { %v5883_v50 = vpack.c.bf16 %v5874_v9, %v5874_v9 }
 0x680   : > { %5751 = vmatmul.bf16.gmra.mxu2 %v5664_v22 }
 0x683   : > { %v5310_v35 = vpop.f32.mrf.mxu2 }
 0x684   : > { %v5339_v40 = vadd.f32 %v5310_v35, %v12357_v42 }
 0x685   : > { %v5648_v0 = vpop.f32.mrf.mxu1 }
 0x686   : > { %v5555_v2 = vadd.f32 %v5526_v27, %v5339_v40  ;;  %v5541_v21 = vpop.f32.mrf.mxu0  ;;  %v5876_v29 = vpop.f32.mrf.mxu3 }
 0x689   : > { %5982 = vmatmul.bf16.gmra.mxu0 %v5883_v50 }
 0x68b   : > { %v5312_v39 = vpop.f32.mrf.mxu2 }
 0x68c   : > { %v5340_v22 = vadd.f32 %v5312_v39, %v12373_v23 }
 0x68d   : > { %v5650_v36 = vpop.f32.mrf.mxu1 }
 0x68e   : > { %v5665_v37 = vpack.c.bf16 %v5650_v36, %v5648_v0  ;;  %v12428_v25 = vpop.f32.mrf.mxu0  ;;  %v5556_v40 = vadd.f32 %v12416_v15, %v5340_v22 }
 0x690   : > { %5756 = vmatmul.bf16.gmra.mxu2 %v5665_v37 }
 0x693   : > { %v5315_v13 = vpop.f32.mrf.mxu2 }
 0x694   : > { %v5341_v32 = vadd.f32 %v5315_v13, %v12392_v63 }
 0x695   : > { %v5653_v54 = vpop.f32.mrf.mxu1 }
 0x696   : > { %v5557_v34 = vadd.f32 %v5531_v60, %v5341_v32  ;;  %v5546_v12 = vpop.f32.mrf.mxu0 }
 0x69b   : > { %v5317_v42 = vpop.f32.mrf.mxu2 }
 0x69c   : > { %v5342_v32 = vadd.f32 %v5317_v42, %v12399_v59 }
 0x69d   : > { %v5655_v47 = vpop.f32.mrf.mxu1 }
 0x69e   : > { %v5666_v46 = vpack.c.bf16 %v5655_v47, %v5653_v54  ;;  %v5548_v52 = vpop.f32.mrf.mxu0  ;;  %v5558_v29 = vadd.f32 %v12422_v28, %v5342_v32 }
 0x6a0   : > { %5761 = vmatmul.bf16.gmra.mxu2 %v5666_v46 }
 0x6a3   : > { %v5320_v1 = vpop.f32.mrf.mxu2 }
 0x6a4   : > { %v5343_v27 = vadd.f32 %v5320_v1, %v12403_v56 }
 0x6a5   : > { %v5658_v11 = vpop.f32.mrf.mxu1 }
 0x6a6   : > { %v5559_v48 = vadd.f32 %v5536_v16, %v5343_v27  ;;  %v5551_v20 = vpop.f32.mrf.mxu0  ;;  %v5667_v4 = vpack.c.bf16 %v5658_v11, %v5658_v11 }
 0x6ab   : > { %v5322_v55 = vpop.f32.mrf.mxu2 }
 0x6ad   : > { %v5660_v44 = vpop.f32.mrf.mxu1 }
 0x6ae   : > { %v5553_v33 = vpop.f32.mrf.mxu0 }
 0x6b0   : > { %5766 = vmatmul.bf16.gmra.mxu2 %v5667_v4 }
 0x6b3   : > { %v5325_v63 = vpop.f32.mrf.mxu2 }
 0x6b4   : > { %v5345_v31 = vadd.f32 %v5325_v63, %v12411_v53 }
 0x6b6   : > { %v12433_v41 = vadd.f32 %v5541_v21, %v5345_v31  ;;  %v5958_v3 = vpop.f32.mrf.mxu0 }
 0x6bb   : > { %v12435_v60 = vpop.f32.mrf.mxu2 }
 0x6be   : > { %v5960_v51 = vpop.f32.mrf.mxu0 }
 0x6c3   : > { %v5330_v17 = vpop.f32.mrf.mxu2 }
 0x6c4   : > { %v5347_v56 = vadd.f32 %v5330_v17, %v12419_v5 }
 0x6c6   : > { %v12438_v61 = vadd.f32 %v5546_v12, %v5347_v56  ;;  %v5963_v7 = vpop.f32.mrf.mxu0 }
 0x6cb   : > { %v5332_v43 = vpop.f32.mrf.mxu2 }
 0x6cc   : > { %v5348_v38 = vadd.f32 %v5332_v43, %v5132_v6  ;;  %v12448_v6 = vld [vmem:[%s12568_s5] ss:$0 sm:$0xff] }
 0x6ce   : > { %v12440_v62 = vadd.f32 %v5548_v52, %v5348_v38  ;;  %v5965_v49 = vpop.f32.mrf.mxu0 }
 0x6d3   : > { %v5335_v58 = vpop.f32.mrf.mxu2 }
 0x6d4   : > { %v5349_v45 = vadd.f32 %v5335_v58, %v5133_v57 }
 0x6d6   : > { %v12442_v53 = vadd.f32 %v5551_v20, %v5349_v45  ;;  %v5968_v16 = vpop.f32.mrf.mxu0 }
 0x6db   : > { %v5337_v8 = vpop.f32.mrf.mxu2 }
 0x6de   : > { %v5970_v14 = vpop.f32.mrf.mxu0 }
 0x6e3   : > { %v5742_v30 = vpop.f32.mrf.mxu2 }
 0x6e4   : > { %v5771_v10 = vadd.f32 %v5742_v30, %v5555_v2 }
 0x6e6   : > { %v5987_v5 = vadd.f32 %v5958_v3, %v5771_v10  ;;  %v5973_v35 = vpop.f32.mrf.mxu0 }
 0x6e8   : > { %v6002_v21 = vadd.f32 %v12448_v6, %v5987_v5 }
 0x6ea   : > { %v6013_v9 = vmax.f32 %v6002_v21, 0.0 }
 0x6eb   : > { %v5744_v0 = vpop.f32.mrf.mxu2 }
 0x6ec   : > { %v5772_v57 = vadd.f32 %v5744_v0, %v5556_v40 }
 0x6ee   : > { %v5988_v36 = vadd.f32 %v5960_v51, %v5772_v57  ;;  %v5975_v50 = vpop.f32.mrf.mxu0 }
 0x6f0   : > { %v6003_v37 = vadd.f32 %v12448_v6, %v5988_v36 }
 0x6f2   : > { %v6014_v2 = vmax.f32 %v6003_v37, 0.0 }
 0x6f3   : > { %v5747_v23 = vpop.f32.mrf.mxu2 }
 0x6f4   : > { %v12453_v39 = vpack.c.bf16 %v6014_v2, %v6013_v9  ;;  %v5773_v13 = vadd.f32 %v5747_v23, %v5557_v34  ;;  %v5344_v34 = vadd.f32 %v5322_v55, %v12407_v18  ;;  %v5346_v18 = vadd.f32 %v12435_v60, %v12414_v19 }
 0x6f6   : > { %v5989_v54 = vadd.f32 %v5963_v7, %v5773_v13  ;;  %v5978_v47 = vpop.f32.mrf.mxu0  ;;  %v5560_v28 = vadd.f32 %v12425_v26, %v5344_v34  ;;  %v10323_v34 = vld [vmem:[#allocation5 + $0x10] sm:$0xff] }
 0x6f8   : > { %v6004_v46 = vadd.f32 %v12448_v6, %v5989_v54  ;;  %v10317_v54 = vld [vmem:[%s12569_s6] sm:$0xff] }
 0x6fa   : > { %v6015_v27 = vmax.f32 %v6004_v46, 0.0  ;;  %v10343_v46 = vld [vmem:[#allocation5 + $0xb0] sm:$0xff] }
 0x6fb   : > { %v5749_v15 = vpop.f32.mrf.mxu2 }
 0x6fc   : > { %v5774_v12 = vadd.f32 %v5749_v15, %v5558_v29  ;;  %v10318_v29 = vld [vmem:[%s12569_s6 + $0x8] sm:$0xff]  ;;  %v10319_v15 = vld [vmem:[%s12569_s6 + $0x10] sm:$0xff] }
 0x6fe   : > { %v5990_v52 = vadd.f32 %v5965_v49, %v5774_v12  ;;  %v5980_v42 = vpop.f32.mrf.mxu0  ;;  %v5562_v49 = vadd.f32 %v12428_v25, %v5346_v18  ;;  %v10326_v12 = vld [vmem:[#allocation5 + $0x28] sm:$0xff]  ;;  %v10337_v18 = vld [vmem:[#allocation5 + $0x80] sm:$0xff] }
 0x700   : > { %v6005_v1 = vadd.f32 %v12448_v6, %v5990_v52  ;;  %v10325_v52 = vld [vmem:[#allocation5 + $0x20] sm:$0xff] }
 0x702   : > { %v6016_v11 = vmax.f32 %v6005_v1, 0.0  ;;  %v10334_v1 = vld [vmem:[#allocation5 + $0x68] sm:$0xff] }
 0x703   : > { %v5752_v20 = vpop.f32.mrf.mxu2 }
 0x704   : > { %v12459_v4 = vpack.c.bf16 %v6016_v11, %v6015_v27  ;;  %v5775_v44 = vadd.f32 %v5752_v20, %v5559_v48  ;;  %v10342_v27 = vld [vmem:[#allocation5 + $0xa8] sm:$0xff]  ;;  %v10324_v11 = vld [vmem:[#allocation5 + $0x18] sm:$0xff]  ;;  %v10333_v20 = vld [vmem:[#allocation5 + $0x60] sm:$0xff] }
 0x706   : > { %v5991_v59 = vadd.f32 %v5968_v16, %v5775_v44  ;;  %v5983_v51 = vpop.f32.mrf.mxu0  ;;  %v10341_v44 = vld [vmem:[#allocation5 + $0xa0] sm:$0xff] }
 0x708   : > { %v6006_v31 = vadd.f32 %v12448_v6, %v5991_v59  ;;  %v10332_v59 = vld [vmem:[#allocation5 + $0x58] sm:$0xff] }
 0x70a   : > { %v6017_v56 = vmax.f32 %v6006_v31, 0.0  ;;  %v10339_v31 = vld [vmem:[#allocation5 + $0x90] sm:$0xff] }
 0x70b   : > { %v5754_v33 = vpop.f32.mrf.mxu2 }
 0x70c   : > { %v5776_v63 = vadd.f32 %v5754_v33, %v5560_v28  ;;  %v10322_v28 = vld [vmem:[#allocation5 + $0x8] sm:$0xff]  ;;  %v10352_v33 = vld [vmem:[#allocation5 + $0xf8] sm:$0xff] }
 0x70e   : > { %v5992_v3 = vadd.f32 %v5970_v14, %v5776_v63  ;;  %v5985_v26 = vpop.f32.mrf.mxu0  ;;  %v10331_v63 = vld [vmem:[#allocation5 + $0x50] sm:$0xff] }
 0x70f   : > { %v10349_v26 = vld [vmem:[#allocation5 + $0xe0] sm:$0xff] }
 0x710   : > { %v6007_v17 = vadd.f32 %v12448_v6, %v5992_v3  ;;  %v10320_v3 = vld [vmem:[%s12569_s6 + $0x18] sm:$0xff] }
 0x712   : > { %v6018_v7 = vmax.f32 %v6007_v17, 0.0  ;;  %v10360_v17 = vld [vmem:[#allocation5 + $0x138] sm:$0xff] }
 0x713   : > { %v5757_v43 = vpop.f32.mrf.mxu2 }
 0x714   : > { %v12465_v38 = vpack.c.bf16 %v6018_v7, %v6017_v56  ;;  %v5777_v48 = vadd.f32 %v5757_v43, %v12433_v41  ;;  %v10351_v56 = vld [vmem:[#allocation5 + $0xf0] sm:$0xff]  ;;  %v10330_v7 = vld [vmem:[#allocation5 + $0x48] sm:$0xff] }
 0x715   : > { %v10359_v43 = vld [vmem:[#allocation5 + $0x130] sm:$0xff] }
 0x716   : > { %v5993_v55 = vadd.f32 %v5973_v35, %v5777_v48  ;;  %v10329_v48 = vld [vmem:[#allocation5 + $0x40] sm:$0xff] }
 0x718   : > { %v6008_v16 = vadd.f32 %v12448_v6, %v5993_v55  ;;  %v10368_v55 = vld [vmem:[#allocation5 + $0x178] sm:$0xff] }
 0x71a   : > { %v6019_v30 = vmax.f32 %v6008_v16, 0.0  ;;  %v10345_v16 = vld [vmem:[#allocation5 + $0xc0] sm:$0xff] }
 0x71b   : > { %v5759_v58 = vpop.f32.mrf.mxu2 }
 0x71c   : > { %v5778_v45 = vadd.f32 %v5759_v58, %v5562_v49  ;;  %v10348_v49 = vld [vmem:[#allocation5 + $0xd8] sm:$0xff]  ;;  %v10347_v58 = vld [vmem:[#allocation5 + $0xd0] sm:$0xff] }
 0x71e   : > { %v5994_v8 = vadd.f32 %v5975_v50, %v5778_v45  ;;  %v10346_v45 = vld [vmem:[#allocation5 + $0xc8] sm:$0xff] }
 0x720   : > { %v6009_v14 = vadd.f32 %v12448_v6, %v5994_v8  ;;  %v10384_v8 = vld [vmem:[#allocation5 + $0x1f8] sm:$0xff] }
 0x722   : > { %v6020_v10 = vmax.f32 %v6009_v14, 0.0  ;;  %v10367_v14 = vld [vmem:[#allocation5 + $0x170] sm:$0xff] }
 0x723   : > { %v5762_v22 = vpop.f32.mrf.mxu2 }
 0x724   : > { %v12473_v5 = vpack.c.bf16 %v6020_v10, %v6019_v30  ;;  %v5779_v41 = vadd.f32 %v5762_v22, %v12438_v61  ;;  %v10375_v30 = vld [vmem:[#allocation5 + $0x1b0] sm:$0xff]  ;;  %v10358_v22 = vld [vmem:[#allocation5 + $0x128] sm:$0xff] }
 0x725   : > { %v10383_v10 = vld [vmem:[#allocation5 + $0x1f0] sm:$0xff] }
 0x726   : > { %v5995_v40 = vadd.f32 %v5978_v47, %v5779_v41  ;;  %v10335_v47 = vld [vmem:[#allocation5 + $0x70] sm:$0xff]  ;;  %v10374_v41 = vld [vmem:[#allocation5 + $0x1a8] sm:$0xff] }
 0x728   : > { %v6010_v25 = vadd.f32 %v12448_v6, %v5995_v40  ;;  %v10382_v40 = vld [vmem:[#allocation5 + $0x1e8] sm:$0xff] }
 0x72a   : > { %v6021_v57 = vmax.f32 %v6010_v25, 0.0  ;;  %v10373_v25 = vld [vmem:[#allocation5 + $0x1a0] sm:$0xff] }
 0x72b   : > { %v5764_v19 = vpop.f32.mrf.mxu2 }
 0x72c   : > { %v5780_v60 = vadd.f32 %v5764_v19, %v12440_v62  ;;  %v10328_v62 = vld [vmem:[#allocation5 + $0x38] sm:$0xff]  ;;  %v10357_v19 = vld [vmem:[#allocation5 + $0x120] sm:$0xff] }
 0x72d   : > { %7209 = vmatpush.bf16.msrb.mxu0 %v10328_v62  ;;  %v10353_v62 = vld [vmem:[#allocation5 + $0x100] sm:$0xff] }
 0x72e   : > { %v5996_v35 = vadd.f32 %v5980_v42, %v5780_v60  ;;  %v10340_v42 = vld [vmem:[#allocation5 + $0x98] sm:$0xff]  ;;  %v10365_v60 = vld [vmem:[#allocation5 + $0x160] sm:$0xff] }
 0x730   : > { %v6011_v0 = vadd.f32 %v12448_v6, %v5996_v35  ;;  %v10381_v35 = vld [vmem:[#allocation5 + $0x1e0] sm:$0xff] }
 0x732   : > { %v6022_v21 = vmax.f32 %v6011_v0, 0.0  ;;  %v10356_v0 = vld [vmem:[#allocation5 + $0x118] sm:$0xff] }
 0x733   : > { %v5767_v36 = vpop.f32.mrf.mxu2 }
 0x734   : > { %v6028_v37 = vpack.c.bf16 %v6022_v21, %v6021_v57  ;;  %v5781_v9 = vadd.f32 %v5767_v36, %v12442_v53  ;;  %v10336_v53 = vld [vmem:[#allocation5 + $0x78] sm:$0xff] }
 0x735   : > { %v10364_v57 = vld [vmem:[#allocation5 + $0x158] sm:$0xff] }
 0x736   : > { %v5997_v2 = vadd.f32 %v5983_v51, %v5781_v9  ;;  %v10321_v51 = vld [vmem:[#allocation5] sm:$0xff]  ;;  %v10372_v21 = vld [vmem:[#allocation5 + $0x198] sm:$0xff]  ;;  %v10363_v9 = vld [vmem:[#allocation5 + $0x150] sm:$0xff] }
 0x737   : > { %v10380_v36 = vld [vmem:[#allocation5 + $0x1d8] sm:$0xff] }
 0x738   : > { %v6012_v50 = vadd.f32 %v12448_v6, %v5997_v2  ;;  %v10344_v6 = vld [vmem:[#allocation5 + $0xb8] sm:$0xff]  ;;  %v10371_v2 = vld [vmem:[#allocation5 + $0x190] sm:$0xff] }
 0x73a   : > { %v6023_v23 = vmax.f32 %v6012_v50, 0.0  ;;  %v10379_v50 = vld [vmem:[#allocation5 + $0x1d0] sm:$0xff] }
 0x73b   : > { %v5769_v61 = vpop.f32.mrf.mxu2 }
 0x73c   : > { %v6029_v13 = vpack.c.bf16 %v6023_v23, %v6023_v23  ;;  %v10354_v23 = vld [vmem:[#allocation5 + $0x108] sm:$0xff] }
 0x73d   : > { %v10362_v61 = vld [vmem:[#allocation5 + $0x148] sm:$0xff] }
 0x73e   : > { %v6041_v32 = vand.u32 %v6029_v13, %v10883_v24  ;;  %v10327_v24 = vld [vmem:[#allocation5 + $0x30] sm:$0xff]  ;;  %v10370_v13 = vld [vmem:[#allocation5 + $0x188] sm:$0xff] }
 0x73f   : > { %7210 = vmatpush.bf16.msrb.mxu0 %v10327_v24  ;;  %v10361_v24 = vld [vmem:[#allocation5 + $0x140] sm:$0xff] }
 0x740   : > { %6045 = vmatpush.bf16.msrb.mxu1 %v6041_v32  ;;  %6070 = vmatpush.bf16.msrb.mxu2 %v6041_v32 }
 0x741   : > { %6095 = vmatpush.bf16.msrb.mxu3 %v6041_v32 }
 0x743   : > { %7211 = vmatpush.bf16.msrb.mxu0 %v10326_v12 }
 0x744   : > { %6046 = vmatpush.bf16.msrb.mxu1 %v6028_v37  ;;  %6071 = vmatpush.bf16.msrb.mxu2 %v6028_v37 }
 0x745   : > { %6096 = vmatpush.bf16.msrb.mxu3 %v6028_v37 }
 0x747   : > { %7212 = vmatpush.bf16.msrb.mxu0 %v10325_v52 }
 0x748   : > { %6047 = vmatpush.bf16.msrb.mxu1 %v12473_v5  ;;  %6072 = vmatpush.bf16.msrb.mxu2 %v12473_v5 }
 0x749   : > { %6097 = vmatpush.bf16.msrb.mxu3 %v12473_v5 }
 0x74b   : > { %7213 = vmatpush.bf16.msrb.mxu0 %v10324_v11 }
 0x74c   : > { %6048 = vmatpush.bf16.msrb.mxu1 %v12465_v38  ;;  %6073 = vmatpush.bf16.msrb.mxu2 %v12465_v38 }
 0x74d   : > { %6098 = vmatpush.bf16.msrb.mxu3 %v12465_v38 }
 0x74f   : > { %7214 = vmatpush.bf16.msrb.mxu0 %v10323_v34 }
 0x750   : > { %6049 = vmatpush.bf16.msrb.mxu1 %v12459_v4  ;;  %6074 = vmatpush.bf16.msrb.mxu2 %v12459_v4 }
 0x751   : > { %6099 = vmatpush.bf16.msrb.mxu3 %v12459_v4 }
 0x753   : > { %7215 = vmatpush.bf16.msrb.mxu0 %v10322_v28 }
 0x754   : > { %6050 = vmatpush.bf16.msrb.mxu1 %v12453_v39  ;;  %6075 = vmatpush.bf16.msrb.mxu2 %v12453_v39 }
 0x755   : > { %6100 = vmatpush.bf16.msrb.mxu3 %v12453_v39 }
 0x757   : > { %9437 = vmatmul.msk.bf16.vlgmr.msrb.gmra.mxu1 %vm654_vm2, %v10317_v54  ;;  %9444 = vmatmul.msk.bf16.vlgmr.msrb.gmra.mxu2 %vm654_vm2, %v10318_v29 }
 0x758   : > { %6120 = vmatpush.bf16.msra.mxu1 %v6041_v32  ;;  %7222 = vmatpush.bf16.msra.mxu2 %v10336_v53  ;;  %v10378_v32 = vld [vmem:[#allocation5 + $0x1c8] sm:$0xff]  ;;  %v10369_v53 = vld [vmem:[#allocation5 + $0x180] sm:$0xff] }
 0x759   : > { %7235 = vmatpush.bf16.msra.mxu3 %v10344_v6  ;;  %7216 = vmatpush.bf16.msrb.mxu0 %v10321_v51  ;;  %v10377_v6 = vld [vmem:[#allocation5 + $0x1c0] sm:$0xff]  ;;  %v10399_v51 = vld [vmem:[#allocation5 + $0x270] sm:$0xff] }
 0x75a   : > { %9451 = vmatmul.msk.bf16.vlgmr.msrb.gmra.mxu3 %vm654_vm2, %v10319_v15 }
 0x75c   : > { %6121 = vmatpush.bf16.msra.mxu1 %v6028_v37  ;;  %7223 = vmatpush.bf16.msra.mxu2 %v10335_v47  ;;  %v10355_v37 = vld [vmem:[#allocation5 + $0x110] sm:$0xff] }
 0x75d   : > { %7236 = vmatpush.bf16.msra.mxu3 %v10343_v46  ;;  %7261 = vmatpush.bf16.msra.mxu0 %v10360_v17  ;;  %v10407_v17 = vld [vmem:[#allocation5 + $0x2b0] sm:$0xff] }
 0x760   : > { %6122 = vmatpush.bf16.msra.mxu1 %v12473_v5  ;;  %7224 = vmatpush.bf16.msra.mxu2 %v10334_v1  ;;  %v10366_v5 = vld [vmem:[#allocation5 + $0x168] sm:$0xff] }
 0x761   : > { %7237 = vmatpush.bf16.msra.mxu3 %v10342_v27  ;;  %7262 = vmatpush.bf16.msra.mxu0 %v10359_v43  ;;  %v10392_v27 = vld [vmem:[#allocation5 + $0x238] sm:$0xff]  ;;  %v10406_v43 = vld [vmem:[#allocation5 + $0x2a8] sm:$0xff] }
 0x764   : > { %6123 = vmatpush.bf16.msra.mxu1 %v12465_v38  ;;  %7225 = vmatpush.bf16.msra.mxu2 %v10333_v20  ;;  %v10350_v38 = vld [vmem:[#allocation5 + $0xe8] sm:$0xff] }
 0x765   : > { %7238 = vmatpush.bf16.msra.mxu3 %v10341_v44  ;;  %7263 = vmatpush.bf16.msra.mxu0 %v10358_v22 }
 0x768   : > { %6124 = vmatpush.bf16.msra.mxu1 %v12459_v4  ;;  %7226 = vmatpush.bf16.msra.mxu2 %v10332_v59  ;;  %v10338_v4 = vld [vmem:[#allocation5 + $0x88] sm:$0xff]  ;;  %v10400_v59 = vld [vmem:[#allocation5 + $0x278] sm:$0xff] }
 0x769   : > { %7239 = vmatpush.bf16.msra.mxu3 %v10340_v42  ;;  %7264 = vmatpush.bf16.msra.mxu0 %v10357_v19 }
 0x76c   : > { %6125 = vmatpush.bf16.msra.mxu1 %v12453_v39  ;;  %7227 = vmatpush.bf16.msra.mxu2 %v10331_v63  ;;  %v10376_v39 = vld [vmem:[#allocation5 + $0x1b8] sm:$0xff] }
 0x76d   : > { %7240 = vmatpush.bf16.msra.mxu3 %v10339_v31  ;;  %7265 = vmatpush.bf16.msra.mxu0 %v10356_v0  ;;  %v10408_v63 = vld [vmem:[#allocation5 + $0x2b8] sm:$0xff] }
 0x76e   : > { %v10416_v31 = vld [vmem:[#allocation5 + $0x2f8] sm:$0xff] }
 0x76f   : > { %9458 = vmatmul.msk.bf16.vlgmr.msra.gmra.mxu1 %vm654_vm2, %v10320_v3  ;;  %v10391_v3 = vld [vmem:[#allocation5 + $0x230] sm:$0xff] }
 0x770   : > { %7248 = vmatpush.bf16.msrb.mxu1 %v10352_v33  ;;  %7228 = vmatpush.bf16.msra.mxu2 %v10330_v7  ;;  %v10390_v7 = vld [vmem:[#allocation5 + $0x228] sm:$0xff] }
 0x771   : > { %7241 = vmatpush.bf16.msra.mxu3 %v10338_v4  ;;  %7266 = vmatpush.bf16.msra.mxu0 %v10355_v37  ;;  %v10398_v4 = vld [vmem:[#allocation5 + $0x268] sm:$0xff] }
 0x774   : > { %7249 = vmatpush.bf16.msrb.mxu1 %v10351_v56  ;;  %7229 = vmatpush.bf16.msra.mxu2 %v10329_v48  ;;  %v10415_v56 = vld [vmem:[#allocation5 + $0x2f0] sm:$0xff]  ;;  %v10389_v48 = vld [vmem:[#allocation5 + $0x220] sm:$0xff] }
 0x775   : > { %7242 = vmatpush.bf16.msra.mxu3 %v10337_v18  ;;  %7267 = vmatpush.bf16.msra.mxu0 %v10354_v23  ;;  %v10397_v18 = vld [vmem:[#allocation5 + $0x260] sm:$0xff]  ;;  %v10410_v23 = vld [vmem:[#allocation5 + $0x2c8] sm:$0xff] }
 0x778   : > { %7250 = vmatpush.bf16.msrb.mxu1 %v10350_v38  ;;  %7274 = vmatpush.bf16.msrb.mxu2 %v10368_v55  ;;  %v10414_v38 = vld [vmem:[#allocation5 + $0x2e8] sm:$0xff] }
 0x779   : > { %7287 = vmatpush.bf16.msrb.mxu3 %v10376_v39  ;;  %7268 = vmatpush.bf16.msra.mxu0 %v10353_v62  ;;  %v10405_v39 = vld [vmem:[#allocation5 + $0x2a0] sm:$0xff] }
 0x77a   : > { %v10401_v62 = vld [vmem:[#allocation5 + $0x280] sm:$0xff] }
 0x77c   : > { %7251 = vmatpush.bf16.msrb.mxu1 %v10349_v26  ;;  %7275 = vmatpush.bf16.msrb.mxu2 %v10367_v14  ;;  %v10413_v26 = vld [vmem:[#allocation5 + $0x2e0] sm:$0xff] }
 0x77d   : > { %7288 = vmatpush.bf16.msrb.mxu3 %v10375_v30  ;;  %v10396_v30 = vld [vmem:[#allocation5 + $0x258] sm:$0xff] }
 0x780   : > { %7252 = vmatpush.bf16.msrb.mxu1 %v10348_v49  ;;  %7276 = vmatpush.bf16.msrb.mxu2 %v10366_v5 }
 0x781   : > { %7289 = vmatpush.bf16.msrb.mxu3 %v10374_v41  ;;  %v10412_v41 = vld [vmem:[#allocation5 + $0x2d8] sm:$0xff] }
 0x784   : > { %7253 = vmatpush.bf16.msrb.mxu1 %v10347_v58  ;;  %7277 = vmatpush.bf16.msrb.mxu2 %v10365_v60  ;;  %v10395_v60 = vld [vmem:[#allocation5 + $0x250] sm:$0xff] }
 0x785   : > { %7290 = vmatpush.bf16.msrb.mxu3 %v10373_v25  ;;  %v10403_v25 = vld [vmem:[#allocation5 + $0x290] sm:$0xff] }
 0x788   : > { %7254 = vmatpush.bf16.msrb.mxu1 %v10346_v45  ;;  %7278 = vmatpush.bf16.msrb.mxu2 %v10364_v57  ;;  %v10411_v57 = vld [vmem:[#allocation5 + $0x2d0] sm:$0xff] }
 0x789   : > { %7291 = vmatpush.bf16.msrb.mxu3 %v10372_v21 }
 0x78c   : > { %7255 = vmatpush.bf16.msrb.mxu1 %v10345_v16  ;;  %7279 = vmatpush.bf16.msrb.mxu2 %v10363_v9  ;;  %v10388_v16 = vld [vmem:[#allocation5 + $0x218] sm:$0xff]  ;;  %v10394_v9 = vld [vmem:[#allocation5 + $0x248] sm:$0xff] }
 0x78d   : > { %7292 = vmatpush.bf16.msrb.mxu3 %v10371_v2  ;;  %v10402_v2 = vld [vmem:[#allocation5 + $0x288] sm:$0xff] }
 0x790   : > { %7300 = vmatpush.bf16.msra.mxu1 %v10384_v8  ;;  %7280 = vmatpush.bf16.msrb.mxu2 %v10362_v61  ;;  %v10385_v61 = vld [vmem:[#allocation5 + $0x200] sm:$0xff] }
 0x791   : > { %7293 = vmatpush.bf16.msrb.mxu3 %v10370_v13  ;;  %v10424_v13 = vld [vmem:[#allocation5 + $0x338] sm:$0xff] }
 0x794   : > { %7301 = vmatpush.bf16.msra.mxu1 %v10383_v10  ;;  %7281 = vmatpush.bf16.msrb.mxu2 %v10361_v24  ;;  %v10404_v10 = vld [vmem:[#allocation5 + $0x298] sm:$0xff]  ;;  %v10409_v24 = vld [vmem:[#allocation5 + $0x2c0] sm:$0xff] }
 0x795   : > { %7294 = vmatpush.bf16.msrb.mxu3 %v10369_v53  ;;  %v10432_v53 = vld [vmem:[#allocation5 + $0x378] sm:$0xff] }
 0x798   : > { %7302 = vmatpush.bf16.msra.mxu1 %v10382_v40  ;;  %v10387_v40 = vld [vmem:[#allocation5 + $0x210] sm:$0xff] }
 0x79c   : > { %7303 = vmatpush.bf16.msra.mxu1 %v10381_v35 }
 0x7a0   : > { %7304 = vmatpush.bf16.msra.mxu1 %v10380_v36  ;;  %v10386_v36 = vld [vmem:[#allocation5 + $0x208] sm:$0xff] }
 0x7a4   : > { %7305 = vmatpush.bf16.msra.mxu1 %v10379_v50 }
 0x7a8   : > { %7306 = vmatpush.bf16.msra.mxu1 %v10378_v32  ;;  %v10393_v32 = vld [vmem:[#allocation5 + $0x240] sm:$0xff] }
 0x7ac   : > { %7307 = vmatpush.bf16.msra.mxu1 %v10377_v6 }
 0x7d4   : > { %v6052_v54 = vpop.f32.mrf.mxu1 }
 0x7da   : > { %v6077_v15 = vpop.f32.mrf.mxu2 }
 0x7db   : > { %v6132_v46 = vmax.f32 %v6052_v54, %v6077_v15  ;;  %v10440_v54 = vld [vmem:[#allocation5 + $0x3b8] sm:$0xff] }
 0x7dc   : > { %v12514_v29 = vpop.f32.mrf.mxu1 }
 0x7dd   : > { %v6102_v12 = vpop.f32.mrf.mxu3 }
 0x7e2   : > { %v6079_v35 = vpop.f32.mrf.mxu2 }
 0x7e3   : > { %v6133_v37 = vmax.f32 %v12514_v29, %v6079_v35  ;;  %v10448_v29 = vld [vmem:[#allocation5 + $0x3f8] sm:$0xff] }
 0x7e5   : > { %v6104_v0 = vpop.f32.mrf.mxu3 }
 0x7ec   : > { %v6127_v47 = vpop.f32.mrf.mxu1 }
 0x7ed   : > { %v6134_v52 = vmax.f32 %v6102_v12, %v6127_v47  ;;  %v10423_v47 = vld [vmem:[#allocation5 + $0x330] sm:$0xff] }
 0x7ef   : > { %v6136_v1 = vmax.f32 %v6132_v46, %v6134_v52 }
 0x7f1   : > { %v6168_v11 = vpack.c.bf16 %v6136_v1, %v6136_v1  ;;  %v6139_v20 = vrot.slane %v6136_v1, 1  ;;  %v6141_v44 = vrot.slane %v6136_v1, 2  ;;  %v6143_v34 = vrot.slane %v6136_v1, 3 }
 0x7f2   : > { %v6145_v55 = vrot.slane %v6136_v1, 4  ;;  %v6147_v49 = vrot.slane %v6136_v1, 5  ;;  %v6149_v58 = vrot.slane %v6136_v1, 6  ;;  %v6151_v45 = vrot.slane %v6136_v1, 7  ;;  %v10431_v1 = vld [vmem:[#allocation5 + $0x370] sm:$0xff] }
 0x7f3   : > { %7217 = vmatmul.bf16.vlgmr.msrb.gmra.mxu0 %v6168_v11  ;;  %v6169_v42 = vpack.c.bf16 %v6139_v20, %v6139_v20  ;;  %v6170_v28 = vpack.c.bf16 %v6141_v44, %v6141_v44  ;;  %v6171_v33 = vpack.c.bf16 %v6143_v34, %v6143_v34  ;;  %v10439_v11 = vld [vmem:[#allocation5 + $0x3b0] sm:$0xff]  ;;  %v10422_v34 = vld [vmem:[#allocation5 + $0x328] sm:$0xff] }
 0x7f4   : > { %7313 = vmatpush.bf16.msrb.mxu0 %v10392_v27  ;;  %v6172_v8 = vpack.c.bf16 %v6145_v55, %v6145_v55  ;;  %v6173_v14 = vpack.c.bf16 %v6147_v49, %v6147_v49  ;;  %v6174_v22 = vpack.c.bf16 %v6149_v58, %v6149_v58  ;;  %v6175_v5 = vpack.c.bf16 %v6151_v45, %v6151_v45  ;;  %v6129_v19 = vpop.f32.mrf.mxu1  ;;  %v10447_v20 = vld [vmem:[#allocation5 + $0x3f0] sm:$0xff]  ;;  %v10426_v55 = vld [vmem:[#allocation5 + $0x348] sm:$0xff]  ;;  %v10417_v49 = vld [vmem:[#allocation5 + $0x300] sm:$0xff] }
 0x7f5   : > { %7230 = vmatmul.bf16.vlgmr.msra.gmra.mxu2 %v6169_v42  ;;  %7243 = vmatmul.bf16.vlgmr.msra.gmra.mxu3 %v6170_v28  ;;  %v6135_v21 = vmax.f32 %v6104_v0, %v6129_v19  ;;  %v10438_v42 = vld [vmem:[#allocation5 + $0x3a8] sm:$0xff]  ;;  %v10425_v58 = vld [vmem:[#allocation5 + $0x340] sm:$0xff] }
 0x7f6   : > { %7256 = vmatmul.bf16.vlgmr.msrb.gmra.mxu1 %v6171_v33  ;;  %7326 = vmatpush.bf16.msra.mxu2 %v10400_v59  ;;  %v10430_v59 = vld [vmem:[#allocation5 + $0x368] sm:$0xff]  ;;  %v10421_v33 = vld [vmem:[#allocation5 + $0x320] sm:$0xff] }
 0x7f7   : > { %7339 = vmatpush.bf16.msra.mxu3 %v10408_v63  ;;  %7352 = vmatpush.bf16.msrb.mxu1 %v10416_v31  ;;  %v12517_v50 = vmax.f32 %v6133_v37, %v6135_v21  ;;  %v10446_v28 = vld [vmem:[#allocation5 + $0x3e8] sm:$0xff]  ;;  %v10429_v63 = vld [vmem:[#allocation5 + $0x360] sm:$0xff] }
 0x7f8   : > { %7314 = vmatpush.bf16.msrb.mxu0 %v10391_v3  ;;  %v10437_v31 = vld [vmem:[#allocation5 + $0x3a0] sm:$0xff] }
 0x7f9   : > { %v6154_v6 = vrot.slane %v12517_v50, 1  ;;  %v6156_v15 = vrot.slane %v12517_v50, 2  ;;  %v6158_v12 = vrot.slane %v12517_v50, 3  ;;  %v6176_v46 = vpack.c.bf16 %v12517_v50, %v12517_v50  ;;  %v10445_v3 = vld [vmem:[#allocation5 + $0x3e0] sm:$0xff] }
 0x7fa   : > { %7327 = vmatpush.bf16.msra.mxu2 %v10399_v51  ;;  %v10420_v51 = vld [vmem:[#allocation5 + $0x318] sm:$0xff]  ;;  %v6160_v45 = vrot.slane %v12517_v50, 4 }
 0x7fb   : > { %7340 = vmatpush.bf16.msra.mxu3 %v10407_v17  ;;  %7353 = vmatpush.bf16.msrb.mxu1 %v10415_v56  ;;  %v6177_v52 = vpack.c.bf16 %v6154_v6, %v6154_v6  ;;  %v6178_v27 = vpack.c.bf16 %v6156_v15, %v6156_v15  ;;  %v6179_v44 = vpack.c.bf16 %v6158_v12, %v6158_v12  ;;  %v10428_v17 = vld [vmem:[#allocation5 + $0x358] sm:$0xff] }
 0x7fc   : > { %7315 = vmatpush.bf16.msrb.mxu0 %v10390_v7  ;;  %v10436_v56 = vld [vmem:[#allocation5 + $0x398] sm:$0xff] }
 0x7fd   : > { %v10444_v7 = vld [vmem:[#allocation5 + $0x3d8] sm:$0xff] }
 0x7fe   : > { %7328 = vmatpush.bf16.msra.mxu2 %v10398_v4  ;;  %v10419_v4 = vld [vmem:[#allocation5 + $0x310] sm:$0xff] }
 0x7ff   : > { %7341 = vmatpush.bf16.msra.mxu3 %v10406_v43  ;;  %7354 = vmatpush.bf16.msrb.mxu1 %v10414_v38  ;;  %v10427_v43 = vld [vmem:[#allocation5 + $0x350] sm:$0xff] }
 0x800   : > { %7316 = vmatpush.bf16.msrb.mxu0 %v10389_v48  ;;  %v10435_v38 = vld [vmem:[#allocation5 + $0x390] sm:$0xff] }
 0x801   : > { %v10443_v48 = vld [vmem:[#allocation5 + $0x3d0] sm:$0xff] }
 0x802   : > { %7329 = vmatpush.bf16.msra.mxu2 %v10397_v18  ;;  %v10418_v18 = vld [vmem:[#allocation5 + $0x308] sm:$0xff] }
 0x803   : > { %7342 = vmatpush.bf16.msra.mxu3 %v10405_v39  ;;  %7355 = vmatpush.bf16.msrb.mxu1 %v10413_v26  ;;  %v10434_v39 = vld [vmem:[#allocation5 + $0x388] sm:$0xff] }
 0x804   : > { %7269 = vmatmul.bf16.vlgmr.msra.gmra.mxu0 %v6172_v8  ;;  %v10442_v26 = vld [vmem:[#allocation5 + $0x3c8] sm:$0xff]  ;;  %v10441_v8 = vld [vmem:[#allocation5 + $0x3c0] sm:$0xff] }
 0x805   : > { %7317 = vmatpush.bf16.msrb.mxu0 %v10388_v16  ;;  %7282 = vmatmul.bf16.vlgmr.msrb.gmra.mxu2 %v6173_v14  ;;  %v10433_v16 = vld [vmem:[#allocation5 + $0x380] sm:$0xff]  ;;  %v6162_v14 = vrot.slane %v12517_v50, 5 }
 0x806   : > { %7295 = vmatmul.bf16.vlgmr.msrb.gmra.mxu3 %v6174_v22  ;;  %7308 = vmatmul.bf16.vlgmr.msra.gmra.mxu1 %v6175_v5  ;;  %v6180_v22 = vpack.c.bf16 %v6160_v45, %v6160_v45 }
 0x807   : > { %7330 = vmatpush.bf16.msra.mxu2 %v10396_v30  ;;  %7343 = vmatpush.bf16.msra.mxu3 %v10404_v10  ;;  %v6164_v30 = vrot.slane %v12517_v50, 6  ;;  %v6166_v10 = vrot.slane %v12517_v50, 7  ;;  %v6181_v5 = vpack.c.bf16 %v6162_v14, %v6162_v14 }
 0x808   : > { %7356 = vmatpush.bf16.msrb.mxu1 %v10412_v41 }
 0x809   : > { %7318 = vmatpush.bf16.msrb.mxu0 %v10387_v40  ;;  %v6182_v41 = vpack.c.bf16 %v6164_v30, %v6164_v30  ;;  %v6183_v40 = vpack.c.bf16 %v6166_v10, %v6166_v10 }
 0x80b   : > { %7331 = vmatpush.bf16.msra.mxu2 %v10395_v60  ;;  %7344 = vmatpush.bf16.msra.mxu3 %v10403_v25 }
 0x80c   : > { %7357 = vmatpush.bf16.msrb.mxu1 %v10411_v57 }
 0x80d   : > { %7319 = vmatpush.bf16.msrb.mxu0 %v10386_v36 }
 0x80f   : > { %7332 = vmatpush.bf16.msra.mxu2 %v10394_v9  ;;  %7345 = vmatpush.bf16.msra.mxu3 %v10402_v2 }
 0x810   : > { %7358 = vmatpush.bf16.msrb.mxu1 %v10410_v23 }
 0x811   : > { %7320 = vmatpush.bf16.msrb.mxu0 %v10385_v61 }
 0x813   : > { %7333 = vmatpush.bf16.msra.mxu2 %v10393_v32  ;;  %7346 = vmatpush.bf16.msra.mxu3 %v10401_v62 }
 0x814   : > { %7359 = vmatpush.bf16.msrb.mxu1 %v10409_v24  ;;  %7321 = vmatmul.bf16.vlgmr.msrb.gmra.mxu0 %v6176_v46 }
 0x815   : > { %7365 = vmatpush.bf16.msra.mxu0 %v10424_v13  ;;  %v6440_v13 = vld [vmem:[%s12571_s8] sm:$0x1] }
 0x816   : > { %7334 = vmatmul.bf16.vlgmr.msra.gmra.mxu2 %v6177_v52  ;;  %7347 = vmatmul.bf16.vlgmr.msra.gmra.mxu3 %v6178_v27 }
 0x817   : > { %7378 = vmatpush.bf16.msrb.mxu2 %v10432_v53  ;;  %7391 = vmatpush.bf16.msrb.mxu3 %v10440_v54 }
 0x818   : > { %7404 = vmatpush.bf16.msra.mxu1 %v10448_v29 }
 0x819   : > { %7366 = vmatpush.bf16.msra.mxu0 %v10423_v47  ;;  %7360 = vmatmul.bf16.vlgmr.msrb.gmra.mxu1 %v6179_v44 }
 0x81b   : > { %7379 = vmatpush.bf16.msrb.mxu2 %v10431_v1  ;;  %7392 = vmatpush.bf16.msrb.mxu3 %v10439_v11 }
 0x81c   : > { %7405 = vmatpush.bf16.msra.mxu1 %v10447_v20 }
 0x81d   : > { %7367 = vmatpush.bf16.msra.mxu0 %v10422_v34 }
 0x81f   : > { %7380 = vmatpush.bf16.msrb.mxu2 %v10430_v59  ;;  %7393 = vmatpush.bf16.msrb.mxu3 %v10438_v42 }
 0x820   : > { %7406 = vmatpush.bf16.msra.mxu1 %v10446_v28 }
 0x821   : > { %7368 = vmatpush.bf16.msra.mxu0 %v10421_v33 }
 0x823   : > { %7381 = vmatpush.bf16.msrb.mxu2 %v10429_v63  ;;  %7394 = vmatpush.bf16.msrb.mxu3 %v10437_v31 }
 0x824   : > { %7407 = vmatpush.bf16.msra.mxu1 %v10445_v3 }
 0x825   : > { %7369 = vmatpush.bf16.msra.mxu0 %v10420_v51 }
 0x827   : > { %7382 = vmatpush.bf16.msrb.mxu2 %v10428_v17  ;;  %7395 = vmatpush.bf16.msrb.mxu3 %v10436_v56 }
 0x828   : > { %7408 = vmatpush.bf16.msra.mxu1 %v10444_v7 }
 0x829   : > { %7370 = vmatpush.bf16.msra.mxu0 %v10419_v4 }
 0x82b   : > { %7383 = vmatpush.bf16.msrb.mxu2 %v10427_v43  ;;  %7396 = vmatpush.bf16.msrb.mxu3 %v10435_v38 }
 0x82c   : > { %7409 = vmatpush.bf16.msra.mxu1 %v10443_v48 }
 0x82d   : > { %7371 = vmatpush.bf16.msra.mxu0 %v10418_v18 }
 0x82f   : > { %7384 = vmatpush.bf16.msrb.mxu2 %v10426_v55  ;;  %7397 = vmatpush.bf16.msrb.mxu3 %v10434_v39 }
 0x830   : > { %7410 = vmatpush.bf16.msra.mxu1 %v10442_v26 }
 0x831   : > { %7372 = vmatpush.bf16.msra.mxu0 %v10417_v49 }
 0x833   : > { %7385 = vmatpush.bf16.msrb.mxu2 %v10425_v58  ;;  %7398 = vmatpush.bf16.msrb.mxu3 %v10433_v16 }
 0x834   : > { %7411 = vmatpush.bf16.msra.mxu1 %v10441_v8  ;;  %7373 = vmatmul.bf16.vlgmr.msra.gmra.mxu0 %v6180_v22 }
 0x836   : > { %7386 = vmatmul.bf16.vlgmr.msrb.gmra.mxu2 %v6181_v5  ;;  %7399 = vmatmul.bf16.vlgmr.msrb.gmra.mxu3 %v6182_v41 }
 0x837   : > { %7412 = vmatmul.bf16.vlgmr.msra.gmra.mxu1 %v6183_v40 }
 0x870   : > { %v7218_v19 = vpop.f32.mrf.mxu0 }
 0x871   : > { %v7219_v62 = vadd.f32 %v7218_v19, %v6440_v13 }
 0x873   : > { %v7257_v60 = vpop.f32.mrf.mxu1 }
 0x878   : > { %v7220_v25 = vpop.f32.mrf.mxu0  ;;  %v7231_v35 = vpop.f32.mrf.mxu2 }
 0x879   : > { %v7244_v0 = vpop.f32.mrf.mxu3  ;;  %v7232_v53 = vadd.f32 %v7231_v35, %v7219_v62 }
 0x87b   : > { %v7259_v57 = vpop.f32.mrf.mxu1  ;;  %v7245_v29 = vadd.f32 %v7244_v0, %v7232_v53 }
 0x87d   : > { %v7258_v47 = vadd.f32 %v7257_v60, %v7245_v29 }
 0x880   : > { %v7233_v21 = vpop.f32.mrf.mxu2 }
 0x881   : > { %v7246_v36 = vpop.f32.mrf.mxu3  ;;  %v7270_v37 = vpop.f32.mrf.mxu0 }
 0x882   : > { %v7271_v52 = vadd.f32 %v7270_v37, %v7258_v47 }
 0x883   : > { %v7309_v9 = vpop.f32.mrf.mxu1 }
 0x888   : > { %v7283_v2 = vpop.f32.mrf.mxu2 }
 0x889   : > { %v7272_v50 = vpop.f32.mrf.mxu0  ;;  %v7296_v23 = vpop.f32.mrf.mxu3  ;;  %v7284_v27 = vadd.f32 %v7283_v2, %v7271_v52 }
 0x88b   : > { %v7311_v61 = vpop.f32.mrf.mxu1  ;;  %v7297_v44 = vadd.f32 %v7296_v23, %v7284_v27 }
 0x88d   : > { %v7310_v34 = vadd.f32 %v7309_v9, %v7297_v44 }
 0x890   : > { %v7285_v32 = vpop.f32.mrf.mxu2 }
 0x891   : > { %v7298_v24 = vpop.f32.mrf.mxu3  ;;  %v7322_v6 = vpop.f32.mrf.mxu0 }
 0x892   : > { %v7323_v59 = vadd.f32 %v7322_v6, %v7310_v34 }
 0x896   : > { %v7361_v54 = vpop.f32.mrf.mxu1 }
 0x899   : > { %v7335_v15 = vpop.f32.mrf.mxu2  ;;  %v7348_v12 = vpop.f32.mrf.mxu3 }
 0x89a   : > { %v7324_v46 = vpop.f32.mrf.mxu0  ;;  %v7336_v42 = vadd.f32 %v7335_v15, %v7323_v59 }
 0x89c   : > { %v7349_v28 = vadd.f32 %v7348_v12, %v7336_v42 }
 0x89e   : > { %v7363_v1 = vpop.f32.mrf.mxu1  ;;  %v7362_v31 = vadd.f32 %v7361_v54, %v7349_v28 }
 0x8a1   : > { %v7337_v11 = vpop.f32.mrf.mxu2  ;;  %v7350_v20 = vpop.f32.mrf.mxu3 }
 0x8b1   : > { %v7374_v33 = vpop.f32.mrf.mxu0 }
 0x8b2   : > { %v7375_v3 = vadd.f32 %v7374_v33, %v7362_v31 }
 0x8b4   : > { %v7413_v63 = vpop.f32.mrf.mxu1 }
 0x8b9   : > { %v7387_v51 = vpop.f32.mrf.mxu2  ;;  %v7376_v17 = vpop.f32.mrf.mxu0 }
 0x8ba   : > { %v7388_v56 = vadd.f32 %v7387_v51, %v7375_v3  ;;  %v7400_v7 = vpop.f32.mrf.mxu3 }
 0x8bc   : > { %v7401_v4 = vadd.f32 %v7400_v7, %v7388_v56  ;;  %v7415_v43 = vpop.f32.mrf.mxu1 }
 0x8be   : > { %v7414_v38 = vadd.f32 %v7413_v63, %v7401_v4 }
 0x8c0   : > { %7417 = vst [vmem:[%s358_s17] sm:$0x1] %v7414_v38 }
 0x8c1   : > { %v7389_v48 = vpop.f32.mrf.mxu2 }
 0x8c2   : > { %10602 = shalt.err (!%p10599_p8)
}
 0x8c3   : > { %10458 = dma.vmem_to_hbm [thread:$0]  (%p10740_p5), %s7430_s22, 16, %s7432_s23, %s7419_s24   ;;  %v7402_v18 = vpop.f32.mrf.mxu3 }
 0x8c4 PF: > { %p10475_p9 = scmp.ge.s32.totalorder %s10645_s12, 2  ;;  %s7443_s28 = sand.u32 1, %s10633_s30  }
 0x8c5   : > { %s7444_s16 = scalar_lea.sflag [#allocation4], %s7443_s28 }
 0x8c6   : > { %p10468_p10 = pnand %p10475_p9, %p10744_p6 }
 0x8c8   : > { %p10469_p11 = pneg %p10468_p10 }
 0x8ca   : > { %10628 = dma.done.wait (%p10469_p11), %s7444_s16, 16  }
 0x8cb   : > { %10630 = vsyncadd (%p10469_p11), %s7444_s16, 4294967280  ;;  %p21_p12 = scmp.ge.s32.totalorder %s10727_s15, 4   ;;  %s12576_s30 = smov %s10637_s10 }
 0x8cc   : > { %s12577_s10 = smov %s10641_s11  ;;  %s12578_s11 = smov %s10738_s18 }
 0x8cd   : > { %s12579_s12 = smov %s10727_s15  ;;  %23 = sbr.rel (!%p21_p12) target bundleno = 5 (0x5), region = 151 }
 0x8d2   :  { %7449 = vsyncpa [#allocation3], 1 }
 0x8d3   :  { %7451 = vsyncpa [#allocation3 + $0x1], 1 }
 0x8d4   :  { %7452 = vsyncpa [#allocation6], 1 }
 0x8d5   :  { %7453 = vsyncpa [#allocation4], 1 }
 0x8d6   :  { %7455 = vsyncpa [#allocation4 + $0x1], 1 }

</bundles_post_ra>
